<compile_context>
chip_gen: v6e
topology: v6e:2x2x1
jax: 0.10.0
libtpu: 0.0.40
codegen_flags: <defaults>
</compile_context>

<pallas_src>
import functools

import jax
import jax.numpy as jnp
from jax.experimental import pallas as pl
from jax.experimental.pallas import tpu as pltpu


# ---------------------------------------------------------------------------
# Fused ResBlock kernel  (layouts: (1, C, lanes) — time on the lane axis)
# ---------------------------------------------------------------------------
def _resblock_kernel(xl_ref, xc_ref, xr_ref, w_ref, b_ref, o_ref, *,
                     k, n_blocks, seq_len, tile_t, halo_block):
    # xl_ref/xr_ref: (1, C, HB)  lane-aligned blocks left/right of the tile (clamped)
    # xc_ref       : (1, C, TT)  center tile
    # w_ref        : (2*n_blocks, K, C_out, C_in) bf16, VMEM-resident across the grid
    # b_ref        : (2*n_blocks, C_out, 1) f32
    # o_ref        : (1, C, TT)
    p = k // 2
    TT = tile_t
    HB = halo_block
    C = xc_ref.shape[1]
    W = TT + 2 * HB
    t = pl.program_id(1)

    # Assemble the halo'd window once (all pieces are lane-aligned -> cheap concat).
    win = jnp.concatenate([xl_ref[0], xc_ref[0], xr_ref[0]], axis=-1)        # (C, W)

    # Columns whose global time position falls outside [0, seq_len) must behave exactly
    # like the zero padding Conv1d(padding=k//2) applies at the array boundary; this also
    # zeroes the clamped duplicate halo data at t = 0 / t = nT-1.
    g = t * TT - HB + jax.lax.broadcasted_iota(jnp.int32, (1, W), 1)          # (1, W)
    mask = jnp.logical_and(g >= 0, g < seq_len)

    x = jnp.where(mask, win, 0.0)                    # f32 residual carrier (C, W)
    zpad = jnp.zeros((C, p), jnp.bfloat16)

    ci = 0
    for _ in range(n_blocks):
        h = x.astype(jnp.bfloat16)                   # bf16 through the data-movement chain
        for _ in range(2):                           # each res block = 2 convs (module spec)
            # Per-tap matmuls on the MXU with f32 accumulation; shifted taps are static
            # lane slices of a small zero-padded bf16 copy (no (W, K*C) unfold slab).
            hp = jnp.concatenate([zpad, h, zpad], axis=1)                     # (C, W + 2p)
            acc = jnp.dot(w_ref[ci, p], h, preferred_element_type=jnp.float32)
            for j in range(k):
                if j == p:
                    continue
                acc = acc + jnp.dot(w_ref[ci, j], hp[:, j:j + W],
                                    preferred_element_type=jnp.float32)       # (C, W) f32
            # bias + ReLU in f32 on the VPU, then re-impose the array-boundary zero
            # padding so the next conv sees exactly what Conv1d would see.
            acc = jnp.where(mask, jnp.maximum(acc + b_ref[ci], 0.0), 0.0)
            h = acc.astype(jnp.bfloat16)
            ci += 1
        x = x + acc                                  # fused residual add (f32)

    # Central TT columns are exact: window-edge effects reach at most
    # H = 2*n_blocks*(k//2) <= HB columns in from either window edge.
    o_ref[0] = x[:, HB:HB + TT].astype(o_ref.dtype)  # lane-dense store (last dim = TT)


# ---------------------------------------------------------------------------
# VMEM sizing / tiling heuristics
# ---------------------------------------------------------------------------
def _vmem_bytes(C, TT, HB, k, n_convs):
    p = k // 2
    W = TT + 2 * HB
    weights = 2 * n_convs * k * C * C * 2              # bf16 weights, double-buffered
    io = 2 * 2 * C * TT * 4 + 2 * 2 * C * HB * 4       # dbl-buffered center in/out + halos
    temps = 10 * C * (W + 2 * p) * 2 + 4 * C * W * 4   # bf16 pad/slice copies + f32 acc/x
    return int(weights + io + temps)


def _choose_tiling(T, C, k, n_convs, H, tile_t):
    if T % 128 != 0 or H > 128:
        # Ragged-T / very-large-kernel fallback: one tile spanning the whole sequence.
        # TODO(synk): a ragged last tile would avoid the W = 3*T window for odd T.
        assert H <= T, "sequence shorter than the ResBlock receptive-field halo"
        assert tile_t is None or int(tile_t) == T
        return T, T, 1
    HB = 128                                           # lane-aligned halo block
    if tile_t is not None:
        TT = int(tile_t)
        assert TT % 128 == 0 and T % TT == 0, \
            f"tile_t={TT} must be a multiple of 128 that divides T={T}"
        return TT, HB, T // TT
    # Largest tile (<= 2048 cols, multiple of 128, dividing T) fitting a ~44 MiB budget
    # (keeps headroom inside v7x's 64 MiB VMEM; v5e/v6e simply benefit from bigger tiles).
    best, budget = 128, 44 * 1024 * 1024
    for cand in range(128, min(T, 2048) + 1, 128):
        if T % cand == 0 and _vmem_bytes(C, cand, HB, k, n_convs) <= budget:
            best = cand
    return best, HB, T // best


# ---------------------------------------------------------------------------
# Wrapper
# ---------------------------------------------------------------------------
def resblock_forward(blocks, x_ncw, *, kernel_size, tile_t=None):
    """blocks: list of (w1, b1, w2, b2); w: (C_out, C_in, K) effective (weight-normed)
    Conv1d weight in torch layout, b: (C,).  x_ncw: (B, C, T) float32 (PyTorch NCW).
    Returns (B, C, T) float32."""
    k = int(kernel_size)
    assert k % 2 == 1 and k >= 3, "kernel_size must be odd and >= 3"
    n_blocks = len(blocks)
    n_convs = 2 * n_blocks
    p = k // 2
    H = n_convs * p                                    # receptive-field halo of the chain

    B, C, T = x_ncw.shape
    x = x_ncw.astype(jnp.float32)                      # NCW used directly: no HBM transpose

    TT, HB, nT = _choose_tiling(T, C, k, n_convs, H, tile_t)
    # v7x megacore: keep the grid evenly splittable across 2 TensorCores when possible.
    if tile_t is None and (B * nT) % 2 == 1 and TT % 256 == 0:
        TT //= 2
        nT *= 2
    r = TT // HB
    n_hb = T // HB

    # Fused weights (n_convs, K, C_out, C_in) bf16; biases (n_convs, C_out, 1) f32.
    w_all = jnp.stack([jnp.transpose(w, (2, 0, 1))
                       for blk in blocks for w in (blk[0], blk[2])]).astype(jnp.bfloat16)
    b_all = jnp.stack([b.reshape(C, 1).astype(jnp.float32)
                       for blk in blocks for b in (blk[1], blk[3])])

    est = _vmem_bytes(C, TT, HB, k, n_convs)
    vmem_limit = int(min(max(est * 5 // 4, 32 * 1024 * 1024), 64 * 1024 * 1024))

    kernel = functools.partial(_resblock_kernel, k=k, n_blocks=n_blocks,
                               seq_len=T, tile_t=TT, halo_block=HB)
    out = pl.pallas_call(
        kernel,
        out_shape=jax.ShapeDtypeStruct((B, C, T), jnp.float32),
        grid=(B, nT),
        in_specs=[
            # left / right halo blocks of the SAME array (clamped; masked in-kernel)
            pl.BlockSpec((1, C, HB), lambda b, t: (b, 0, jnp.maximum(t * r - 1, 0))),
            # center tile
            pl.BlockSpec((1, C, TT), lambda b, t: (b, 0, t)),
            pl.BlockSpec((1, C, HB),
                         lambda b, t: (b, 0, jnp.minimum((t + 1) * r, n_hb - 1))),
            # conv weights / biases: grid-invariant index_map -> fetched once, reused
            # from the same VMEM buffers for the whole grid.
            pl.BlockSpec((n_convs, k, C, C), lambda b, t: (0, 0, 0, 0)),
            pl.BlockSpec((n_convs, C, 1), lambda b, t: (0, 0, 0)),
        ],
        out_specs=pl.BlockSpec((1, C, TT), lambda b, t: (b, 0, t)),
        compiler_params=pltpu.CompilerParams(
            dimension_semantics=("parallel", "parallel"),   # megacore split on v7x
            vmem_limit_bytes=vmem_limit),
    )(x, x, x, w_all, b_all)
    return out


# ---------------------------------------------------------------------------
# Deterministic synthetic params (effective weight-normed weights, torch layout)
# ---------------------------------------------------------------------------
def init_resblock_params(key, channels, kernel_size, n_blocks=2):
    keys = jax.random.split(key, 4 * n_blocks)
    scale = (channels * kernel_size) ** -0.5
    blocks, i = [], 0
    for _ in range(n_blocks):
        w1 = scale * jax.random.normal(keys[i], (channels, channels, kernel_size), jnp.float32)
        b1 = 0.01 * jax.random.normal(keys[i + 1], (channels,), jnp.float32)
        w2 = scale * jax.random.normal(keys[i + 2], (channels, channels, kernel_size), jnp.float32)
        b2 = 0.01 * jax.random.normal(keys[i + 3], (channels,), jnp.float32)
        blocks.append((w1, b1, w2, b2))
        i += 4
    return blocks


# ---------------------------------------------------------------------------
# Pure-JAX reference (mirrors the kernel numerics: bf16 matmul operands, f32 accumulation)
# ---------------------------------------------------------------------------
def _conv_relu_ref(x, w, b, k):
    B, C, T = x.shape
    p = k // 2
    xp = jnp.pad(x, ((0, 0), (0, 0), (p, p))).astype(jnp.bfloat16)
    acc = jnp.zeros((B, w.shape[0], T), jnp.float32)
    for j in range(k):
        acc = acc + jnp.einsum("oc,bct->bot", w[:, :, j].astype(jnp.bfloat16),
                               xp[:, :, j:j + T],
                               preferred_element_type=jnp.float32)
    return jnp.maximum(acc + b[None, :, None], 0.0)


def resblock_ref(blocks, x_ncw, *, kernel_size):
    x = x_ncw.astype(jnp.float32)
    for (w1, b1, w2, b2) in blocks:
        h = _conv_relu_ref(x, w1, b1, kernel_size)
        h = _conv_relu_ref(h, w2, b2, kernel_size)
        x = x + h
    return x


# ---------------------------------------------------------------------------
if __name__ == "__main__":
    B, C, T = 2, 64, 256
    kernel_size, n_blocks = 3, 2

    key = jax.random.PRNGKey(0)
    pkey, xkey = jax.random.split(key)
    blocks = init_resblock_params(pkey, C, kernel_size, n_blocks)
    x = jax.random.normal(xkey, (B, C, T), jnp.float32)

    # tile_t=128 -> a (B=2, nT=2) grid so both the real-data and the clamped/masked
    # cross-tile halo paths are exercised.
    fwd = jax.jit(functools.partial(resblock_forward, kernel_size=kernel_size, tile_t=128))
    out = fwd(blocks, x)
    jax.block_until_ready(out)
    assert out.shape == (B, C, T)

    ref = resblock_ref(blocks, x, kernel_size=kernel_size)
    max_err = float(jnp.max(jnp.abs(out - ref)))
    assert max_err < 1e-2, f"kernel/reference mismatch: max abs err = {max_err}"
    print("KERNEL_OK")
</pallas_src>

<mosaic_0001>
module attributes {stable_mosaic.version = 11 : i64} {
  func.func @_resblock_kernel(%arg0: i32, %arg1: i32, %arg2: memref<1x64x128xf32, #tpu.memory_space<vmem>>, %arg3: memref<1x64x128xf32, #tpu.memory_space<vmem>>, %arg4: memref<1x64x128xf32, #tpu.memory_space<vmem>>, %arg5: memref<4x3x64x64xbf16, #tpu.memory_space<vmem>>, %arg6: memref<4x64x1xf32, #tpu.memory_space<vmem>>, %arg7: memref<1x64x128xf32, #tpu.memory_space<vmem>>) attributes {dimension_semantics = [#tpu.dimension_semantics<parallel>, #tpu.dimension_semantics<parallel>], iteration_bounds = array<i64: 2, 2>, scalar_prefetch = 0 : i64, scratch_operands = 0 : i64, tpu.core_type = #tpu.core_type<tc>, window_params = [{transform_indices = @transform_0, window_bounds = array<i64: 1, 64, 128>}, {transform_indices = @transform_1, window_bounds = array<i64: 1, 64, 128>}, {transform_indices = @transform_2, window_bounds = array<i64: 1, 64, 128>}, {pipeline_mode = #tpu.pipeline_mode<synchronous>, transform_indices = @transform_3, window_bounds = array<i64: 4, 3, 64, 64>}, {pipeline_mode = #tpu.pipeline_mode<synchronous>, transform_indices = @transform_4, window_bounds = array<i64: 4, 64, 1>}, {transform_indices = @transform_5, window_bounds = array<i64: 1, 64, 128>}]} {
    %c0 = arith.constant 0 : index
    %c0_0 = arith.constant 0 : index
    %c0_1 = arith.constant 0 : index
    %0 = vector.load %arg2[%c0, %c0_0, %c0_1] : memref<1x64x128xf32, #tpu.memory_space<vmem>>, vector<1x64x128xf32>
    %1 = vector.shape_cast %0 : vector<1x64x128xf32> to vector<64x128xf32>
    %c0_2 = arith.constant 0 : index
    %c0_3 = arith.constant 0 : index
    %c0_4 = arith.constant 0 : index
    %2 = vector.load %arg3[%c0_2, %c0_3, %c0_4] : memref<1x64x128xf32, #tpu.memory_space<vmem>>, vector<1x64x128xf32>
    %3 = vector.shape_cast %2 : vector<1x64x128xf32> to vector<64x128xf32>
    %c0_5 = arith.constant 0 : index
    %c0_6 = arith.constant 0 : index
    %c0_7 = arith.constant 0 : index
    %4 = vector.load %arg4[%c0_5, %c0_6, %c0_7] : memref<1x64x128xf32, #tpu.memory_space<vmem>>, vector<1x64x128xf32>
    %5 = vector.shape_cast %4 : vector<1x64x128xf32> to vector<64x128xf32>
    %6 = tpu.concatenate %1, %3, %5 in 1 : vector<64x128xf32>, vector<64x128xf32>, vector<64x128xf32> -> vector<64x384xf32>
    %c128_i32 = arith.constant 128 : i32
    %7 = arith.muli %arg1, %c128_i32 : i32
    %c128_i32_8 = arith.constant 128 : i32
    %8 = arith.subi %7, %c128_i32_8 : i32
    %9 = tpu.iota {dimensions = array<i32: 1>} : vector<1x384xi32>
    %10 = vector.broadcast %8 : i32 to vector<1x384xi32>
    %11 = arith.addi %10, %9 : vector<1x384xi32>
    %c0_i32 = arith.constant 0 : i32
    %12 = vector.broadcast %c0_i32 : i32 to vector<1x384xi32>
    %13 = arith.cmpi sge, %11, %12 : vector<1x384xi32>
    %c256_i32 = arith.constant 256 : i32
    %14 = vector.broadcast %c256_i32 : i32 to vector<1x384xi32>
    %15 = arith.cmpi slt, %11, %14 : vector<1x384xi32>
    %16 = arith.andi %13, %15 : vector<1x384xi1>
    %cst = arith.constant 0.000000e+00 : f32
    %17 = vector.shape_cast %16 : vector<1x384xi1> to vector<1x384xi1>
    %18 = vector.broadcast %17 : vector<1x384xi1> to vector<64x384xi1>
    %19 = vector.broadcast %cst : f32 to vector<64x384xf32>
    %20 = arith.select %18, %6, %19 : vector<64x384xi1>, vector<64x384xf32>
    %cst_9 = arith.constant 0.000000e+00 : bf16
    %21 = vector.broadcast %cst_9 : bf16 to vector<64x1xbf16>
    %22 = arith.truncf %20 : vector<64x384xf32> to vector<64x384xbf16>
    %23 = tpu.concatenate %21, %22, %21 in 1 : vector<64x1xbf16>, vector<64x384xbf16>, vector<64x1xbf16> -> vector<64x386xbf16>
    %c0_10 = arith.constant 0 : index
    %c1 = arith.constant 1 : index
    %c0_11 = arith.constant 0 : index
    %c0_12 = arith.constant 0 : index
    %24 = vector.load %arg5[%c0_10, %c1, %c0_11, %c0_12] : memref<4x3x64x64xbf16, #tpu.memory_space<vmem>>, vector<1x1x64x64xbf16>
    %25 = vector.shape_cast %24 : vector<1x1x64x64xbf16> to vector<64x64xbf16>
    %cst_13 = arith.constant dense<0.000000e+00> : vector<64x384xf32>
    %26 = tpu.matmul %25, %22, %cst_13 {dimension_numbers = #tpu.dot_dimension_numbers<[1], [0], [0], [1], [0, 0, 1, 1], [], []>} : vector<64x64xbf16>, vector<64x384xbf16>, vector<64x384xf32> -> vector<64x384xf32>
    %c0_14 = arith.constant 0 : index
    %c0_15 = arith.constant 0 : index
    %c0_16 = arith.constant 0 : index
    %c0_17 = arith.constant 0 : index
    %27 = vector.load %arg5[%c0_14, %c0_15, %c0_16, %c0_17] : memref<4x3x64x64xbf16, #tpu.memory_space<vmem>>, vector<1x1x64x64xbf16>
    %28 = vector.shape_cast %27 : vector<1x1x64x64xbf16> to vector<64x64xbf16>
    %29 = vector.extract_strided_slice %23 {offsets = [0, 0], sizes = [64, 384], strides = [1, 1]} : vector<64x386xbf16> to vector<64x384xbf16>
    %cst_18 = arith.constant dense<0.000000e+00> : vector<64x384xf32>
    %30 = tpu.matmul %28, %29, %cst_18 {dimension_numbers = #tpu.dot_dimension_numbers<[1], [0], [0], [1], [0, 0, 1, 1], [], []>} : vector<64x64xbf16>, vector<64x384xbf16>, vector<64x384xf32> -> vector<64x384xf32>
    %31 = arith.addf %26, %30 : vector<64x384xf32>
    %c0_19 = arith.constant 0 : index
    %c2 = arith.constant 2 : index
    %c0_20 = arith.constant 0 : index
    %c0_21 = arith.constant 0 : index
    %32 = vector.load %arg5[%c0_19, %c2, %c0_20, %c0_21] : memref<4x3x64x64xbf16, #tpu.memory_space<vmem>>, vector<1x1x64x64xbf16>
    %33 = vector.shape_cast %32 : vector<1x1x64x64xbf16> to vector<64x64xbf16>
    %34 = vector.extract_strided_slice %23 {offsets = [0, 2], sizes = [64, 384], strides = [1, 1]} : vector<64x386xbf16> to vector<64x384xbf16>
    %cst_22 = arith.constant dense<0.000000e+00> : vector<64x384xf32>
    %35 = tpu.matmul %33, %34, %cst_22 {dimension_numbers = #tpu.dot_dimension_numbers<[1], [0], [0], [1], [0, 0, 1, 1], [], []>} : vector<64x64xbf16>, vector<64x384xbf16>, vector<64x384xf32> -> vector<64x384xf32>
    %36 = arith.addf %31, %35 : vector<64x384xf32>
    %c0_23 = arith.constant 0 : index
    %c0_24 = arith.constant 0 : index
    %c0_25 = arith.constant 0 : index
    %37 = vector.load %arg6[%c0_23, %c0_24, %c0_25] : memref<4x64x1xf32, #tpu.memory_space<vmem>>, vector<1x64x1xf32>
    %38 = vector.shape_cast %37 : vector<1x64x1xf32> to vector<64x1xf32>
    %39 = vector.broadcast %38 : vector<64x1xf32> to vector<64x384xf32>
    %40 = arith.addf %36, %39 : vector<64x384xf32>
    %cst_26 = arith.constant 0.000000e+00 : f32
    %41 = vector.broadcast %cst_26 : f32 to vector<64x384xf32>
    %42 = arith.maximumf %40, %41 : vector<64x384xf32>
    %cst_27 = arith.constant 0.000000e+00 : f32
    %43 = vector.shape_cast %16 : vector<1x384xi1> to vector<1x384xi1>
    %44 = vector.broadcast %43 : vector<1x384xi1> to vector<64x384xi1>
    %45 = vector.broadcast %cst_27 : f32 to vector<64x384xf32>
    %46 = arith.select %44, %42, %45 : vector<64x384xi1>, vector<64x384xf32>
    %47 = arith.truncf %46 : vector<64x384xf32> to vector<64x384xbf16>
    %48 = tpu.concatenate %21, %47, %21 in 1 : vector<64x1xbf16>, vector<64x384xbf16>, vector<64x1xbf16> -> vector<64x386xbf16>
    %c1_28 = arith.constant 1 : index
    %c1_29 = arith.constant 1 : index
    %c0_30 = arith.constant 0 : index
    %c0_31 = arith.constant 0 : index
    %49 = vector.load %arg5[%c1_28, %c1_29, %c0_30, %c0_31] : memref<4x3x64x64xbf16, #tpu.memory_space<vmem>>, vector<1x1x64x64xbf16>
    %50 = vector.shape_cast %49 : vector<1x1x64x64xbf16> to vector<64x64xbf16>
    %cst_32 = arith.constant dense<0.000000e+00> : vector<64x384xf32>
    %51 = tpu.matmul %50, %47, %cst_32 {dimension_numbers = #tpu.dot_dimension_numbers<[1], [0], [0], [1], [0, 0, 1, 1], [], []>} : vector<64x64xbf16>, vector<64x384xbf16>, vector<64x384xf32> -> vector<64x384xf32>
    %c1_33 = arith.constant 1 : index
    %c0_34 = arith.constant 0 : index
    %c0_35 = arith.constant 0 : index
    %c0_36 = arith.constant 0 : index
    %52 = vector.load %arg5[%c1_33, %c0_34, %c0_35, %c0_36] : memref<4x3x64x64xbf16, #tpu.memory_space<vmem>>, vector<1x1x64x64xbf16>
    %53 = vector.shape_cast %52 : vector<1x1x64x64xbf16> to vector<64x64xbf16>
    %54 = vector.extract_strided_slice %48 {offsets = [0, 0], sizes = [64, 384], strides = [1, 1]} : vector<64x386xbf16> to vector<64x384xbf16>
    %cst_37 = arith.constant dense<0.000000e+00> : vector<64x384xf32>
    %55 = tpu.matmul %53, %54, %cst_37 {dimension_numbers = #tpu.dot_dimension_numbers<[1], [0], [0], [1], [0, 0, 1, 1], [], []>} : vector<64x64xbf16>, vector<64x384xbf16>, vector<64x384xf32> -> vector<64x384xf32>
    %56 = arith.addf %51, %55 : vector<64x384xf32>
    %c1_38 = arith.constant 1 : index
    %c2_39 = arith.constant 2 : index
    %c0_40 = arith.constant 0 : index
    %c0_41 = arith.constant 0 : index
    %57 = vector.load %arg5[%c1_38, %c2_39, %c0_40, %c0_41] : memref<4x3x64x64xbf16, #tpu.memory_space<vmem>>, vector<1x1x64x64xbf16>
    %58 = vector.shape_cast %57 : vector<1x1x64x64xbf16> to vector<64x64xbf16>
    %59 = vector.extract_strided_slice %48 {offsets = [0, 2], sizes = [64, 384], strides = [1, 1]} : vector<64x386xbf16> to vector<64x384xbf16>
    %cst_42 = arith.constant dense<0.000000e+00> : vector<64x384xf32>
    %60 = tpu.matmul %58, %59, %cst_42 {dimension_numbers = #tpu.dot_dimension_numbers<[1], [0], [0], [1], [0, 0, 1, 1], [], []>} : vector<64x64xbf16>, vector<64x384xbf16>, vector<64x384xf32> -> vector<64x384xf32>
    %61 = arith.addf %56, %60 : vector<64x384xf32>
    %c1_43 = arith.constant 1 : index
    %c0_44 = arith.constant 0 : index
    %c0_45 = arith.constant 0 : index
    %62 = vector.load %arg6[%c1_43, %c0_44, %c0_45] : memref<4x64x1xf32, #tpu.memory_space<vmem>>, vector<1x64x1xf32>
    %63 = vector.shape_cast %62 : vector<1x64x1xf32> to vector<64x1xf32>
    %64 = vector.broadcast %63 : vector<64x1xf32> to vector<64x384xf32>
    %65 = arith.addf %61, %64 : vector<64x384xf32>
    %cst_46 = arith.constant 0.000000e+00 : f32
    %66 = vector.broadcast %cst_46 : f32 to vector<64x384xf32>
    %67 = arith.maximumf %65, %66 : vector<64x384xf32>
    %cst_47 = arith.constant 0.000000e+00 : f32
    %68 = vector.shape_cast %16 : vector<1x384xi1> to vector<1x384xi1>
    %69 = vector.broadcast %68 : vector<1x384xi1> to vector<64x384xi1>
    %70 = vector.broadcast %cst_47 : f32 to vector<64x384xf32>
    %71 = arith.select %69, %67, %70 : vector<64x384xi1>, vector<64x384xf32>
    %72 = arith.addf %20, %71 : vector<64x384xf32>
    %73 = arith.truncf %72 : vector<64x384xf32> to vector<64x384xbf16>
    %74 = tpu.concatenate %21, %73, %21 in 1 : vector<64x1xbf16>, vector<64x384xbf16>, vector<64x1xbf16> -> vector<64x386xbf16>
    %c2_48 = arith.constant 2 : index
    %c1_49 = arith.constant 1 : index
    %c0_50 = arith.constant 0 : index
    %c0_51 = arith.constant 0 : index
    %75 = vector.load %arg5[%c2_48, %c1_49, %c0_50, %c0_51] : memref<4x3x64x64xbf16, #tpu.memory_space<vmem>>, vector<1x1x64x64xbf16>
    %76 = vector.shape_cast %75 : vector<1x1x64x64xbf16> to vector<64x64xbf16>
    %cst_52 = arith.constant dense<0.000000e+00> : vector<64x384xf32>
    %77 = tpu.matmul %76, %73, %cst_52 {dimension_numbers = #tpu.dot_dimension_numbers<[1], [0], [0], [1], [0, 0, 1, 1], [], []>} : vector<64x64xbf16>, vector<64x384xbf16>, vector<64x384xf32> -> vector<64x384xf32>
    %c2_53 = arith.constant 2 : index
    %c0_54 = arith.constant 0 : index
    %c0_55 = arith.constant 0 : index
    %c0_56 = arith.constant 0 : index
    %78 = vector.load %arg5[%c2_53, %c0_54, %c0_55, %c0_56] : memref<4x3x64x64xbf16, #tpu.memory_space<vmem>>, vector<1x1x64x64xbf16>
    %79 = vector.shape_cast %78 : vector<1x1x64x64xbf16> to vector<64x64xbf16>
    %80 = vector.extract_strided_slice %74 {offsets = [0, 0], sizes = [64, 384], strides = [1, 1]} : vector<64x386xbf16> to vector<64x384xbf16>
    %cst_57 = arith.constant dense<0.000000e+00> : vector<64x384xf32>
    %81 = tpu.matmul %79, %80, %cst_57 {dimension_numbers = #tpu.dot_dimension_numbers<[1], [0], [0], [1], [0, 0, 1, 1], [], []>} : vector<64x64xbf16>, vector<64x384xbf16>, vector<64x384xf32> -> vector<64x384xf32>
    %82 = arith.addf %77, %81 : vector<64x384xf32>
    %c2_58 = arith.constant 2 : index
    %c2_59 = arith.constant 2 : index
    %c0_60 = arith.constant 0 : index
    %c0_61 = arith.constant 0 : index
    %83 = vector.load %arg5[%c2_58, %c2_59, %c0_60, %c0_61] : memref<4x3x64x64xbf16, #tpu.memory_space<vmem>>, vector<1x1x64x64xbf16>
    %84 = vector.shape_cast %83 : vector<1x1x64x64xbf16> to vector<64x64xbf16>
    %85 = vector.extract_strided_slice %74 {offsets = [0, 2], sizes = [64, 384], strides = [1, 1]} : vector<64x386xbf16> to vector<64x384xbf16>
    %cst_62 = arith.constant dense<0.000000e+00> : vector<64x384xf32>
    %86 = tpu.matmul %84, %85, %cst_62 {dimension_numbers = #tpu.dot_dimension_numbers<[1], [0], [0], [1], [0, 0, 1, 1], [], []>} : vector<64x64xbf16>, vector<64x384xbf16>, vector<64x384xf32> -> vector<64x384xf32>
    %87 = arith.addf %82, %86 : vector<64x384xf32>
    %c2_63 = arith.constant 2 : index
    %c0_64 = arith.constant 0 : index
    %c0_65 = arith.constant 0 : index
    %88 = vector.load %arg6[%c2_63, %c0_64, %c0_65] : memref<4x64x1xf32, #tpu.memory_space<vmem>>, vector<1x64x1xf32>
    %89 = vector.shape_cast %88 : vector<1x64x1xf32> to vector<64x1xf32>
    %90 = vector.broadcast %89 : vector<64x1xf32> to vector<64x384xf32>
    %91 = arith.addf %87, %90 : vector<64x384xf32>
    %cst_66 = arith.constant 0.000000e+00 : f32
    %92 = vector.broadcast %cst_66 : f32 to vector<64x384xf32>
    %93 = arith.maximumf %91, %92 : vector<64x384xf32>
    %cst_67 = arith.constant 0.000000e+00 : f32
    %94 = vector.shape_cast %16 : vector<1x384xi1> to vector<1x384xi1>
    %95 = vector.broadcast %94 : vector<1x384xi1> to vector<64x384xi1>
    %96 = vector.broadcast %cst_67 : f32 to vector<64x384xf32>
    %97 = arith.select %95, %93, %96 : vector<64x384xi1>, vector<64x384xf32>
    %98 = arith.truncf %97 : vector<64x384xf32> to vector<64x384xbf16>
    %99 = tpu.concatenate %21, %98, %21 in 1 : vector<64x1xbf16>, vector<64x384xbf16>, vector<64x1xbf16> -> vector<64x386xbf16>
    %c3 = arith.constant 3 : index
    %c1_68 = arith.constant 1 : index
    %c0_69 = arith.constant 0 : index
    %c0_70 = arith.constant 0 : index
    %100 = vector.load %arg5[%c3, %c1_68, %c0_69, %c0_70] : memref<4x3x64x64xbf16, #tpu.memory_space<vmem>>, vector<1x1x64x64xbf16>
    %101 = vector.shape_cast %100 : vector<1x1x64x64xbf16> to vector<64x64xbf16>
    %cst_71 = arith.constant dense<0.000000e+00> : vector<64x384xf32>
    %102 = tpu.matmul %101, %98, %cst_71 {dimension_numbers = #tpu.dot_dimension_numbers<[1], [0], [0], [1], [0, 0, 1, 1], [], []>} : vector<64x64xbf16>, vector<64x384xbf16>, vector<64x384xf32> -> vector<64x384xf32>
    %c3_72 = arith.constant 3 : index
    %c0_73 = arith.constant 0 : index
    %c0_74 = arith.constant 0 : index
    %c0_75 = arith.constant 0 : index
    %103 = vector.load %arg5[%c3_72, %c0_73, %c0_74, %c0_75] : memref<4x3x64x64xbf16, #tpu.memory_space<vmem>>, vector<1x1x64x64xbf16>
    %104 = vector.shape_cast %103 : vector<1x1x64x64xbf16> to vector<64x64xbf16>
    %105 = vector.extract_strided_slice %99 {offsets = [0, 0], sizes = [64, 384], strides = [1, 1]} : vector<64x386xbf16> to vector<64x384xbf16>
    %cst_76 = arith.constant dense<0.000000e+00> : vector<64x384xf32>
    %106 = tpu.matmul %104, %105, %cst_76 {dimension_numbers = #tpu.dot_dimension_numbers<[1], [0], [0], [1], [0, 0, 1, 1], [], []>} : vector<64x64xbf16>, vector<64x384xbf16>, vector<64x384xf32> -> vector<64x384xf32>
    %107 = arith.addf %102, %106 : vector<64x384xf32>
    %c3_77 = arith.constant 3 : index
    %c2_78 = arith.constant 2 : index
    %c0_79 = arith.constant 0 : index
    %c0_80 = arith.constant 0 : index
    %108 = vector.load %arg5[%c3_77, %c2_78, %c0_79, %c0_80] : memref<4x3x64x64xbf16, #tpu.memory_space<vmem>>, vector<1x1x64x64xbf16>
    %109 = vector.shape_cast %108 : vector<1x1x64x64xbf16> to vector<64x64xbf16>
    %110 = vector.extract_strided_slice %99 {offsets = [0, 2], sizes = [64, 384], strides = [1, 1]} : vector<64x386xbf16> to vector<64x384xbf16>
    %cst_81 = arith.constant dense<0.000000e+00> : vector<64x384xf32>
    %111 = tpu.matmul %109, %110, %cst_81 {dimension_numbers = #tpu.dot_dimension_numbers<[1], [0], [0], [1], [0, 0, 1, 1], [], []>} : vector<64x64xbf16>, vector<64x384xbf16>, vector<64x384xf32> -> vector<64x384xf32>
    %112 = arith.addf %107, %111 : vector<64x384xf32>
    %c3_82 = arith.constant 3 : index
    %c0_83 = arith.constant 0 : index
    %c0_84 = arith.constant 0 : index
    %113 = vector.load %arg6[%c3_82, %c0_83, %c0_84] : memref<4x64x1xf32, #tpu.memory_space<vmem>>, vector<1x64x1xf32>
    %114 = vector.shape_cast %113 : vector<1x64x1xf32> to vector<64x1xf32>
    %115 = vector.broadcast %114 : vector<64x1xf32> to vector<64x384xf32>
    %116 = arith.addf %112, %115 : vector<64x384xf32>
    %cst_85 = arith.constant 0.000000e+00 : f32
    %117 = vector.broadcast %cst_85 : f32 to vector<64x384xf32>
    %118 = arith.maximumf %116, %117 : vector<64x384xf32>
    %cst_86 = arith.constant 0.000000e+00 : f32
    %119 = vector.shape_cast %16 : vector<1x384xi1> to vector<1x384xi1>
    %120 = vector.broadcast %119 : vector<1x384xi1> to vector<64x384xi1>
    %121 = vector.broadcast %cst_86 : f32 to vector<64x384xf32>
    %122 = arith.select %120, %118, %121 : vector<64x384xi1>, vector<64x384xf32>
    %123 = arith.addf %72, %122 : vector<64x384xf32>
    %124 = vector.extract_strided_slice %123 {offsets = [0, 128], sizes = [64, 128], strides = [1, 1]} : vector<64x384xf32> to vector<64x128xf32>
    %c0_87 = arith.constant 0 : index
    %c0_88 = arith.constant 0 : index
    %c0_89 = arith.constant 0 : index
    %125 = vector.load %arg7[%c0_87, %c0_88, %c0_89] : memref<1x64x128xf32, #tpu.memory_space<vmem>>, vector<1x64x128xf32>
    %126 = vector.shape_cast %125 : vector<1x64x128xf32> to vector<64x128xf32>
    %127 = vector.shape_cast %124 : vector<64x128xf32> to vector<1x64x128xf32>
    tpu.vector_store %arg7[%c0_87, %c0_88, %c0_89], %127 {strides = array<i32>} : memref<1x64x128xf32, #tpu.memory_space<vmem>>, vector<1x64x128xf32>,
    return
  }
  func.func @transform_0(%arg0: i32, %arg1: i32) -> (i32, i32, i32) {
    %c1_i32 = arith.constant 1 : i32
    %0 = arith.muli %arg1, %c1_i32 : i32
    %c1_i32_0 = arith.constant 1 : i32
    %1 = arith.subi %0, %c1_i32_0 : i32
    %c0_i32 = arith.constant 0 : i32
    %2 = arith.maxsi %1, %c0_i32 : i32
    %c0_i32_1 = arith.constant 0 : i32
    %c0_i32_2 = arith.constant 0 : i32
    return %arg0, %c0_i32_1, %2 : i32, i32, i32
  }
  func.func @transform_1(%arg0: i32, %arg1: i32) -> (i32, i32, i32) {
    %c0_i32 = arith.constant 0 : i32
    %c0_i32_0 = arith.constant 0 : i32
    return %arg0, %c0_i32, %arg1 : i32, i32, i32
  }
  func.func @transform_2(%arg0: i32, %arg1: i32) -> (i32, i32, i32) {
    %c1_i32 = arith.constant 1 : i32
    %0 = arith.addi %arg1, %c1_i32 : i32
    %c1_i32_0 = arith.constant 1 : i32
    %1 = arith.muli %0, %c1_i32_0 : i32
    %c1_i32_1 = arith.constant 1 : i32
    %2 = arith.minsi %1, %c1_i32_1 : i32
    %c0_i32 = arith.constant 0 : i32
    %c0_i32_2 = arith.constant 0 : i32
    return %arg0, %c0_i32, %2 : i32, i32, i32
  }
  func.func @transform_3(%arg0: i32, %arg1: i32) -> (i32, i32, i32, i32) {
    %c0_i32 = arith.constant 0 : i32
    %c0_i32_0 = arith.constant 0 : i32
    %c0_i32_1 = arith.constant 0 : i32
    %c0_i32_2 = arith.constant 0 : i32
    %c0_i32_3 = arith.constant 0 : i32
    return %c0_i32, %c0_i32_0, %c0_i32_1, %c0_i32_2 : i32, i32, i32, i32
  }
  func.func @transform_4(%arg0: i32, %arg1: i32) -> (i32, i32, i32) {
    %c0_i32 = arith.constant 0 : i32
    %c0_i32_0 = arith.constant 0 : i32
    %c0_i32_1 = arith.constant 0 : i32
    %c0_i32_2 = arith.constant 0 : i32
    return %c0_i32, %c0_i32_0, %c0_i32_1 : i32, i32, i32
  }
  func.func @transform_5(%arg0: i32, %arg1: i32) -> (i32, i32, i32) {
    %c0_i32 = arith.constant 0 : i32
    %c0_i32_0 = arith.constant 0 : i32
    return %arg0, %c0_i32, %arg1 : i32, i32, i32
  }
}

</mosaic_0001>

<bundles_post_ra>
// kernel: resblock_forward.1
= control target key start
LH: loop header
LB: loop body
LE: loop exit
PB: predicated region body
PF: predicated region fallthrough
CT: control target
= control target key end

     0   :  { %s6806_s0 = inlined_call_operand.vmem [shape: f32[2,64,256], index: 0, kind: input, shape index: {}, may-alias: {0,1,2}]   ;;  %s6807_s1 = inlined_call_operand.vmem [shape: f32[2,64,256], index: 1, kind: input, shape index: {}, may-alias: {0,1,2}]   ;;  %s6808_s2 = inlined_call_operand.vmem [shape: f32[2,64,256], index: 2, kind: input, shape index: {}, may-alias: {0,1,2}]   ;;  %s6809_s3 = inlined_call_operand.vmem [shape: bf16[4,3,64,64], index: 3, kind: input, shape index: {}]   ;;  %s6810_s4 = inlined_call_operand.vmem [shape: f32[4,64,1], index: 4, kind: input, shape index: {}]   ;;  %s6811_s5 = inlined_call_operand.hbm [shape: f32[2,64,256], index: 5, kind: output, shape index: {}]  }
   0x1   :  { %6878 = sst [smem:[#allocation49_spill]] %s6806_s0 }
   0x2   :  { %10 = vsyncpa [#allocation6], 0 }
   0x3   :  { %12 = vsyncpa [#allocation6 + $0x1], 0  ;;  %s4712_s18 = smov 0   ;;  %s4714_s19 = smov 0  }
   0x4   :  { %s4716_s20 = smov 0   ;;  %s4718_s21 = smov 0  }
   0x5   :  { %s4720_s22 = smov 0   ;;  %s4722_s23 = smov 0  }
   0x6   :  { %s4724_s24 = smov 0   ;;  %s4726_s25 = smov 0  }
   0x7   :  { %s4728_s26 = smov 0   ;;  %s4730_s27 = smov 0  }
   0x8   :  { %s4732_s28 = smov 0   ;;  %s4734_s29 = smov 0  }
   0x9 LB: > { %6879 = sst [smem:[#allocation8_spill]] %s4653_s24  ;;  %s3762_s30 = sadd.s32 4294967295, %s4673_s29   ;;  %s4673_s29 = sphi %s4734_s29, %s18_s29   ;;  %s4669_s28 = sphi %s4732_s28, %s7040_s28   ;;  %s4665_s27 = sphi %s4730_s27, %s7039_s27   ;;  %s4661_s26 = sphi %s4728_s26, %s7038_s26   ;;  %s4657_s25 = sphi %s4726_s25, %s7037_s25   ;;  %s4653_s24 = sphi %s4724_s24, %s7029_s24   ;;  %s4649_s23 = sphi %s4722_s23, %s7028_s23   ;;  %s4645_s22 = sphi %s4720_s22, %s7036_s22   ;;  %s4641_s21 = sphi %s4718_s21, %s7035_s21   ;;  %s4637_s20 = sphi %s4716_s20, %s7034_s20   ;;  %s4633_s19 = sphi %s4714_s19, %s7033_s19   ;;  %s4629_s18 = sphi %s4712_s18, %s7032_s18  }
   0xa   : > { %s3763_s6 = sadd.s32 4294967294, %s4673_s29   ;;  %s27_s7 = sadd.s32 1, %s4665_s27 }
   0xb   : > { %s30_s8 = sadd.s32 1, %s4669_s28  ;;  %p28_p0 = scmp.ge.s32.totalorder %s27_s7, 2 }
   0xc   : > { %s45_s9 = sadd.s32 1, %s4653_s24  ;;  %p52_p2 = scmp.ne.s32.totalorder %s4653_s24, %s4649_s23 }
   0xd   : > { %s7042_s7 = smov (%p28_p0, %s27_s7), 0  ;;  %s7044_s8 = smov (!%p28_p0, %s30_s8), %s4669_s28 }
   0xe   : > { %6880 = sst [smem:[#allocation9_spill]] %s7042_s7  ;;  %p32_p1 = scmp.ge.s32.totalorder %s7044_s8, 2 }
   0xf   : > { %p53_p3 = scmp.eq.s32.totalorder %s4673_s29, 0  ;;  %s69_s11 = ssub.s32 %s4665_s27, %s7042_s7 }
  0x10   : > { %s7046_s8 = smov (%p32_p1, %s7044_s8), 0  ;;  %s73_s14 = sadd.s32 1, %s4645_s22 }
  0x11   : > { %6881 = sst [smem:[#allocation10_spill]] %s7046_s8  ;;  %s40_s10 = ssub.s32 %s4669_s28, %s7046_s8 }
  0x12   : > { %p4791_p4 = por %p53_p3, %p52_p2  ;;  %p43_p5 = scmp.eq.s32.totalorder %s40_s10, 0 }
  0x13   : > { %s70_s13 = sor.u32 %s69_s11, %s40_s10  ;;  %p80_p7 = scmp.ne.s32.totalorder %s4645_s22, %s4641_s21 }
  0x14   : > { %p71_p6 = scmp.eq.s32.totalorder %s70_s13, 0  ;;  %s107_s17 = sadd.s32 1, %s4637_s20 }
  0x15   : > { %s4798_s15 = scalar_select %p43_p5, %s4653_s24, %s45_s9  }
  0x16   : > { %s4801_s16 = scalar_select %p71_p6, %s4645_s22, %s73_s14  }
  0x17   : > { %6883 = sst [smem:[#allocation11_spill]] %s4798_s15  ;;  %p4808_p8 = por %p80_p7, %p53_p3 }
  0x18   : > { %6884 = sst [smem:[#allocation12_spill]] %s4801_s16  ;;  %p114_p9 = scmp.ne.s32.totalorder %s4637_s20, %s4633_s19 }
  0x19   : > { %p188_p10 = scmp.eq.s32.totalorder %s3762_s30, 3  ;;  %p193_p11 = scmp.ne.s32.totalorder %s4641_s21, %s4629_s18 }
  0x1a   : > { %p4818_p12 = por %p114_p9, %p53_p3  ;;  %p194_p0 = scmp.eq.s32.totalorder %s3763_s6, 3 }
  0x1b   : > { %p4822_p13 = por %p188_p10, %p80_p7  ;;  %p3767_p2 = scmp.ge.s32.totalorder %s4673_s29, 4 }
  0x1c   : > { %s4828_s13 = scalar_select %p43_p5, %s4637_s20, %s107_s17  }
  0x1d   : > { %p4830_p1 = por %p194_p0, %p193_p11  ;;  %216 = sbr.rel (%p3767_p2) target bundleno = 67 (0x43), region = 24 }
  0x22   : > { %219 = sbr.rel (!%p4791_p4) target bundleno = 48 (0x30), region = 28  ;;  %s221_s30 = sand.u32 (%p4791_p4), 1, %s4653_s24  }
  0x23   : > { %s3768_s7 = sshll.u32 (%p4791_p4), %s221_s30, 6  ;;  %s4623_s15 = sshll.u32 (%p4791_p4), %s4669_s28, 7 }
  0x24   : > { %s6889_s0 = sld [smem:[#allocation49_spill]] (%p4791_p4)  ;;  %s223_s17 = scalar_lea.vmem (%p4791_p4), [#allocation2], %s3768_s7 }
  0x2a   : > { %s230_s10 = scalar_lea.vmem %s6889_s0, %s4623_s15 }
  0x2b   : > { %v273_v0 = vld [vmem:[%s230_s10] sm:$0xff]  ;;  %v275_v1 = vld [vmem:[%s230_s10 + $0x10] sm:$0xff] }
  0x2c   : > { %v277_v2 = vld [vmem:[%s230_s10 + $0x20] sm:$0xff]  ;;  %274 = vst [vmem:[%s223_s17] sm:$0xff] %v273_v0  ;;  %276 = vst [vmem:[%s223_s17 + $0x8] sm:$0xff] %v275_v1  ;;  %v279_v3 = vld [vmem:[%s230_s10 + $0x30] sm:$0xff] }
  0x2d   : > { %278 = vst [vmem:[%s223_s17 + $0x10] sm:$0xff] %v277_v2  ;;  %v281_v4 = vld [vmem:[%s230_s10 + $0x40] sm:$0xff]  ;;  %v283_v5 = vld [vmem:[%s230_s10 + $0x50] sm:$0xff]  ;;  %280 = vst [vmem:[%s223_s17 + $0x18] sm:$0xff] %v279_v3 }
  0x2e   : > { %282 = vst [vmem:[%s223_s17 + $0x20] sm:$0xff] %v281_v4  ;;  %284 = vst [vmem:[%s223_s17 + $0x28] sm:$0xff] %v283_v5  ;;  %v285_v6 = vld [vmem:[%s230_s10 + $0x60] sm:$0xff]  ;;  %v287_v7 = vld [vmem:[%s230_s10 + $0x70] sm:$0xff] }
  0x2f   : > { %286 = vst [vmem:[%s223_s17 + $0x30] sm:$0xff] %v285_v6  ;;  %288 = vst [vmem:[%s223_s17 + $0x38] sm:$0xff] %v287_v7 }
  0x30 PF: > { %294 = sbr.rel (!%p4808_p8) target bundleno = 58 (0x3a), region = 66  ;;  %s296_s7 = sand.u32 (%p4808_p8), 1, %s4645_s22  }
  0x31   : > { %s3773_s12 = sshll.u32 (%p4808_p8), %s4669_s28, 4  ;;  %s3772_s15 = sshll.u32 (%p4808_p8), %s296_s7, 6 }
  0x32   : > { %s300_s16 = sadd.s32 (%p4808_p8), %s4665_s27, %s3773_s12  ;;  %s298_s10 = scalar_lea.vmem (%p4808_p8), [#allocation3], %s3772_s15 }
  0x33   : > { %s3774_s30 = sshll.u32 (%p4808_p8), %s300_s16, 3 }
  0x34   : > { %s302_s24 = scalar_lea.vmem (%p4808_p8), %s6807_s1, %s3774_s30 }
  0x35   : > { %v345_v8 = vld [vmem:[%s302_s24] sm:$0xff]  ;;  %v347_v9 = vld [vmem:[%s302_s24 + $0x10] sm:$0xff] }
  0x36   : > { %v349_v10 = vld [vmem:[%s302_s24 + $0x20] sm:$0xff]  ;;  %346 = vst [vmem:[%s298_s10] sm:$0xff] %v345_v8  ;;  %348 = vst [vmem:[%s298_s10 + $0x8] sm:$0xff] %v347_v9  ;;  %v351_v11 = vld [vmem:[%s302_s24 + $0x30] sm:$0xff] }
  0x37   : > { %350 = vst [vmem:[%s298_s10 + $0x10] sm:$0xff] %v349_v10  ;;  %v353_v12 = vld [vmem:[%s302_s24 + $0x40] sm:$0xff]  ;;  %v355_v13 = vld [vmem:[%s302_s24 + $0x50] sm:$0xff]  ;;  %352 = vst [vmem:[%s298_s10 + $0x18] sm:$0xff] %v351_v11 }
  0x38   : > { %354 = vst [vmem:[%s298_s10 + $0x20] sm:$0xff] %v353_v12  ;;  %356 = vst [vmem:[%s298_s10 + $0x28] sm:$0xff] %v355_v13  ;;  %v357_v14 = vld [vmem:[%s302_s24 + $0x60] sm:$0xff]  ;;  %v359_v15 = vld [vmem:[%s302_s24 + $0x70] sm:$0xff] }
  0x39   : > { %358 = vst [vmem:[%s298_s10 + $0x30] sm:$0xff] %v357_v14  ;;  %360 = vst [vmem:[%s298_s10 + $0x38] sm:$0xff] %v359_v15 }
  0x3a PF: > { %366 = sbr.rel (!%p4818_p12) target bundleno = 67 (0x43), region = 104  ;;  %s368_s0 = sand.u32 (%p4818_p12), 1, %s4637_s20  }
  0x3b   : > { %s3775_s8 = sshll.u32 (%p4818_p12), %s368_s0, 6  ;;  %s4626_s17 = sshll.u32 (%p4818_p12), %s4669_s28, 7 }
  0x3c   : > { %s4625_s7 = sadd.s32 (%p4818_p12), 8, %s4626_s17  ;;  %s370_s24 = scalar_lea.vmem (%p4818_p12), [#allocation4], %s3775_s8 }
  0x3d   : > { %s377_s16 = scalar_lea.vmem (%p4818_p12), %s6808_s2, %s4625_s7 }
  0x3e   : > { %v420_v16 = vld [vmem:[%s377_s16] sm:$0xff] (%p4818_p12)  ;;  %v422_v17 = vld [vmem:[%s377_s16 + $0x10] sm:$0xff] (%p4818_p12) }
  0x3f   : > { %v424_v18 = vld [vmem:[%s377_s16 + $0x20] sm:$0xff]  ;;  %421 = vst [vmem:[%s370_s24] sm:$0xff] %v420_v16  ;;  %423 = vst [vmem:[%s370_s24 + $0x8] sm:$0xff] %v422_v17  ;;  %v426_v19 = vld [vmem:[%s377_s16 + $0x30] sm:$0xff] }
  0x40   : > { %425 = vst [vmem:[%s370_s24 + $0x10] sm:$0xff] %v424_v18  ;;  %v428_v20 = vld [vmem:[%s377_s16 + $0x40] sm:$0xff]  ;;  %v430_v21 = vld [vmem:[%s377_s16 + $0x50] sm:$0xff]  ;;  %427 = vst [vmem:[%s370_s24 + $0x18] sm:$0xff] %v426_v19 }
  0x41   : > { %429 = vst [vmem:[%s370_s24 + $0x20] sm:$0xff] %v428_v20  ;;  %431 = vst [vmem:[%s370_s24 + $0x28] sm:$0xff] %v430_v21  ;;  %v432_v22 = vld [vmem:[%s377_s16 + $0x60] sm:$0xff]  ;;  %v434_v23 = vld [vmem:[%s377_s16 + $0x70] sm:$0xff] }
  0x42   : > { %433 = vst [vmem:[%s370_s24 + $0x30] sm:$0xff] %v432_v22  ;;  %435 = vst [vmem:[%s370_s24 + $0x38] sm:$0xff] %v434_v23 }
  0x43 PF: > { %p3778_p3 = scmp.ge.s32.totalorder %s4673_s29, 1  ;;  %p440_p4 = scmp.lt.s32.totalorder %s4673_s29, 5 }
  0x45   : > { %p441_p5 = pnand %p3778_p3, %p440_p4 }
  0x47   : > { %444 = sbr.rel (%p441_p5) target bundleno = 2060 (0x80c), region = 142 }
  0x4c   : > { %s447_s11 = sand.u32 1, %s4649_s23   ;;  %s3783_s30 = sshll.u32 %s4657_s25, 7  ;;  %v529_v24 = vlaneseq  ;;  %v6894_v51 = vmov 0  ;;  %v6901_v63 = vmov 0  ;;  %vm700_vm9 = vcmask 523264   ;;  %v4534_v45 = vld [vmem:[%s6809_s3 + $0x140] sm:$0xff]  }
  0x4d   : > { %s3779_s6 = sshll.u32 %s447_s11, 6  ;;  %s3784_s10 = sadd.s32 4294967168, %s3783_s30  ;;  %vm624_vm10 = vcmask 7168   ;;  %v6922_v37 = vmov 0  ;;  %vm1090_vm15 = vcmask 1031168  }
  0x4e   : > { %v530_v25 = vand.u32 127, %v529_v24  ;;  %v533_v26 = vstv %s3784_s10  ;;  %s449_s0 = scalar_lea.vmem [#allocation2], %s3779_s6  ;;  %s461_s8 = sand.u32 1, %s4633_s19   ;;  %vm5123_vm11 = vmneg %vm624_vm10 }
  0x4f   : > { %v4861_v27 = vld [vmem:[%s449_s0 + $0x30] sm:$0xff]  ;;  %v4863_v28 = vld [vmem:[%s449_s0 + $0x38] sm:$0xff]  ;;  %v4865_v29 = vld [vmem:[%s449_s0 + $0x20] sm:$0xff]  ;;  %s454_s17 = sand.u32 1, %s4641_s21   ;;  %s3781_s23 = sshll.u32 %s461_s8, 6  ;;  %v6923_v37 = vsel %vm5123_vm11, 4294967295, %v6922_v37 }
  0x50   : > { %v531_v30 = vadd.s32 128, %v530_v25  ;;  %v534_v31 = vadd.s32 %v533_v26, %v530_v25  ;;  %v3821_v32 = vpack.c.bf16 %v4863_v28, %v4861_v27  ;;  %v4871_v33 = vld [vmem:[%s449_s0 + $0x28] sm:$0xff]  ;;  %v532_v34 = vadd.s32 256, %v530_v25  ;;  %v4873_v35 = vld [vmem:[%s449_s0 + $0x10] sm:$0xff]  ;;  %v4875_v36 = vld [vmem:[%s449_s0 + $0x18] sm:$0xff]  ;;  %s4883_s19 = sshll.u32 %s454_s17, 6 }
  0x51   : > { %v4885_v39 = vld [vmem:[%s449_s0] sm:$0xff]  ;;  %s4887_s7 = scalar_lea.vmem [#allocation4], %s3781_s23  ;;  %v4891_v44 = vld [vmem:[%s449_s0 + $0x8] sm:$0xff]  ;;  %s4912_s12 = scalar_lea.vmem [#allocation3], %s4883_s19  ;;  %6924 = vst [vmem:[#allocation39_spill] sm:$0xff] %v6923_v37 }
  0x52   : > { %v535_v40 = vadd.s32 %v533_v26, %v531_v30  ;;  %vm537_vm0 = vcmp.ge.s32.totalorder %v534_v31, 0  ;;  %vm540_vm1 = vcmp.lt.s32.totalorder %v534_v31, 256  ;;  %v525_v41 = vld [vmem:[%s4887_s7 + $0x30] sm:$0xff]  ;;  %v526_v42 = vld [vmem:[%s4887_s7 + $0x38] sm:$0xff]  ;;  %v536_v43 = vadd.s32 %v533_v26, %v532_v34  ;;  %v523_v55 = vld [vmem:[%s4887_s7 + $0x20] sm:$0xff]  ;;  %s4675_s15 = smov 1  }
  0x53   : > { %vm4893_vm2 = vmand %vm537_vm0, %vm540_vm1  ;;  %v4897_v46 = vpack.c.bf16 %v526_v42, %v525_v41  ;;  %v4915_v50 = vld [vmem:[%s4912_s12 + $0x30] sm:$0xff]  ;;  %v4935_v56 = vld [vmem:[%s4912_s12 + $0x38] sm:$0xff]  ;;  %s4677_s11 = smov 126   ;;  %s4678_s16 = smov [#allocation5]  }
  0x54   : > { %vm538_vm3 = vcmp.ge.s32.totalorder %v535_v40, 0  ;;  %vm541_vm4 = vcmp.lt.s32.totalorder %v535_v40, 256  ;;  %v4904_v48 = vsel %vm4893_vm2, %v4861_v27, 0.0  ;;  %v4909_v49 = vsel %vm4893_vm2, %v4863_v28, 0.0  ;;  %v524_v60 = vld [vmem:[%s4887_s7 + $0x28] sm:$0xff]  ;;  %v4951_v61 = vld [vmem:[%s4912_s12 + $0x10] sm:$0xff]  ;;  %vm5179_vm14 = vmpackc.low %vm4893_vm2, %vm4893_vm2 }
  0x55   : > { %6892 = vst [vmem:[#allocation13_spill] sm:$0xff] %v4904_v48  ;;  %6893 = vst [vmem:[#allocation14_spill] sm:$0xff] %v4909_v49  ;;  %v585_v52 = vpack.c.bf16 %v4909_v49, %v4904_v48  ;;  %v4926_v53 = vsel %vm4893_vm2, %v4865_v29, 0.0  ;;  %v4931_v54 = vsel %vm4893_vm2, %v4871_v33, 0.0  ;;  %vm539_vm6 = vcmp.ge.s32.totalorder %v536_v43, 0  ;;  %v4954_v62 = vld [vmem:[%s4912_s12 + $0x18] sm:$0xff] }
  0x56   : > { %vm4917_vm5 = vmand %vm538_vm3, %vm541_vm4  ;;  %6897 = vst [vmem:[#allocation16_spill] sm:$0xff] %v4926_v53  ;;  %v582_v57 = vpack.c.bf16 %v4931_v54, %v4926_v53  ;;  %vm542_vm7 = vcmp.lt.s32.totalorder %v536_v43, 256  ;;  %v4942_v58 = vsel %vm4893_vm2, %v4873_v35, 0.0  ;;  %v4947_v59 = vsel %vm4893_vm2, %v4875_v36, 0.0  ;;  %v4971_v3 = vld [vmem:[%s4912_s12 + $0x20] sm:$0xff]  ;;  %v4974_v4 = vld [vmem:[%s4912_s12 + $0x28] sm:$0xff] }
  0x57   : > { %v6895_v51 = vsel %vm4917_vm5, 4294967295, %v6894_v51  ;;  %6898 = vst [vmem:[#allocation17_spill] sm:$0xff] %v4931_v54  ;;  %6899 = vst [vmem:[#allocation18_spill] sm:$0xff] %v4942_v58  ;;  %618 = vrot.lane.b32.xlu0 %v585_v52, %s4675_s15  ;;  %v579_v0 = vpack.c.bf16 %v4947_v59, %v4942_v58  ;;  %v4963_v1 = vpack.c.bf16 %v524_v60, %v523_v55  ;;  %v4968_v2 = vsel %vm4917_vm5, %v4915_v50, 0.0  ;;  %v521_v9 = vld [vmem:[%s4887_s7 + $0x10] sm:$0xff]  ;;  %v522_v10 = vld [vmem:[%s4887_s7 + $0x18] sm:$0xff] }
  0x58   : > { %6896 = vst [vmem:[#allocation15_spill] sm:$0xff] %v6895_v51  ;;  %6900 = vst [vmem:[#allocation19_spill] sm:$0xff] %v4947_v59  ;;  %612 = vrot.lane.b32.xlu1 %v582_v57, %s4675_s15  ;;  %v4992_v8 = vsel %vm4917_vm5, %v4935_v56, 0.0  ;;  %v3818_v13 = vpack.c.bf16 %v4935_v56, %v4915_v50  ;;  %v5005_v14 = vld [vmem:[%s4912_s12] sm:$0xff]  ;;  %v5008_v15 = vld [vmem:[%s4912_s12 + $0x8] sm:$0xff]  ;;  %v5020_v20 = vsel %vm4917_vm5, %v4951_v61, 0.0  ;;  %v5042_v26 = vpack.c.bf16 %v522_v10, %v521_v9 }
  0x59   : > { %vm4957_vm8 = vmand %vm539_vm6, %vm542_vm7  ;;  %6904 = vst [vmem:[#allocation21_spill] sm:$0xff] %v4968_v2  ;;  %v519_v17 = vld [vmem:[%s4887_s7] sm:$0xff]  ;;  %v520_v18 = vld [vmem:[%s4887_s7 + $0x8] sm:$0xff]  ;;  %v586_v19 = vpack.c.bf16 %v4992_v8, %v4968_v2  ;;  %v5025_v21 = vsel %vm4917_vm5, %v4954_v62, 0.0  ;;  %v5035_v24 = vsel %vm4917_vm5, %v4971_v3, 0.0  ;;  %v5040_v25 = vsel %vm4917_vm5, %v4974_v4, 0.0 }
  0x5a   : > { %v6902_v63 = vsel %vm4957_vm8, 4294967295, %v6901_v63  ;;  %v4979_v5 = vsel %vm4957_vm8, %v525_v41, 0.0  ;;  %v4983_v6 = vsel %vm4957_vm8, %v526_v42, 0.0  ;;  %v4987_v7 = vsel %vm4957_vm8, %v523_v55, 0.0  ;;  %6908 = vst [vmem:[#allocation25_spill] sm:$0xff] %v4992_v8  ;;  %6910 = vst [vmem:[#allocation27_spill] sm:$0xff] %v5020_v20 }
  0x5b   : > { %6903 = vst [vmem:[#allocation20_spill] sm:$0xff] %v6902_v63  ;;  %6905 = vst [vmem:[#allocation22_spill] sm:$0xff] %v4979_v5  ;;  %v587_v11 = vpack.c.bf16 %v4983_v6, %v4979_v5  ;;  %v5000_v12 = vsel %vm4957_vm8, %v524_v60, 0.0  ;;  %606 = vrot.lane.b32.xlu0 %v579_v0, %s4675_s15  ;;  %v5046_v30 = vsel %vm4957_vm8, %v521_v9, 0.0  ;;  %v5050_v31 = vsel %vm4957_vm8, %v522_v10, 0.0  ;;  %v4500_v27 = vld [vmem:[%s6809_s3 + $0x18] sm:$0xff]  }
  0x5c   : > { %6906 = vst [vmem:[#allocation23_spill] sm:$0xff] %v4983_v6  ;;  %6907 = vst [vmem:[#allocation24_spill] sm:$0xff] %v4987_v7  ;;  %v584_v23 = vpack.c.bf16 %v5000_v12, %v4987_v7  ;;  %v5055_v34 = vsel %vm4893_vm2, %v4885_v39, 0.0  ;;  %v5060_v40 = vsel %vm4893_vm2, %v4891_v44, 0.0  ;;  %v5065_v41 = vsel %vm4917_vm5, %v5005_v14, 0.0  ;;  %s6743_s7 = scalar_lea.sflag [#allocation6], %s454_s17 }
  0x5d   : > { %6909 = vst [vmem:[#allocation26_spill] sm:$0xff] %v5000_v12  ;;  %6911 = vst [vmem:[#allocation28_spill] sm:$0xff] %v5025_v21  ;;  %622 = vrot.lane.b32.xlu1 %v587_v11, %s4675_s15  ;;  %v5070_v42 = vsel %vm4917_vm5, %v5008_v15, 0.0  ;;  %v583_v52 = vpack.c.bf16 %v5040_v25, %v5035_v24  ;;  %v5079_v55 = vsel %vm4957_vm8, %v519_v17, 0.0  ;;  %v5083_v57 = vsel %vm4957_vm8, %v520_v18, 0.0  ;;  %s4549_s24 = sshll.u32 %s4678_s16, 4  ;;  %s4550_s24 = int_to_ptr.vmem [resolvable:$false] %s4549_s24 }
  0x5e   : > { %6912 = vst [vmem:[#allocation29_spill] sm:$0xff] %v5035_v24  ;;  %6913 = vst [vmem:[#allocation30_spill] sm:$0xff] %v5040_v25  ;;  %v5085_v60 = vpack.c.bf16 %v520_v18, %v519_v17  ;;  %v580_v0 = vpack.c.bf16 %v5025_v21, %v5020_v20  ;;  %v581_v9 = vpack.c.bf16 %v5050_v31, %v5046_v30  ;;  %v5107_v18 = vld [vmem:[%s6809_s3] sm:$0xff]   ;;  %s4551_s30 = scalar_lea.vmem %s4550_s24, 2048 }
  0x5f   : > { %6914 = vst [vmem:[#allocation31_spill] sm:$0xff] %v5046_v30  ;;  %6915 = vst [vmem:[#allocation32_spill] sm:$0xff] %v5050_v31  ;;  %620 = vrot.lane.b32.xlu0 %v586_v19, %s4675_s15  ;;  %v576_v10 = vpack.c.bf16 %v5060_v40, %v5055_v34  ;;  %v577_v11 = vpack.c.bf16 %v5070_v42, %v5065_v41  ;;  %v578_v17 = vpack.c.bf16 %v5083_v57, %v5079_v55  ;;  %v6815_v19 = vmov 0  }
  0x60   : > { %6916 = vst [vmem:[#allocation33_spill] sm:$0xff] %v5055_v34  ;;  %6917 = vst [vmem:[#allocation34_spill] sm:$0xff] %v5060_v40  ;;  %745 = vmatprep.mubr.bf16.mxu0 %v6815_v19  ;;  %4496 = vset.pattern.permute.xlu1 %v6815_v19  ;;  %v6935_v28 = vpack.c.bf16 %v4871_v33, %v4865_v29  ;;  %v6937_v29 = vpack.c.bf16 %v4875_v36, %v4873_v35  ;;  %v4501_v35 = vld [vmem:[%s6809_s3 + $0x20] sm:$0xff]  }
  0x61   : > { %6918 = vst [vmem:[#allocation35_spill] sm:$0xff] %v5065_v41  ;;  %6919 = vst [vmem:[#allocation36_spill] sm:$0xff] %v5070_v42  ;;  %616 = vrot.lane.b32.xlu1 %v584_v23, %s4675_s15  ;;  %4242 = vmatprep.mubr.msk.bf16.mxu1 %vm700_vm9, %v5107_v18  ;;  %v6938_v33 = vpack.c.bf16 %v5008_v15, %v5005_v14  ;;  %v6939_v36 = vpack.c.bf16 %v4891_v44, %v4885_v39  ;;  %v1295_v39 = vld [vmem:[%s6810_s4 + $0x30] sm:$0xff]  ;;  %v1293_v44 = vld [vmem:[%s6810_s4 + $0x20] sm:$0xff] }
  0x62   : > { %6920 = vst [vmem:[#allocation37_spill] sm:$0xff] %v5079_v55  ;;  %6921 = vst [vmem:[#allocation38_spill] sm:$0xff] %v5083_v57  ;;  %4495 = vset.pattern.permute.xlu0 %v6815_v19  ;;  %v1289_v14 = vld [vmem:[%s6810_s4] sm:$0xff]  ;;  %v1290_v15 = vld [vmem:[%s6810_s4 + $0x8] sm:$0xff] }
  0x63   : > { %614 = vrot.lane.b32.xlu0 %v583_v52, %s4675_s15  ;;  %vm5148_vm12 = vmpackc.low %vm4957_vm8, %vm4957_vm8 }
  0x64   : > { %vm5157_vm13 = vmpackc.low %vm4917_vm5, %vm4917_vm5 }
  0x65   : > { %608 = vrot.lane.b32.xlu1 %v580_v0, %s4675_s15 }
  0x67   : > { %610 = vrot.lane.b32.xlu0 %v581_v9, %s4675_s15 }
  0x69   : > { %600 = vrot.lane.b32.xlu1 %v576_v10, %s4675_s15 }
  0x6b   : > { %602 = vrot.lane.b32.xlu0 %v577_v11, %s4675_s15 }
  0x6d   : > { %604 = vrot.lane.b32.xlu1 %v578_v17, %s4675_s15 }
  0xc9   : > { %v619_v23 = vpop.permute.xlu0 %618 }
  0xca   : > { %v613_v52 = vpop.permute.xlu1 %612  ;;  %v653_v0 = vsel %vm624_vm10, 0, %v619_v23 }
  0xcb   : > { %1082 = vrot.lane.b32.xlu0 %v653_v0, %s4677_s11  ;;  %v650_v9 = vsel %vm624_vm10, 0, %v613_v52 }
  0xcc   : > { %1074 = vrot.lane.b32.xlu1 %v650_v9, %s4677_s11 }
  0xcd   : > { %v607_v10 = vpop.permute.xlu0 %606 }
  0xce   : > { %v647_v17 = vsel %vm624_vm10, 0, %v607_v10 }
  0xcf   : > { %v623_v11 = vpop.permute.xlu1 %622  ;;  %1066 = vrot.lane.b32.xlu0 %v647_v17, %s4677_s11 }
  0xd1   : > { %v621_v47 = vpop.permute.xlu0 %620 }
  0xd2   : > { %v632_v38 = vsel %vm624_vm10, %v621_v47, %v623_v11  ;;  %v631_v16 = vsel %vm624_vm10, %v619_v23, %v621_v47 }
  0xd3   : > { %v617_v43 = vpop.permute.xlu1 %616  ;;  %4234 = vmatprep.subr.bf16.mxu1 %v632_v38  ;;  %1084 = vrot.lane.b32.xlu0 %v631_v16, %s4677_s11 }
  0xd4   : > { %721 = vmatprep.subr.bf16.mxu0 %v631_v16  ;;  %1086 = vrot.lane.b32.xlu1 %v632_v38, %s4677_s11  ;;  %v660_v50 = vsel %vm624_vm10, %v617_v43, 0 }
  0xd5   : > { %3798 = vmatpush1.bf16.msk.msra.mxu0 %vm5123_vm11, %v619_v23  ;;  %4235 = vmatpush3.bf16.msra.mxu1 %v632_v38  ;;  %v615_v0 = vpop.permute.xlu0 %614 }
  0xd6   : > { %v630_v17 = vsel %vm624_vm10, %v615_v0, %v617_v43  ;;  %v629_v47 = vsel %vm624_vm10, %v613_v52, %v615_v0  ;;  %v4504_v43 = vld [vmem:[%s6809_s3 + $0x38] sm:$0xff]  }
  0xd7   : > { %v609_v9 = vpop.permute.xlu1 %608  ;;  %1078 = vrot.lane.b32.xlu0 %v630_v17, %s4677_s11  ;;  %723 = vmatprep.subr.bf16.mxu0 %v629_v47 }
  0xd8   : > { %4236 = vmatprep.subr.bf16.mxu1 %v630_v17  ;;  %1076 = vrot.lane.b32.xlu1 %v629_v47, %s4677_s11  ;;  %v627_v16 = vsel %vm624_vm10, %v607_v10, %v609_v9 }
  0xd9   : > { %3800 = vmatpush1.bf16.msk.msra.mxu0 %vm5123_vm11, %v613_v52  ;;  %4237 = vmatpush3.bf16.msra.mxu1 %v630_v17  ;;  %v611_v23 = vpop.permute.xlu0 %610 }
  0xda   : > { %725 = vmatprep.subr.bf16.mxu0 %v627_v16  ;;  %v628_v22 = vsel %vm624_vm10, %v609_v9, %v611_v23  ;;  %v6925_v9 = vmov 0  ;;  %v658_v56 = vsel %vm624_vm10, %v611_v23, 0 }
  0xdb   : > { %v601_v38 = vpop.permute.xlu1 %600  ;;  %1068 = vrot.lane.b32.xlu0 %v627_v16, %s4677_s11  ;;  %4238 = vmatprep.subr.bf16.mxu1 %v628_v22  ;;  %v6926_v9 = vsel %vm5148_vm12, 4294967295, %v6925_v9 }
  0xdc   : > { %1070 = vrot.lane.b32.xlu1 %v628_v22, %s4677_s11  ;;  %6927 = vst [vmem:[#allocation40_spill] sm:$0xff] %v6926_v9  ;;  %v644_v16 = vsel %vm624_vm10, 0, %v601_v38 }
  0xdd   : > { %3802 = vmatpush1.bf16.msk.msra.mxu0 %vm5123_vm11, %v607_v10  ;;  %4239 = vmatpush3.bf16.msra.mxu1 %v628_v22  ;;  %v603_v0 = vpop.permute.xlu0 %602  ;;  %v6928_v22 = vmov 0  ;;  %v4498_v10 = vld [vmem:[%s6809_s3 + $0x8] sm:$0xff]  }
  0xde   : > { %v625_v52 = vsel %vm624_vm10, %v601_v38, %v603_v0  ;;  %v6929_v22 = vsel %vm5157_vm13, 4294967295, %v6928_v22 }
  0xdf   : > { %v605_v47 = vpop.permute.xlu1 %604  ;;  %727 = vmatprep.subr.bf16.mxu0 %v625_v52  ;;  %6930 = vst [vmem:[#allocation41_spill] sm:$0xff] %v6929_v22 }
  0xe0   : > { %v626_v17 = vsel %vm624_vm10, %v603_v0, %v605_v47  ;;  %1060 = vrot.lane.b32.xlu1 %v625_v52, %s4677_s11  ;;  %v662_v0 = vsel %vm624_vm10, %v623_v11, 0  ;;  %v6931_v52 = vmov 0 }
  0xe1   : > { %1062 = vrot.lane.b32.xlu0 %v626_v17, %s4677_s11  ;;  %4240 = vmatprep.subr.bf16.mxu1 %v626_v17  ;;  %v6932_v52 = vsel %vm5179_vm14, 4294967295, %v6931_v52 }
  0xe2   : > { %3804 = vmatpush1.bf16.msk.msra.mxu0 %vm5123_vm11, %v601_v38  ;;  %4241 = vmatpush3.bf16.msra.mxu1 %v626_v17  ;;  %6933 = vst [vmem:[#allocation42_spill] sm:$0xff] %v6932_v52  ;;  %v4499_v17 = vld [vmem:[%s6809_s3 + $0x10] sm:$0xff]  }
  0xe3   : > { %4250 = vmatprep.subr.msk.bf16.mxu0 %vm5148_vm12, %v4897_v46  ;;  %3819 = vmatprep.subr.msk.bf16.mxu1 %vm5157_vm13, %v3818_v13  ;;  %v6934_v13 = vpack.c.bf16 %v4974_v4, %v4971_v3  ;;  %v6936_v3 = vpack.c.bf16 %v4954_v62, %v4951_v61  ;;  %v1294_v61 = vld [vmem:[%s6810_s4 + $0x28] sm:$0xff]  ;;  %v1292_v4 = vld [vmem:[%s6810_s4 + $0x18] sm:$0xff] }
  0xe4   : > { %1058 = vrot.lane.b32.xlu1 %v644_v16, %s4677_s11  ;;  %v4502_v62 = vld [vmem:[%s6809_s3 + $0x28] sm:$0xff]  }
  0xe5   : > { %1088 = vrot.lane.b32.xlu0 %v662_v0, %s4677_s11  ;;  %3805 = vmatmul.mubr.msk.bf16.vlgmr.msra.gmra.mxu0 %vm700_vm9, %v5107_v18 }
  0xe6   : > { %4243 = vmatmul.mubr.msk.bf16.vlgmr.msra.gmra.mxu1 %vm700_vm9, %v4498_v10  ;;  %755 = vmatprep.mubr.bf16.mxu0 %v6815_v19 }
  0xe7   : > { %3822 = vmatpush1.bf16.msk.msra.mxu1 %vm5179_vm14, %v3821_v32  ;;  %4246 = vmatprep.mubr.msk.bf16.mxu1 %vm700_vm9, %v4499_v17  ;;  %v656_v32 = vsel %vm624_vm10, %v605_v47, 0 }
  0xe8   : > { %3825 = vmatprep.subr.msk.bf16.mxu1 %vm5157_vm13, %v6934_v13  ;;  %1080 = vrot.lane.b32.xlu1 %v660_v50, %s4677_s11 }
  0xe9   : > { %1072 = vrot.lane.b32.xlu0 %v658_v56, %s4677_s11  ;;  %4251 = vmatpush3.bf16.msk.msra.mxu0 %vm5148_vm12, %v4897_v46  ;;  %v1296_v46 = vld [vmem:[%s6810_s4 + $0x38] sm:$0xff] }
  0xea   : > { %4252 = vmatprep.subr.msk.bf16.mxu0 %vm5148_vm12, %v4963_v1 }
  0xeb   : > { %3828 = vmatpush1.bf16.msk.msra.mxu1 %vm5179_vm14, %v6935_v28 }
  0xec   : > { %3831 = vmatprep.subr.msk.bf16.mxu1 %vm5157_vm13, %v6936_v3  ;;  %1064 = vrot.lane.b32.xlu1 %v656_v32, %s4677_s11 }
  0xed   : > { %3806 = vmatmul.mubr.msk.bf16.gmra.mxu0 %vm700_vm9, %v4498_v10  ;;  %1329 = vperm.xlu0 %4495, %v1295_v39  }
  0xee   : > { %4247 = vmatmul.mubr.msk.bf16.gmra.mxu1 %vm700_vm9, %v4500_v27  ;;  %765 = vmatprep.mubr.bf16.mxu0 %v6815_v19 }
  0xef   : > { %3834 = vmatpush1.bf16.msk.msra.mxu1 %vm5179_vm14, %v6937_v29  ;;  %4253 = vmatpush3.bf16.msk.msra.mxu0 %vm5148_vm12, %v4963_v1  ;;  %v1291_v1 = vld [vmem:[%s6810_s4 + $0x10] sm:$0xff] }
  0xf0   : > { %3837 = vmatprep.subr.msk.bf16.mxu1 %vm5157_vm13, %v6938_v33  ;;  %915 = vmatprep.mubr.bf16.mxu1 %v6815_v19 }
  0xf1   : > { %4254 = vmatprep.subr.msk.bf16.mxu0 %vm5148_vm12, %v5042_v26  ;;  %1334 = vperm.xlu1 %4496, %v1296_v46  }
  0xf2   : > { %1324 = vperm.xlu0 %4495, %v1294_v61  }
  0xf3   : > { %3840 = vmatpush1.bf16.msk.msra.mxu1 %vm5179_vm14, %v6939_v36  ;;  %4255 = vmatpush3.bf16.msk.msra.mxu0 %vm5148_vm12, %v5042_v26  ;;  %v4503_v26 = vld [vmem:[%s6809_s3 + $0x30] sm:$0xff]  }
  0xf4   : > { %4256 = vmatprep.subr.msk.bf16.mxu0 %vm5148_vm12, %v5085_v60 }
  0xf5   : > { %3807 = vmatmul.mubr.msk.bf16.gmra.mxu0 %vm700_vm9, %v4499_v17  ;;  %1319 = vperm.xlu1 %4496, %v1293_v44  }
  0xf6   : > { %3841 = vmatmul.mubr.msk.bf16.vlgmr.msra.gmra.mxu1 %vm700_vm9, %v4501_v35  ;;  %775 = vmatprep.mubr.bf16.mxu0 %v6815_v19 }
  0xf7   : > { %925 = vmatprep.mubr.bf16.mxu1 %v6815_v19  ;;  %4257 = vmatpush3.bf16.msk.msra.mxu0 %vm5148_vm12, %v5085_v60  ;;  %v4505_v60 = vld [vmem:[%s6809_s3 + $0x40] sm:$0xff]  }
  0xf8   : > { %1314 = vperm.xlu0 %4495, %v1292_v4  }
  0xf9   : > { %1309 = vperm.xlu1 %4496, %v1291_v1  }
  0xfc   : > { %1304 = vperm.xlu0 %4495, %v1290_v15  }
  0xfd   : > { %3808 = vmatmul.mubr.msk.bf16.gmra.mxu0 %vm700_vm9, %v4500_v27  ;;  %1299 = vperm.xlu1 %4496, %v1289_v14   ;;  %v4506_v14 = vld [vmem:[%s6809_s3 + $0x48] sm:$0xff]  }
  0xfe   : > { %3842 = vmatmul.mubr.msk.bf16.gmra.mxu1 %vm700_vm9, %v4502_v62  ;;  %4258 = vmatprep.mubr.msk.bf16.mxu0 %vm700_vm9, %v4501_v35 }
  0xff   : > { %935 = vmatprep.mubr.bf16.mxu1 %v6815_v19 }
 0x105   : > { %4259 = vmatmul.mubr.msk.bf16.vlgmr.msra.gmra.mxu0 %vm700_vm9, %v4502_v62 }
 0x106   : > { %3843 = vmatmul.mubr.msk.bf16.gmra.mxu1 %vm700_vm9, %v4503_v26  ;;  %4262 = vmatprep.mubr.msk.bf16.mxu0 %vm700_vm9, %v4503_v26  ;;  %v4507_v26 = vld [vmem:[%s6809_s3 + $0x50] sm:$0xff]  }
 0x107   : > { %945 = vmatprep.mubr.bf16.mxu1 %v6815_v19 }
 0x10d   : > { %4263 = vmatmul.mubr.msk.bf16.gmra.mxu0 %vm700_vm9, %v4504_v43 }
 0x10e   : > { %3844 = vmatmul.mubr.msk.bf16.gmra.mxu1 %vm700_vm9, %v4504_v43  ;;  %1159 = vmatprep.mubr.bf16.mxu0 %v6815_v19  ;;  %v4508_v43 = vld [vmem:[%s6809_s3 + $0x58] sm:$0xff]  }
 0x10f   : > { %4274 = vmatprep.mubr.msk.bf16.mxu1 %vm700_vm9, %v4505_v60 }
 0x13d   : > { %v1083_v18 = vpop.permute.xlu0 %1082 }
 0x13e   : > { %v1075_v23 = vpop.permute.xlu1 %1074 }
 0x141   : > { %v1067_v11 = vpop.permute.xlu0 %1066 }
 0x145   : > { %v1085_v38 = vpop.permute.xlu0 %1084 }
 0x146   : > { %v1087_v47 = vpop.permute.xlu1 %1086  ;;  %v1100_v10 = vsel %vm1090_vm15, %v1083_v18, %v1085_v38 }
 0x147   : > { %v1101_v16 = vsel %vm1090_vm15, %v1085_v38, %v1087_v47 }
 0x148   : > { %1135 = vmatprep.subr.bf16.mxu0 %v1101_v16 }
 0x149   : > { %1136 = vmatpush1.bf16.msra.mxu0 %v1100_v10  ;;  %v1079_v0 = vpop.permute.xlu0 %1078 }
 0x14a   : > { %v1077_v17 = vpop.permute.xlu1 %1076 }
 0x14b   : > { %v1098_v50 = vsel %vm1090_vm15, %v1077_v17, %v1079_v0  ;;  %v1097_v56 = vsel %vm1090_vm15, %v1075_v23, %v1077_v17 }
 0x14c   : > { %1137 = vmatprep.subr.bf16.mxu0 %v1098_v50 }
 0x14d   : > { %1138 = vmatpush1.bf16.msra.mxu0 %v1097_v56  ;;  %v1069_v13 = vpop.permute.xlu0 %1068 }
 0x14e   : > { %v1071_v27 = vpop.permute.xlu1 %1070  ;;  %v1094_v28 = vsel %vm1090_vm15, %v1067_v11, %v1069_v13 }
 0x14f   : > { %v1095_v32 = vsel %vm1090_vm15, %v1069_v13, %v1071_v27 }
 0x150   : > { %1139 = vmatprep.subr.bf16.mxu0 %v1095_v32 }
 0x151   : > { %1140 = vmatpush1.bf16.msra.mxu0 %v1094_v28 }
 0x152   : > { %v1061_v29 = vpop.permute.xlu1 %1060 }
 0x153   : > { %v1063_v3 = vpop.permute.xlu0 %1062 }
 0x154   : > { %v1092_v33 = vsel %vm1090_vm15, %v1061_v29, %v1063_v3 }
 0x155   : > { %1141 = vmatprep.subr.bf16.mxu0 %v1092_v33 }
 0x156   : > { %v1059_v36 = vpop.permute.xlu1 %1058 }
 0x157   : > { %v1089_v35 = vpop.permute.xlu0 %1088  ;;  %v1091_v46 = vsel %vm1090_vm15, %v1059_v36, %v1061_v29 }
 0x158   : > { %v1102_v39 = vsel %vm1090_vm15, %v1087_v47, %v1089_v35  ;;  %1142 = vmatpush1.bf16.msra.mxu0 %v1091_v46 }
 0x159   : > { %4266 = vmatprep.subr.bf16.mxu1 %v1102_v39 }
 0x15a   : > { %4267 = vmatpush3.bf16.msra.mxu1 %v1102_v39  ;;  %v1081_v61 = vpop.permute.xlu1 %1080 }
 0x15b   : > { %v1073_v44 = vpop.permute.xlu0 %1072  ;;  %3873 = vmatmul.mubr.msk.bf16.vlgmr.msra.gmra.mxu0 %vm700_vm9, %v4505_v60  ;;  %v1099_v62 = vsel %vm1090_vm15, %v1079_v0, %v1081_v61 }
 0x15c   : > { %4268 = vmatprep.subr.bf16.mxu1 %v1099_v62  ;;  %1169 = vmatprep.mubr.bf16.mxu0 %v6815_v19  ;;  %v1096_v1 = vsel %vm1090_vm15, %v1071_v27, %v1073_v44 }
 0x15e   : > { %4269 = vmatpush3.bf16.msra.mxu1 %v1099_v62  ;;  %v1065_v4 = vpop.permute.xlu1 %1064 }
 0x15f   : > { %4270 = vmatprep.subr.bf16.mxu1 %v1096_v1  ;;  %v1093_v15 = vsel %vm1090_vm15, %v1063_v3, %v1065_v4 }
 0x162   : > { %4271 = vmatpush3.bf16.msra.mxu1 %v1096_v1 }
 0x163   : > { %4272 = vmatprep.subr.bf16.mxu1 %v1093_v15  ;;  %3874 = vmatmul.mubr.msk.bf16.gmra.mxu0 %vm700_vm9, %v4506_v14 }
 0x164   : > { %1179 = vmatprep.mubr.bf16.mxu0 %v6815_v19 }
 0x166   : > { %4273 = vmatpush3.bf16.msra.mxu1 %v1093_v15 }
 0x168   : > { %v5389_v48 = vpop.permute.xlu0 %1329 }
 0x169   : > { %4275 = vmatmul.mubr.msk.bf16.vlgmr.msra.gmra.mxu1 %vm700_vm9, %v4506_v14 }
 0x16a   : > { %4278 = vmatprep.mubr.msk.bf16.mxu1 %vm700_vm9, %v4507_v26 }
 0x16b   : > { %3875 = vmatmul.mubr.msk.bf16.gmra.mxu0 %vm700_vm9, %v4507_v26 }
 0x16c   : > { %1189 = vmatprep.mubr.bf16.mxu0 %v6815_v19  ;;  %v5385_v2 = vpop.permute.xlu1 %1334 }
 0x16d   : > { %6942 = vst [vmem:[#allocation45_spill] sm:$0xff] %v5385_v2  ;;  %v5395_v31 = vpop.permute.xlu0 %1324 }
 0x170   : > { %v5393_v57 = vpop.permute.xlu1 %1319 }
 0x171   : > { %4279 = vmatmul.mubr.msk.bf16.gmra.mxu1 %vm700_vm9, %v4508_v43 }
 0x172   : > { %1575 = vmatprep.mubr.bf16.mxu1 %v6815_v19 }
 0x173   : > { %3876 = vmatmul.mubr.msk.bf16.gmra.mxu0 %vm700_vm9, %v4508_v43  ;;  %v5403_v12 = vpop.permute.xlu0 %1314 }
 0x174   : > { %v5399_v24 = vpop.permute.xlu1 %1309 }
 0x177   : > { %v5407_v51 = vpop.permute.xlu0 %1304 }
 0x178   : > { %v5405_v34 = vpop.permute.xlu1 %1299 }
 0x1a5   : > { %v747_v60 = vpop.f32.mrf.mxu0 }
 0x1a6   : > { %v5349_v38 = vpop.f32.mrf.mxu1 }
 0x1a7   : > { %v749_v18 = vpop.f32.mrf.mxu0 }
 0x1a8   : > { %v5351_v10 = vpop.f32.mrf.mxu1 }
 0x1a9   : > { %v751_v11 = vpop.f32.mrf.mxu0 }
 0x1aa   : > { %v5355_v0 = vpop.f32.mrf.mxu1 }
 0x1ab   : > { %v753_v23 = vpop.f32.mrf.mxu0 }
 0x1ac   : > { %v5359_v50 = vpop.f32.mrf.mxu1 }
 0x1ad   : > { %v757_v47 = vpop.f32.mrf.mxu0 }
 0x1ae   : > { %v5361_v13 = vpop.f32.mrf.mxu1 }
 0x1af   : > { %v5353_v16 = vpop.f32.mrf.mxu0 }
 0x1b0   : > { %v5365_v28 = vpop.f32.mrf.mxu1 }
 0x1b1   : > { %v5357_v17 = vpop.f32.mrf.mxu0 }
 0x1b2   : > { %v5369_v3 = vpop.f32.mrf.mxu1 }
 0x1b3   : > { %v763_v56 = vpop.f32.mrf.mxu0 }
 0x1b4   : > { %v5373_v33 = vpop.f32.mrf.mxu1 }
 0x1b5   : > { %v5363_v27 = vpop.f32.mrf.mxu0  ;;  %6940 = vst [vmem:[#allocation43_spill] sm:$0xff] %v5373_v33 }
 0x1b6   : > { %v917_v36 = vpop.f32.mrf.mxu1 }
 0x1b7   : > { %v5367_v32 = vpop.f32.mrf.mxu0  ;;  %v918_v7 = vadd.f32 %v917_v36, %v747_v60 }
 0x1b8   : > { %v919_v39 = vpop.f32.mrf.mxu1 }
 0x1b9   : > { %v5371_v29 = vpop.f32.mrf.mxu0  ;;  %v920_v59 = vadd.f32 %v919_v39, %v749_v18 }
 0x1ba   : > { %v921_v61 = vpop.f32.mrf.mxu1 }
 0x1bb   : > { %v5375_v35 = vpop.f32.mrf.mxu0  ;;  %v922_v52 = vadd.f32 %v921_v61, %v751_v11 }
 0x1bc   : > { %v923_v1 = vpop.f32.mrf.mxu1 }
 0x1bd   : > { %v5377_v46 = vpop.f32.mrf.mxu0  ;;  %v924_v63 = vadd.f32 %v923_v1, %v753_v23 }
 0x1be   : > { %v927_v14 = vpop.f32.mrf.mxu1 }
 0x1bf   : > { %v5379_v44 = vpop.f32.mrf.mxu0  ;;  %v928_v33 = vadd.f32 %v927_v14, %v757_v47 }
 0x1c0   : > { %v929_v26 = vpop.f32.mrf.mxu1 }
 0x1c1   : > { %v5381_v62 = vpop.f32.mrf.mxu0  ;;  %v930_v18 = vadd.f32 %v929_v26, %v5353_v16 }
 0x1c2   : > { %v931_v19 = vpop.f32.mrf.mxu1 }
 0x1c3   : > { %v5383_v4 = vpop.f32.mrf.mxu0 }
 0x1c4   : > { %6941 = vst [vmem:[#allocation44_spill] sm:$0xff] %v5383_v4  ;;  %v933_v42 = vpop.f32.mrf.mxu1 }
 0x1c5   : > { %v4260_v15 = vpop.f32.mrf.mxu0 }
 0x1c6   : > { %v937_v21 = vpop.f32.mrf.mxu1 }
 0x1c7   : > { %v990_v43 = vpop.f32.mrf.mxu0  ;;  %v938_v47 = vadd.f32 %v937_v21, %v5363_v27 }
 0x1c8   : > { %v939_v49 = vpop.f32.mrf.mxu1 }
 0x1c9   : > { %v4261_v41 = vpop.f32.mrf.mxu0 }
 0x1ca   : > { %v941_v55 = vpop.f32.mrf.mxu1 }
 0x1cb   : > { %v993_v20 = vpop.f32.mrf.mxu0 }
 0x1cc   : > { %v943_v54 = vpop.f32.mrf.mxu1  ;;  %v994_v21 = vadd.f32 %v993_v20, %v5359_v50 }
 0x1cd   : > { %v5387_v8 = vpop.f32.mrf.mxu0 }
 0x1ce   : > { %v947_v6 = vpop.f32.mrf.mxu1  ;;  %v1015_v50 = vadd.f32 %v5387_v8, %v5361_v13 }
 0x1cf   : > { %v5391_v53 = vpop.f32.mrf.mxu0 }
 0x1d0   : > { %v949_v9 = vpop.f32.mrf.mxu1 }
 0x1d1   : > { %v5397_v30 = vpop.f32.mrf.mxu0 }
 0x1d2   : > { %v951_v60 = vpop.f32.mrf.mxu1 }
 0x1d3   : > { %v5401_v25 = vpop.f32.mrf.mxu0 }
 0x1d4   : > { %6943 = vst [vmem:[#allocation46_spill] sm:$0xff] %v5401_v25 }
 0x21b   : > { %v1161_v5 = vpop.f32.mrf.mxu0 }
 0x21c   : > { %v1265_v58 = vadd.f32 %v1161_v5, %v918_v7 }
 0x21d   : > { %v1163_v40 = vpop.f32.mrf.mxu0 }
 0x21e   : > { %v1266_v22 = vadd.f32 %v1163_v40, %v920_v59  ;;  %v1337_v4 = vadd.f32 %v5405_v34, %v1265_v58  ;;  %v932_v59 = vadd.f32 %v931_v19, %v5357_v17  ;;  %v934_v40 = vadd.f32 %v933_v42, %v763_v56 }
 0x21f   : > { %v1165_v37 = vpop.f32.mrf.mxu0  ;;  %v1002_v56 = vadd.f32 %v4261_v41, %v5355_v0 }
 0x220   : > { %v1268_v2 = vadd.f32 %v1165_v37, %v922_v52  ;;  %v5411_v36 = vadd.f32 %v5405_v34, %v1266_v22  ;;  %v1361_v39 = vmax.f32 %v1337_v4, 0.0  ;;  %v999_v52 = vadd.f32 %v4260_v15, %v5349_v38 }
 0x221   : > { %v1167_v25 = vpop.f32.mrf.mxu0  ;;  %v991_v22 = vadd.f32 %v990_v43, %v5351_v10  ;;  %v942_v38 = vadd.f32 %v941_v55, %v5371_v29  ;;  %v944_v55 = vadd.f32 %v943_v54, %v5375_v35  ;;  %v948_v4 = vadd.f32 %v947_v6, %v5377_v46 }
 0x222   : > { %v1340_v5 = vadd.f32 %v5407_v51, %v1268_v2  ;;  %v1269_v7 = vadd.f32 %v1167_v25, %v924_v63  ;;  %v940_v63 = vadd.f32 %v939_v49, %v5367_v32  ;;  %v5423_v25 = vpop.f32.mrf.mxu1  ;;  %v1362_v42 = vmax.f32 %v5411_v36, 0.0 }
 0x223   : > { %v1171_v11 = vpop.f32.mrf.mxu0  ;;  %v5445_v41 = vsel %vm4893_vm2, %v1361_v39, 0.0  ;;  %v1007_v54 = vadd.f32 %v5391_v53, %v5365_v28  ;;  %v950_v35 = vadd.f32 %v949_v9, %v5379_v44  ;;  %v1018_v46 = vadd.f32 %v5397_v30, %v5369_v3 }
 0x224   : > { %v1364_v23 = vmax.f32 %v1340_v5, 0.0  ;;  %v5417_v58 = vadd.f32 %v5407_v51, %v1269_v7  ;;  %v1271_v37 = vadd.f32 %v1171_v11, %v928_v33 }
 0x225   : > { %v1173_v2 = vpop.f32.mrf.mxu0 }
 0x226   : > { %v5426_v19 = vpack.c.bf16 %v1364_v23, %v1361_v39  ;;  %v1365_v16 = vmax.f32 %v5417_v58, 0.0  ;;  %v1272_v17 = vadd.f32 %v1173_v2, %v930_v18  ;;  %v1343_v10 = vadd.f32 %v5399_v24, %v1271_v37 }
 0x227   : > { %v1175_v33 = vpop.f32.mrf.mxu0  ;;  %v5434_v49 = vsel %vm4893_vm2, %v1364_v23, 0.0 }
 0x228   : > { %v5441_v27 = vpack.c.bf16 %v1365_v16, %v1362_v42  ;;  %v1274_v32 = vadd.f32 %v1175_v33, %v932_v59  ;;  %v5449_v0 = vadd.f32 %v5399_v24, %v1272_v17  ;;  %v1409_v20 = vpack.c.bf16 %v5434_v49, %v5445_v41 }
 0x229   : > { %v4276_v61 = vpop.f32.mrf.mxu1  ;;  %v1177_v1 = vpop.f32.mrf.mxu0  ;;  %v1367_v43 = vmax.f32 %v1343_v10, 0.0 }
 0x22a   : > { %v1273_v29 = vadd.f32 %v4276_v61, %v999_v52  ;;  %v1346_v14 = vadd.f32 %v5403_v12, %v1274_v32  ;;  %v1275_v15 = vadd.f32 %v1177_v1, %v934_v40  ;;  %v952_v40 = vadd.f32 %v951_v60, %v5381_v62 }
 0x22b   : > { %v1234_v26 = vpop.f32.mrf.mxu1  ;;  %v1181_v7 = vpop.f32.mrf.mxu0  ;;  %v1368_v53 = vmax.f32 %v5449_v0, 0.0  ;;  %v5481_v3 = vsel %vm4893_vm2, %v1367_v43, 0.0  ;;  %v1389_v0 = vsel %vm4917_vm5, %v1365_v16, 0.0 }
 0x22c   : > { %v1267_v5 = vadd.f32 %v1234_v26, %v991_v22  ;;  %v1370_v18 = vmax.f32 %v1346_v14, 0.0  ;;  %v5461_v59 = vadd.f32 %v5399_v24, %v1273_v29  ;;  %v5464_v8 = vadd.f32 %v5403_v12, %v1275_v15 }
 0x22d   : > { %v1277_v6 = vadd.f32 %v1181_v7, %v938_v47  ;;  %v4277_v13 = vpop.f32.mrf.mxu1  ;;  %v1183_v28 = vpop.f32.mrf.mxu0  ;;  %v6944_v7 = vld [vmem:[#allocation43_spill] sm:$0xff] }
 0x22e   : > { %v1276_v9 = vadd.f32 %v4277_v13, %v1002_v56  ;;  %v5470_v44 = vpack.c.bf16 %v1370_v18, %v1367_v43  ;;  %v1371_v11 = vmax.f32 %v5464_v8, 0.0  ;;  %v5474_v24 = vadd.f32 %v5405_v34, %v1267_v5  ;;  %v5598_v8 = vld [vmem:[%s6809_s3 + $0x60] sm:$0xff]  }
 0x22f   : > { %v1278_v39 = vadd.f32 %v1183_v28, %v940_v63  ;;  %v1237_v23 = vpop.f32.mrf.mxu1  ;;  %v1185_v30 = vpop.f32.mrf.mxu0  ;;  %v5485_v62 = vsel %vm4893_vm2, %v1370_v18, 0.0  ;;  %v1369_v60 = vmax.f32 %v5461_v59, 0.0  ;;  %v6945_v18 = vld [vmem:[#allocation46_spill] sm:$0xff]  ;;  %4290 = vmatprep.mubr.msk.bf16.mxu0 %vm700_vm9, %v5598_v8 }
 0x230   : > { %v5477_v37 = vadd.f32 %v5403_v12, %v1276_v9  ;;  %v1270_v52 = vadd.f32 %v1237_v23, %v994_v21  ;;  %v5492_v34 = vpack.c.bf16 %v1371_v11, %v1368_v53  ;;  %v5495_v12 = vadd.f32 %v5393_v57, %v1277_v6 }
 0x231   : > { %v1280_v22 = vadd.f32 %v1185_v30, %v942_v38  ;;  %v4280_v47 = vpop.f32.mrf.mxu1  ;;  %v1187_v56 = vpop.f32.mrf.mxu0  ;;  %v1412_v10 = vpack.c.bf16 %v5485_v62, %v5481_v3  ;;  %v1363_v33 = vmax.f32 %v5474_v24, 0.0  ;;  %v1350_v21 = vadd.f32 %v5393_v57, %v1278_v39 }
 0x232   : > { %v1372_v63 = vmax.f32 %v5477_v37, 0.0  ;;  %v5499_v2 = vadd.f32 %v5407_v51, %v1270_v52  ;;  %v1285_v17 = vadd.f32 %v4280_v47, %v1015_v50  ;;  %v1281_v61 = vadd.f32 %v1187_v56, %v944_v55 }
 0x233   : > { %v1352_v32 = vadd.f32 %v5395_v31, %v1280_v22  ;;  %v1250_v29 = vpop.f32.mrf.mxu1  ;;  %v1191_v14 = vpop.f32.mrf.mxu0  ;;  %v1373_v15 = vmax.f32 %v5495_v12, 0.0  ;;  %v1010_v6 = vadd.f32 %v6945_v18, %v6944_v7  ;;  %v1374_v39 = vmax.f32 %v1350_v21, 0.0  ;;  %v6946_v22 = vld [vmem:[#allocation45_spill] sm:$0xff] }
 0x234   : > { %v5510_v38 = vpack.c.bf16 %v1372_v63, %v1369_v60  ;;  %v1366_v51 = vmax.f32 %v5499_v2, 0.0  ;;  %v1357_v1 = vadd.f32 %v5389_v48, %v1285_v17  ;;  %v1279_v50 = vadd.f32 %v1250_v29, %v1007_v54 }
 0x235   : > { %v1376_v26 = vmax.f32 %v1352_v32, 0.0  ;;  %v1353_v43 = vadd.f32 %v5395_v31, %v1281_v61  ;;  %v1283_v5 = vadd.f32 %v1191_v14, %v948_v4  ;;  %v4281_v55 = vpop.f32.mrf.mxu1  ;;  %v1193_v28 = vpop.f32.mrf.mxu0  ;;  %v6947_v32 = vld [vmem:[#allocation44_spill] sm:$0xff]  ;;  %v1387_v16 = vsel %vm4957_vm8, %v1363_v33, 0.0 }
 0x236   : > { %v5522_v13 = vpack.c.bf16 %v1366_v51, %v1363_v33  ;;  %v1351_v9 = vadd.f32 %v5393_v57, %v1279_v50  ;;  %v1288_v54 = vadd.f32 %v4281_v55, %v1018_v46  ;;  %v1284_v30 = vadd.f32 %v1193_v28, %v950_v35 }
 0x237   : > { %v5525_v23 = vpack.c.bf16 %v1376_v26, %v1373_v15  ;;  %v1377_v52 = vmax.f32 %v1353_v43, 0.0  ;;  %v1253_v4 = vpop.f32.mrf.mxu1  ;;  %v1381_v12 = vmax.f32 %v1357_v1, 0.0  ;;  %v1195_v56 = vpop.f32.mrf.mxu0  ;;  %v954_v61 = vadd.f32 %v5423_v25, %v6947_v32 }
 0x238   : > { %v1360_v47 = vadd.f32 %v6946_v22, %v1288_v54  ;;  %v1282_v17 = vadd.f32 %v1253_v4, %v1010_v6  ;;  %v1355_v57 = vadd.f32 %v5389_v48, %v1283_v5  ;;  %v1286_v46 = vadd.f32 %v1195_v56, %v952_v40 }
 0x239   : > { %v5530_v29 = vpack.c.bf16 %v1377_v52, %v1374_v39  ;;  %v1375_v50 = vmax.f32 %v1351_v9, 0.0  ;;  %v1197_v43 = vpop.f32.mrf.mxu0  ;;  %v1356_v35 = vadd.f32 %v5389_v48, %v1284_v30  ;;  %v1405_v25 = vsel %vm4957_vm8, %v1381_v12, 0.0 }
 0x23a   : > { %v1384_v21 = vmax.f32 %v1360_v47, 0.0  ;;  %v1354_v14 = vadd.f32 %v5395_v31, %v1282_v17  ;;  %v1358_v1 = vadd.f32 %v6946_v22, %v1286_v46  ;;  %v1287_v55 = vadd.f32 %v1197_v43, %v954_v61 }
 0x23b   : > { %v1379_v40 = vmax.f32 %v1355_v57, 0.0  ;;  %v1399_v48 = vsel %vm4957_vm8, %v1375_v50, 0.0  ;;  %v1401_v47 = vsel %vm4917_vm5, %v1377_v52, 0.0  ;;  %v1400_v61 = vsel %vm4893_vm2, %v1376_v26, 0.0 }
 0x23c   : > { %v5536_v7 = vpack.c.bf16 %v1384_v21, %v1381_v12  ;;  %v1378_v18 = vmax.f32 %v1354_v14, 0.0  ;;  %v1408_v5 = vsel %vm4957_vm8, %v1384_v21, 0.0  ;;  %v1382_v9 = vmax.f32 %v1358_v1, 0.0 }
 0x23d   : > { %v1359_v54 = vadd.f32 %v6946_v22, %v1287_v55  ;;  %v1420_v31 = vpack.c.bf16 %v1408_v5, %v1405_v25  ;;  %v1380_v12 = vmax.f32 %v1356_v35, 0.0  ;;  %v1398_v22 = vsel %vm4917_vm5, %v1374_v39, 0.0 }
 0x23e   : > { %v5543_v28 = vpack.c.bf16 %v1378_v18, %v1375_v50  ;;  %v1402_v30 = vsel %vm4957_vm8, %v1378_v18, 0.0  ;;  %v5551_v17 = vpack.c.bf16 %v1382_v9, %v1379_v40  ;;  %v1393_v57 = vsel %vm4957_vm8, %v1369_v60, 0.0 }
 0x23f   : > { %v1383_v56 = vmax.f32 %v1359_v54, 0.0  ;;  %1455 = vrot.lane.b32.xlu1 %v1420_v31, %s4675_s15  ;;  %v1417_v32 = vpack.c.bf16 %v1402_v30, %v1399_v48  ;;  %v1396_v52 = vsel %vm4957_vm8, %v1372_v63, 0.0  ;;  %v1416_v50 = vpack.c.bf16 %v1401_v47, %v1398_v22 }
 0x240   : > { %v1414_v21 = vpack.c.bf16 %v1396_v52, %v1393_v57  ;;  %v1397_v39 = vsel %vm4893_vm2, %v1373_v15, 0.0  ;;  %v1406_v59 = vsel %vm4893_vm2, %v1382_v9, 0.0  ;;  %v1403_v37 = vsel %vm4893_vm2, %v1379_v40, 0.0 }
 0x241   : > { %v5566_v46 = vpack.c.bf16 %v1383_v56, %v1380_v12  ;;  %1449 = vrot.lane.b32.xlu0 %v1417_v32, %s4675_s15  ;;  %v1415_v60 = vpack.c.bf16 %v1400_v61, %v1397_v39  ;;  %v1407_v63 = vsel %vm4917_vm5, %v1383_v56, 0.0  ;;  %v1418_v26 = vpack.c.bf16 %v1406_v59, %v1403_v37  ;;  %v4510_v32 = vld [vmem:[%s6809_s3 + $0x68] sm:$0xff]   ;;  %v3987_v39 = vld [vmem:[%s6810_s4 + $0x50] sm:$0xff] }
 0x242   : > { %v1404_v14 = vsel %vm4917_vm5, %v1380_v12, 0.0  ;;  %v1395_v43 = vsel %vm4917_vm5, %v1371_v11, 0.0  ;;  %v1392_v35 = vsel %vm4917_vm5, %v1368_v53, 0.0  ;;  %v1386_v53 = vsel %vm4917_vm5, %v1362_v42, 0.0  ;;  %v4514_v59 = vld [vmem:[%s6809_s3 + $0x88] sm:$0xff]   ;;  %v4515_v37 = vld [vmem:[%s6809_s3 + $0x90] sm:$0xff]  }
 0x243   : > { %1447 = vrot.lane.b32.xlu1 %v1416_v50, %s4675_s15  ;;  %v1419_v15 = vpack.c.bf16 %v1407_v63, %v1404_v14  ;;  %v1413_v1 = vpack.c.bf16 %v1395_v43, %v1392_v35  ;;  %v1390_v11 = vsel %vm4957_vm8, %v1366_v51, 0.0  ;;  %v1410_v58 = vpack.c.bf16 %v1389_v0, %v1386_v53  ;;  %v4516_v63 = vld [vmem:[%s6809_s3 + $0x98] sm:$0xff]  }
 0x244   : > { %v1411_v36 = vpack.c.bf16 %v1390_v11, %v1387_v16 }
 0x245   : > { %1445 = vrot.lane.b32.xlu0 %v1415_v60, %s4675_s15  ;;  %v3986_v60 = vld [vmem:[%s6810_s4 + $0x48] sm:$0xff] }
 0x247   : > { %1451 = vrot.lane.b32.xlu1 %v1418_v26, %s4675_s15  ;;  %v4517_v26 = vld [vmem:[%s6809_s3 + $0xa0] sm:$0xff]  }
 0x249   : > { %1453 = vrot.lane.b32.xlu0 %v1419_v15, %s4675_s15 }
 0x24b   : > { %1439 = vrot.lane.b32.xlu1 %v1412_v10, %s4675_s15 }
 0x24d   : > { %1441 = vrot.lane.b32.xlu0 %v1413_v1, %s4675_s15 }
 0x24f   : > { %1443 = vrot.lane.b32.xlu1 %v1414_v21, %s4675_s15  ;;  %v6954_v21 = vmov 0  }
 0x251   : > { %1433 = vrot.lane.b32.xlu0 %v1409_v20, %s4675_s15 }
 0x253   : > { %1435 = vrot.lane.b32.xlu1 %v1410_v58, %s4675_s15 }
 0x255   : > { %1437 = vrot.lane.b32.xlu0 %v1411_v36, %s4675_s15 }
 0x2b1   : > { %v1456_v42 = vpop.permute.xlu1 %1455 }
 0x2b2   : > { %v1492_v50 = vsel %vm624_vm10, %v1456_v42, 0 }
 0x2b3   : > { %v5626_v3 = vpop.permute.xlu0 %1449 }
 0x2b5   : > { %v1448_v62 = vpop.permute.xlu1 %1447 }
 0x2b6   : > { %v1462_v2 = vsel %vm624_vm10, %v1448_v62, %v5626_v3 }
 0x2b7   : > { %v1446_v49 = vpop.permute.xlu0 %1445  ;;  %1908 = vrot.lane.b32.xlu1 %v1462_v2, %s4677_s11 }
 0x2b8   : > { %v1461_v41 = vsel %vm624_vm10, %v1446_v49, %v1448_v62  ;;  %v1480_v5 = vsel %vm624_vm10, 0, %v1446_v49 }
 0x2b9   : > { %1906 = vrot.lane.b32.xlu0 %v1461_v41, %s4677_s11  ;;  %v1452_v20 = vpop.permute.xlu1 %1451 }
 0x2ba   : > { %v1483_v24 = vsel %vm624_vm10, 0, %v1452_v20 }
 0x2bb   : > { %v1454_v10 = vpop.permute.xlu0 %1453  ;;  %1912 = vrot.lane.b32.xlu1 %v1483_v24, %s4677_s11 }
 0x2bc   : > { %v1464_v33 = vsel %vm624_vm10, %v1454_v10, %v1456_v42  ;;  %v1463_v51 = vsel %vm624_vm10, %v1452_v20, %v1454_v10 }
 0x2bd   : > { %4282 = vmatprep.subr.bf16.mxu0 %v1464_v33  ;;  %1916 = vrot.lane.b32.xlu0 %v1464_v33, %s4677_s11  ;;  %v1440_v55 = vpop.permute.xlu1 %1439 }
 0x2be   : > { %1551 = vmatprep.subr.bf16.mxu1 %v1463_v51  ;;  %4283 = vmatpush3.bf16.msra.mxu0 %v1464_v33  ;;  %v1477_v12 = vsel %vm624_vm10, 0, %v1440_v55 }
 0x2bf   : > { %3902 = vmatpush1.bf16.msk.msra.mxu1 %vm5123_vm11, %v1452_v20  ;;  %v1442_v25 = vpop.permute.xlu0 %1441  ;;  %4284 = vmatprep.subr.bf16.mxu0 %v1462_v2 }
 0x2c0   : > { %1914 = vrot.lane.b32.xlu1 %v1463_v51, %s4677_s11  ;;  %1553 = vmatprep.subr.bf16.mxu1 %v1461_v41  ;;  %v1459_v31 = vsel %vm624_vm10, %v1440_v55, %v1442_v25 }
 0x2c1   : > { %1904 = vrot.lane.b32.xlu0 %v1480_v5, %s4677_s11  ;;  %v1444_v40 = vpop.permute.xlu1 %1443  ;;  %v4518_v5 = vld [vmem:[%s6809_s3 + $0xa8] sm:$0xff]  }
 0x2c2   : > { %4285 = vmatpush3.bf16.msra.mxu0 %v1462_v2  ;;  %v1460_v9 = vsel %vm624_vm10, %v1442_v25, %v1444_v40 }
 0x2c3   : > { %3904 = vmatpush1.bf16.msk.msra.mxu1 %vm5123_vm11, %v1446_v49  ;;  %v1434_v54 = vpop.permute.xlu0 %1433  ;;  %4286 = vmatprep.subr.bf16.mxu0 %v1460_v9 }
 0x2c4   : > { %1898 = vrot.lane.b32.xlu1 %v1459_v31, %s4677_s11  ;;  %1555 = vmatprep.subr.bf16.mxu1 %v1459_v31  ;;  %v1474_v57 = vsel %vm624_vm10, 0, %v1434_v54  ;;  %v4519_v31 = vld [vmem:[%s6809_s3 + $0xb0] sm:$0xff]  }
 0x2c5   : > { %1900 = vrot.lane.b32.xlu0 %v1460_v9, %s4677_s11  ;;  %v1436_v48 = vpop.permute.xlu1 %1435 }
 0x2c6   : > { %4287 = vmatpush3.bf16.msra.mxu0 %v1460_v9  ;;  %v1457_v30 = vsel %vm624_vm10, %v1434_v54, %v1436_v48 }
 0x2c7   : > { %3906 = vmatpush1.bf16.msk.msra.mxu1 %vm5123_vm11, %v1440_v55  ;;  %v1438_v47 = vpop.permute.xlu0 %1437 }
 0x2c8   : > { %1896 = vrot.lane.b32.xlu1 %v1477_v12, %s4677_s11  ;;  %1557 = vmatprep.subr.bf16.mxu1 %v1457_v30  ;;  %v1458_v56 = vsel %vm624_vm10, %v1436_v48, %v1438_v47  ;;  %v4520_v48 = vld [vmem:[%s6809_s3 + $0xb8] sm:$0xff]  }
 0x2c9   : > { %4288 = vmatprep.subr.bf16.mxu0 %v1458_v56  ;;  %1890 = vrot.lane.b32.xlu0 %v1457_v30, %s4677_s11 }
 0x2ca   : > { %4289 = vmatpush3.bf16.msra.mxu0 %v1458_v56 }
 0x2cb   : > { %3908 = vmatpush1.bf16.msk.msra.mxu1 %vm5123_vm11, %v1434_v54  ;;  %3923 = vmatprep.subr.msk.bf16.mxu0 %vm5157_vm13, %v5566_v46  ;;  %v4511_v46 = vld [vmem:[%s6809_s3 + $0x70] sm:$0xff]  }
 0x2cc   : > { %1892 = vrot.lane.b32.xlu1 %v1458_v56, %s4677_s11  ;;  %4298 = vmatprep.subr.msk.bf16.mxu1 %vm5148_vm12, %v5536_v7 }
 0x2cd   : > { %1888 = vrot.lane.b32.xlu0 %v1474_v57, %s4677_s11  ;;  %4291 = vmatmul.mubr.msk.bf16.vlgmr.msra.gmra.mxu0 %vm700_vm9, %v4510_v32 }
 0x2ce   : > { %3909 = vmatmul.mubr.msk.bf16.vlgmr.msra.gmra.mxu1 %vm700_vm9, %v5598_v8  ;;  %3926 = vmatpush1.bf16.msk.msra.mxu0 %vm5179_vm14, %v5551_v17  ;;  %v1490_v17 = vsel %vm624_vm10, %v5626_v3, 0 }
 0x2cf   : > { %4299 = vmatpush3.bf16.msk.msra.mxu1 %vm5148_vm12, %v5536_v7  ;;  %3929 = vmatprep.subr.msk.bf16.mxu0 %vm5157_vm13, %v5530_v29  ;;  %v4512_v7 = vld [vmem:[%s6809_s3 + $0x78] sm:$0xff]   ;;  %v1488_v29 = vsel %vm624_vm10, %v1444_v40, 0 }
 0x2d0   : > { %1918 = vrot.lane.b32.xlu1 %v1492_v50, %s4677_s11  ;;  %4300 = vmatprep.subr.msk.bf16.mxu1 %vm5148_vm12, %v5543_v28 }
 0x2d1   : > { %1910 = vrot.lane.b32.xlu0 %v1490_v17, %s4677_s11  ;;  %1585 = vmatprep.mubr.bf16.mxu1 %v6954_v21 }
 0x2d2   : > { %3932 = vmatpush1.bf16.msk.msra.mxu0 %vm5179_vm14, %v5525_v23  ;;  %4294 = vmatprep.mubr.msk.bf16.mxu0 %vm700_vm9, %v4511_v46  ;;  %v1486_v23 = vsel %vm624_vm10, %v1438_v47, 0 }
 0x2d3   : > { %4301 = vmatpush3.bf16.msk.msra.mxu1 %vm5148_vm12, %v5543_v28  ;;  %3935 = vmatprep.subr.msk.bf16.mxu0 %vm5157_vm13, %v5492_v34  ;;  %v3991_v28 = vld [vmem:[%s6810_s4 + $0x70] sm:$0xff]  ;;  %v3992_v34 = vld [vmem:[%s6810_s4 + $0x78] sm:$0xff] }
 0x2d4   : > { %1902 = vrot.lane.b32.xlu1 %v1488_v29, %s4677_s11  ;;  %4302 = vmatprep.subr.msk.bf16.mxu1 %vm5148_vm12, %v5510_v38 }
 0x2d5   : > { %1894 = vrot.lane.b32.xlu0 %v1486_v23, %s4677_s11  ;;  %4295 = vmatmul.mubr.msk.bf16.gmra.mxu0 %vm700_vm9, %v4512_v7 }
 0x2d6   : > { %3938 = vmatpush1.bf16.msk.msra.mxu0 %vm5179_vm14, %v5470_v44  ;;  %3910 = vmatmul.mubr.msk.bf16.gmra.mxu1 %vm700_vm9, %v4510_v32  ;;  %v3989_v44 = vld [vmem:[%s6810_s4 + $0x60] sm:$0xff] }
 0x2d7   : > { %4303 = vmatpush3.bf16.msk.msra.mxu1 %vm5148_vm12, %v5510_v38  ;;  %3941 = vmatprep.subr.msk.bf16.mxu0 %vm5157_vm13, %v5441_v27  ;;  %v4513_v38 = vld [vmem:[%s6809_s3 + $0x80] sm:$0xff]   ;;  %v3990_v27 = vld [vmem:[%s6810_s4 + $0x68] sm:$0xff] }
 0x2d8   : > { %2159 = vperm.xlu1 %4496, %v3991_v28   ;;  %4304 = vmatprep.subr.msk.bf16.mxu1 %vm5148_vm12, %v5522_v13 }
 0x2d9   : > { %2164 = vperm.xlu0 %4495, %v3992_v34   ;;  %1595 = vmatprep.mubr.bf16.mxu1 %v6954_v21 }
 0x2da   : > { %3944 = vmatpush1.bf16.msk.msra.mxu0 %vm5179_vm14, %v5426_v19  ;;  %1745 = vmatprep.mubr.bf16.mxu0 %v6954_v21  ;;  %v3988_v19 = vld [vmem:[%s6810_s4 + $0x58] sm:$0xff] }
 0x2db   : > { %4305 = vmatpush3.bf16.msk.msra.mxu1 %vm5148_vm12, %v5522_v13  ;;  %v3985_v13 = vld [vmem:[%s6810_s4 + $0x40] sm:$0xff] }
 0x2dc   : > { %2149 = vperm.xlu1 %4496, %v3989_v44  }
 0x2dd   : > { %2154 = vperm.xlu0 %4495, %v3990_v27   ;;  %3945 = vmatmul.mubr.msk.bf16.vlgmr.msra.gmra.mxu0 %vm700_vm9, %v4513_v38 }
 0x2de   : > { %3911 = vmatmul.mubr.msk.bf16.gmra.mxu1 %vm700_vm9, %v4511_v46  ;;  %1755 = vmatprep.mubr.bf16.mxu0 %v6954_v21 }
 0x2df   : > { %1605 = vmatprep.mubr.bf16.mxu1 %v6954_v21 }
 0x2e0   : > { %2139 = vperm.xlu1 %4496, %v3987_v39  }
 0x2e1   : > { %2144 = vperm.xlu0 %4495, %v3988_v19  }
 0x2e4   : > { %2129 = vperm.xlu1 %4496, %v3985_v13  }
 0x2e5   : > { %2134 = vperm.xlu0 %4495, %v3986_v60   ;;  %3946 = vmatmul.mubr.msk.bf16.gmra.mxu0 %vm700_vm9, %v4514_v59 }
 0x2e6   : > { %3912 = vmatmul.mubr.msk.bf16.gmra.mxu1 %vm700_vm9, %v4512_v7  ;;  %1765 = vmatprep.mubr.bf16.mxu0 %v6954_v21 }
 0x2e7   : > { %4306 = vmatprep.mubr.msk.bf16.mxu1 %vm700_vm9, %v4513_v38 }
 0x2ed   : > { %3947 = vmatmul.mubr.msk.bf16.gmra.mxu0 %vm700_vm9, %v4515_v37 }
 0x2ee   : > { %4307 = vmatmul.mubr.msk.bf16.vlgmr.msra.gmra.mxu1 %vm700_vm9, %v4514_v59  ;;  %1775 = vmatprep.mubr.bf16.mxu0 %v6954_v21 }
 0x2ef   : > { %4310 = vmatprep.mubr.msk.bf16.mxu1 %vm700_vm9, %v4515_v37 }
 0x2f5   : > { %3948 = vmatmul.mubr.msk.bf16.gmra.mxu0 %vm700_vm9, %v4516_v63 }
 0x2f6   : > { %4311 = vmatmul.mubr.msk.bf16.gmra.mxu1 %vm700_vm9, %v4516_v63  ;;  %4322 = vmatprep.mubr.msk.bf16.mxu0 %vm700_vm9, %v4517_v26 }
 0x2f7   : > { %1988 = vmatprep.mubr.bf16.mxu1 %v6954_v21 }
 0x329   : > { %v1909_v14 = vpop.permute.xlu1 %1908 }
 0x32b   : > { %v1907_v15 = vpop.permute.xlu0 %1906 }
 0x32c   : > { %v1927_v11 = vsel %vm1090_vm15, %v1907_v15, %v1909_v14 }
 0x32d   : > { %v1913_v43 = vpop.permute.xlu1 %1912 }
 0x32f   : > { %v1917_v35 = vpop.permute.xlu0 %1916 }
 0x332   : > { %v1915_v1 = vpop.permute.xlu1 %1914 }
 0x333   : > { %v1929_v8 = vsel %vm1090_vm15, %v1913_v43, %v1915_v1  ;;  %v1905_v0 = vpop.permute.xlu0 %1904  ;;  %v1930_v53 = vsel %vm1090_vm15, %v1915_v1, %v1917_v35 }
 0x334   : > { %1964 = vmatprep.subr.bf16.mxu1 %v1930_v53  ;;  %v1926_v36 = vsel %vm1090_vm15, %v1905_v0, %v1907_v15 }
 0x335   : > { %1965 = vmatpush1.bf16.msra.mxu1 %v1929_v8 }
 0x336   : > { %1966 = vmatprep.subr.bf16.mxu1 %v1927_v11  ;;  %v1899_v58 = vpop.permute.xlu1 %1898 }
 0x337   : > { %v1901_v16 = vpop.permute.xlu0 %1900 }
 0x338   : > { %v1924_v42 = vsel %vm1090_vm15, %v1899_v58, %v1901_v16 }
 0x339   : > { %1967 = vmatpush1.bf16.msra.mxu1 %v1926_v36 }
 0x33a   : > { %1968 = vmatprep.subr.bf16.mxu1 %v1924_v42  ;;  %v1897_v3 = vpop.permute.xlu1 %1896 }
 0x33b   : > { %v1923_v62 = vsel %vm1090_vm15, %v1897_v3, %v1899_v58  ;;  %v1891_v2 = vpop.permute.xlu0 %1890 }
 0x33d   : > { %1969 = vmatpush1.bf16.msra.mxu1 %v1923_v62 }
 0x33e   : > { %v1893_v49 = vpop.permute.xlu1 %1892 }
 0x33f   : > { %v1889_v41 = vpop.permute.xlu0 %1888  ;;  %v1921_v20 = vsel %vm1090_vm15, %v1891_v2, %v1893_v49 }
 0x340   : > { %v1920_v24 = vsel %vm1090_vm15, %v1889_v41, %v1891_v2  ;;  %1970 = vmatprep.subr.bf16.mxu1 %v1921_v20 }
 0x341   : > { %1971 = vmatpush1.bf16.msra.mxu1 %v1920_v24 }
 0x342   : > { %v1919_v10 = vpop.permute.xlu1 %1918 }
 0x343   : > { %v1911_v33 = vpop.permute.xlu0 %1910  ;;  %v1931_v51 = vsel %vm1090_vm15, %v1917_v35, %v1919_v10 }
 0x344   : > { %4314 = vmatprep.subr.bf16.mxu0 %v1931_v51  ;;  %3977 = vmatmul.mubr.msk.bf16.vlgmr.msra.gmra.mxu1 %vm700_vm9, %v4517_v26  ;;  %v1928_v55 = vsel %vm1090_vm15, %v1909_v14, %v1911_v33 }
 0x345   : > { %4315 = vmatpush3.bf16.msra.mxu0 %v1931_v51  ;;  %1998 = vmatprep.mubr.bf16.mxu1 %v6954_v21 }
 0x346   : > { %4316 = vmatprep.subr.bf16.mxu0 %v1928_v55  ;;  %v1903_v25 = vpop.permute.xlu1 %1902 }
 0x347   : > { %v1925_v40 = vsel %vm1090_vm15, %v1901_v16, %v1903_v25  ;;  %v1895_v9 = vpop.permute.xlu0 %1894 }
 0x348   : > { %v1922_v54 = vsel %vm1090_vm15, %v1893_v49, %v1895_v9 }
 0x349   : > { %4317 = vmatpush3.bf16.msra.mxu0 %v1928_v55 }
 0x34a   : > { %4318 = vmatprep.subr.bf16.mxu0 %v1925_v40 }
 0x34c   : > { %3978 = vmatmul.mubr.msk.bf16.gmra.mxu1 %vm700_vm9, %v4518_v5 }
 0x34d   : > { %4319 = vmatpush3.bf16.msra.mxu0 %v1925_v40  ;;  %2008 = vmatprep.mubr.bf16.mxu1 %v6954_v21 }
 0x34e   : > { %4320 = vmatprep.subr.bf16.mxu0 %v1922_v54 }
 0x351   : > { %4321 = vmatpush3.bf16.msra.mxu0 %v1922_v54 }
 0x353   : > { %v5867_v16 = vpop.permute.xlu1 %2159 }
 0x354   : > { %4323 = vmatmul.mubr.msk.bf16.vlgmr.msra.gmra.mxu0 %vm700_vm9, %v4518_v5  ;;  %3979 = vmatmul.mubr.msk.bf16.gmra.mxu1 %vm700_vm9, %v4519_v31  ;;  %6955 = vst [vmem:[#allocation43_spill] sm:$0xff] %v5867_v16  ;;  %v5871_v3 = vpop.permute.xlu0 %2164 }
 0x355   : > { %4326 = vmatprep.mubr.msk.bf16.mxu0 %vm700_vm9, %v4519_v31  ;;  %2018 = vmatprep.mubr.bf16.mxu1 %v6954_v21  ;;  %6956 = vst [vmem:[#allocation46_spill] sm:$0xff] %v5871_v3 }
 0x357   : > { %v5873_v62 = vpop.permute.xlu1 %2149 }
 0x358   : > { %v5877_v41 = vpop.permute.xlu0 %2154 }
 0x359   : > { %6957 = vst [vmem:[#allocation45_spill] sm:$0xff] %v5877_v41 }
 0x35b   : > { %v5881_v10 = vpop.permute.xlu1 %2139 }
 0x35c   : > { %4327 = vmatmul.mubr.msk.bf16.gmra.mxu0 %vm700_vm9, %v4520_v48  ;;  %3980 = vmatmul.mubr.msk.bf16.gmra.mxu1 %vm700_vm9, %v4520_v48  ;;  %v5885_v55 = vpop.permute.xlu0 %2144 }
 0x35d   : > { %2429 = vmatprep.mubr.bf16.mxu0 %v6954_v21 }
 0x35f   : > { %v5887_v40 = vpop.permute.xlu1 %2129 }
 0x360   : > { %v5892_v21 = vpop.permute.xlu0 %2134 }
 0x361   : > { %6960 = vst [vmem:[#allocation47_spill] sm:$0xff] %v5892_v21 }
 0x38d   : > { %v5827_v61 = vpop.f32.mrf.mxu0 }
 0x38e   : > { %v1577_v30 = vpop.f32.mrf.mxu1 }
 0x38f   : > { %v5831_v46 = vpop.f32.mrf.mxu0 }
 0x390   : > { %v5823_v47 = vpop.f32.mrf.mxu1 }
 0x391   : > { %v5835_v17 = vpop.f32.mrf.mxu0 }
 0x392   : > { %v1581_v12 = vpop.f32.mrf.mxu1 }
 0x393   : > { %v5839_v29 = vpop.f32.mrf.mxu0 }
 0x394   : > { %v5825_v56 = vpop.f32.mrf.mxu1 }
 0x395   : > { %v5843_v28 = vpop.f32.mrf.mxu0 }
 0x396   : > { %v1587_v32 = vpop.f32.mrf.mxu1 }
 0x397   : > { %v5847_v44 = vpop.f32.mrf.mxu0 }
 0x398   : > { %v5829_v57 = vpop.f32.mrf.mxu1 }
 0x399   : > { %v5851_v27 = vpop.f32.mrf.mxu0 }
 0x39a   : > { %v5833_v50 = vpop.f32.mrf.mxu1 }
 0x39b   : > { %v5855_v19 = vpop.f32.mrf.mxu0 }
 0x39c   : > { %v5837_v7 = vpop.f32.mrf.mxu1 }
 0x39d   : > { %v1747_v59 = vpop.f32.mrf.mxu0 }
 0x39e   : > { %v5841_v23 = vpop.f32.mrf.mxu1  ;;  %v1748_v25 = vadd.f32 %v1747_v59, %v1577_v30 }
 0x39f   : > { %v1749_v37 = vpop.f32.mrf.mxu0 }
 0x3a0   : > { %v5845_v34 = vpop.f32.mrf.mxu1 }
 0x3a1   : > { %v1751_v26 = vpop.f32.mrf.mxu0 }
 0x3a2   : > { %v5849_v38 = vpop.f32.mrf.mxu1  ;;  %v1752_v48 = vadd.f32 %v1751_v26, %v1581_v12 }
 0x3a3   : > { %v1753_v15 = vpop.f32.mrf.mxu0 }
 0x3a4   : > { %v5853_v39 = vpop.f32.mrf.mxu1 }
 0x3a5   : > { %v1757_v43 = vpop.f32.mrf.mxu0 }
 0x3a6   : > { %v5857_v13 = vpop.f32.mrf.mxu1  ;;  %v1758_v16 = vadd.f32 %v1757_v43, %v1587_v32  ;;  %v6963_v43 = vld [vmem:[#allocation34_spill] sm:$0xff] }
 0x3a7   : > { %v1759_v1 = vpop.f32.mrf.mxu0 }
 0x3a8   : > { %v5859_v60 = vpop.f32.mrf.mxu1 }
 0x3a9   : > { %v1761_v0 = vpop.f32.mrf.mxu0 }
 0x3aa   : > { %v5861_v63 = vpop.f32.mrf.mxu1 }
 0x3ab   : > { %v1763_v11 = vpop.f32.mrf.mxu0 }
 0x3ac   : > { %v5863_v14 = vpop.f32.mrf.mxu1 }
 0x3ad   : > { %v1767_v36 = vpop.f32.mrf.mxu0 }
 0x3ae   : > { %v4308_v35 = vpop.f32.mrf.mxu1 }
 0x3af   : > { %v1769_v2 = vpop.f32.mrf.mxu0 }
 0x3b0   : > { %v1820_v8 = vpop.f32.mrf.mxu1 }
 0x3b1   : > { %v1771_v20 = vpop.f32.mrf.mxu0 }
 0x3b2   : > { %v4309_v53 = vpop.f32.mrf.mxu1 }
 0x3b3   : > { %v1773_v33 = vpop.f32.mrf.mxu0 }
 0x3b4   : > { %v5865_v58 = vpop.f32.mrf.mxu1 }
 0x3b5   : > { %v1777_v54 = vpop.f32.mrf.mxu0 }
 0x3b6   : > { %v5869_v42 = vpop.f32.mrf.mxu1 }
 0x3b7   : > { %v1779_v3 = vpop.f32.mrf.mxu0 }
 0x3b8   : > { %v5875_v49 = vpop.f32.mrf.mxu1 }
 0x3b9   : > { %v1781_v12 = vpop.f32.mrf.mxu0 }
 0x3ba   : > { %v5879_v24 = vpop.f32.mrf.mxu1 }
 0x3bc   : > { %v5883_v51 = vpop.f32.mrf.mxu1 }
 0x3bd   : > { %6958 = vst [vmem:[#allocation44_spill] sm:$0xff] %v5883_v51 }
 0x404   : > { %v1990_v5 = vpop.f32.mrf.mxu1 }
 0x405   : > { %v2094_v9 = vadd.f32 %v1990_v5, %v1748_v25 }
 0x406   : > { %v5889_v31 = vpop.f32.mrf.mxu1 }
 0x407   : > { %6959 = vst [vmem:[#allocation40_spill] sm:$0xff] %v5889_v31  ;;  %v2167_v52 = vadd.f32 %v5887_v40, %v2094_v9  ;;  %v1762_v9 = vadd.f32 %v1761_v0, %v5833_v50  ;;  %v1829_v50 = vadd.f32 %v4308_v35, %v5827_v61  ;;  %v1760_v0 = vadd.f32 %v1759_v1, %v5829_v57 }
 0x408   : > { %v1994_v22 = vpop.f32.mrf.mxu1 }
 0x409   : > { %v2191_v18 = vmax.f32 %v2167_v52, 0.0  ;;  %v2097_v4 = vadd.f32 %v1994_v22, %v1752_v48 }
 0x40a   : > { %v5894_v6 = vpop.f32.mrf.mxu1 }
 0x40b   : > { %6961 = vst [vmem:[#allocation48_spill] sm:$0xff] %v5894_v6  ;;  %v2170_v30 = vadd.f32 %v5892_v21, %v2097_v4  ;;  %v2215_v25 = vsel %vm4893_vm2, %v2191_v18, 0.0  ;;  %v6962_v6 = vld [vmem:[#allocation33_spill] sm:$0xff]  ;;  %v1750_v18 = vadd.f32 %v1749_v37, %v5823_v47  ;;  %v1770_v47 = vadd.f32 %v1769_v2, %v5845_v34 }
 0x40c   : > { %v2000_v59 = vpop.f32.mrf.mxu1  ;;  %v2239_v32 = vadd.f32 %v2215_v25, %v6962_v6  ;;  %v1821_v25 = vadd.f32 %v1820_v8, %v5831_v46  ;;  %v1774_v46 = vadd.f32 %v1773_v33, %v5853_v39  ;;  %v1837_v33 = vadd.f32 %v5875_v49, %v5847_v44 }
 0x40d   : > { %v2194_v5 = vmax.f32 %v2170_v30, 0.0  ;;  %v2100_v41 = vadd.f32 %v2000_v59, %v1758_v16  ;;  %v1754_v16 = vadd.f32 %v1753_v15, %v5825_v56  ;;  %v1783_v30 = vpop.f32.mrf.mxu0  ;;  %v1772_v56 = vadd.f32 %v1771_v20, %v5849_v38  ;;  %v6965_v20 = vld [vmem:[#allocation19_spill] sm:$0xff] }
 0x40e   : > { %v2002_v26 = vpop.f32.mrf.mxu1 }
 0x40f   : > { %v2218_v52 = vsel %vm4893_vm2, %v2194_v5, 0.0  ;;  %v2173_v22 = vadd.f32 %v5881_v10, %v2100_v41  ;;  %v1764_v41 = vadd.f32 %v1763_v11, %v5837_v7  ;;  %v1768_v5 = vadd.f32 %v1767_v36, %v5841_v23 }
 0x410   : > { %v2004_v48 = vpop.f32.mrf.mxu1  ;;  %v2242_v4 = vadd.f32 %v2218_v52, %v6963_v43  ;;  %v1824_v7 = vadd.f32 %v5865_v58, %v5839_v29  ;;  %v1778_v23 = vadd.f32 %v1777_v54, %v5857_v13  ;;  %v6964_v58 = vld [vmem:[#allocation18_spill] sm:$0xff]  ;;  %v1848_v54 = vadd.f32 %v5879_v24, %v5851_v27 }
 0x411   : > { %v2197_v21 = vmax.f32 %v2173_v22, 0.0  ;;  %v2103_v31 = vadd.f32 %v2004_v48, %v1762_v9  ;;  %v1832_v9 = vadd.f32 %v4309_v53, %v5835_v17  ;;  %v1782_v52 = vadd.f32 %v1781_v12, %v5861_v63 }
 0x412   : > { %v2006_v59 = vpop.f32.mrf.mxu1  ;;  %v5907_v51 = vpack.c.bf16 %v2242_v4, %v2239_v32  ;;  %v2101_v22 = vadd.f32 %v2002_v26, %v1760_v0  ;;  %v1784_v4 = vadd.f32 %v1783_v30, %v5863_v14  ;;  %v6967_v0 = vld [vmem:[#allocation40_spill] sm:$0xff] }
 0x413   : > { %v2176_v6 = vadd.f32 %v5885_v55, %v2103_v31  ;;  %v2221_v61 = vsel %vm4893_vm2, %v2197_v21, 0.0  ;;  %v2104_v1 = vadd.f32 %v2006_v59, %v1764_v41  ;;  %v1845_v21 = vadd.f32 %v5869_v42, %v5843_v28  ;;  %v6966_v59 = vld [vmem:[#allocation44_spill] sm:$0xff] }
 0x414   : > { %v4324_v37 = vpop.f32.mrf.mxu0  ;;  %v2010_v15 = vpop.f32.mrf.mxu1  ;;  %v2245_v39 = vadd.f32 %v2221_v61, %v6964_v58  ;;  %v1780_v31 = vadd.f32 %v1779_v3, %v5859_v60  ;;  %v5951_v41 = vadd.f32 %v6967_v0, %v1750_v18  ;;  %v6970_v18 = vld [vmem:[#allocation43_spill] sm:$0xff]  ;;  %v6975_v0 = vld [vmem:[#allocation22_spill] sm:$0xff] }
 0x415   : > { %v2200_v57 = vmax.f32 %v2176_v6, 0.0  ;;  %v2102_v35 = vadd.f32 %v4324_v37, %v1829_v50  ;;  %v2106_v53 = vadd.f32 %v2010_v15, %v1768_v5  ;;  %v5938_v28 = vadd.f32 %v5885_v55, %v2104_v1  ;;  %v6968_v6 = vld [vmem:[#allocation48_spill] sm:$0xff]  ;;  %v6972_v1 = vld [vmem:[#allocation47_spill] sm:$0xff] }
 0x416   : > { %v2063_v34 = vpop.f32.mrf.mxu0  ;;  %v2012_v8 = vpop.f32.mrf.mxu1  ;;  %v1840_v50 = vadd.f32 %v6966_v59, %v5855_v19  ;;  %v5954_v14 = vadd.f32 %v6968_v6, %v1754_v16 }
 0x417   : > { %v2224_v38 = vsel %vm4893_vm2, %v2200_v57, 0.0  ;;  %v2175_v17 = vadd.f32 %v5881_v10, %v2102_v35  ;;  %v2096_v11 = vadd.f32 %v2063_v34, %v1821_v25  ;;  %v2107_v36 = vadd.f32 %v2012_v8, %v1770_v47 }
 0x418   : > { %v4325_v2 = vpop.f32.mrf.mxu0  ;;  %v2014_v29 = vpop.f32.mrf.mxu1  ;;  %v2248_v13 = vadd.f32 %v2224_v38, %v6965_v20  ;;  %v5945_v49 = vadd.f32 %v5873_v62, %v2106_v53  ;;  %v5957_v25 = vadd.f32 %v5881_v10, %v2101_v22  ;;  %v2201_v5 = vmax.f32 %v5938_v28, 0.0  ;;  %v6995_v28 = vld [vmem:[#allocation28_spill] sm:$0xff] }
 0x419   : > { %v2169_v42 = vadd.f32 %v5887_v40, %v2096_v11  ;;  %v2199_v44 = vmax.f32 %v2175_v17, 0.0  ;;  %v2105_v27 = vadd.f32 %v4325_v2, %v1832_v9  ;;  %v2180_v60 = vadd.f32 %v5873_v62, %v2107_v36 }
 0x41a   : > { %v2066_v48 = vpop.f32.mrf.mxu0  ;;  %v2016_v32 = vpop.f32.mrf.mxu1  ;;  %v5941_v43 = vpack.c.bf16 %v2248_v13, %v2245_v39  ;;  %v2109_v63 = vadd.f32 %v2014_v29, %v1772_v56  ;;  %v6969_v56 = vld [vmem:[#allocation45_spill] sm:$0xff]  ;;  %v2203_v61 = vmax.f32 %v5945_v49, 0.0 }
 0x41b   : > { %v2099_v3 = vadd.f32 %v2066_v48, %v1824_v7  ;;  %v2110_v24 = vadd.f32 %v2016_v32, %v1774_v46  ;;  %v2193_v47 = vmax.f32 %v2169_v42, 0.0  ;;  %v2178_v19 = vadd.f32 %v5885_v55, %v2105_v27 }
 0x41c   : > { %v4328_v12 = vpop.f32.mrf.mxu0  ;;  %v2020_v26 = vpop.f32.mrf.mxu1  ;;  %v2223_v7 = vsel %vm4957_vm8, %v2199_v44, 0.0  ;;  %v2204_v46 = vmax.f32 %v2180_v60, 0.0  ;;  %v2182_v10 = vadd.f32 %v6969_v56, %v2109_v63 }
 0x41d   : > { %v2114_v30 = vadd.f32 %v4328_v12, %v1845_v21  ;;  %v2183_v37 = vadd.f32 %v6969_v56, %v2110_v24  ;;  %v2172_v34 = vadd.f32 %v6972_v1, %v2099_v3  ;;  %v2112_v53 = vadd.f32 %v2020_v26, %v1778_v23 }
 0x41e   : > { %v2079_v15 = vpop.f32.mrf.mxu0  ;;  %v2022_v9 = vpop.f32.mrf.mxu1  ;;  %v2217_v55 = vsel %vm4957_vm8, %v2193_v47, 0.0  ;;  %v2202_v20 = vmax.f32 %v2178_v19, 0.0  ;;  %v2206_v48 = vmax.f32 %v2182_v10, 0.0  ;;  %v2228_v27 = vsel %vm4917_vm5, %v2204_v46, 0.0  ;;  %v6979_v10 = vld [vmem:[#allocation30_spill] sm:$0xff] }
 0x41f   : > { %v2187_v57 = vadd.f32 %v6970_v18, %v2114_v30  ;;  %v2108_v35 = vadd.f32 %v2079_v15, %v1837_v33  ;;  %v2207_v36 = vmax.f32 %v2183_v37, 0.0  ;;  %v2113_v2 = vadd.f32 %v2022_v9, %v1780_v31  ;;  %v6973_v33 = vld [vmem:[#allocation46_spill] sm:$0xff]  ;;  %v6976_v30 = vld [vmem:[#allocation23_spill] sm:$0xff] }
 0x420   : > { %v4329_v8 = vpop.f32.mrf.mxu0  ;;  %v2024_v38 = vpop.f32.mrf.mxu1  ;;  %v2196_v32 = vmax.f32 %v2172_v34, 0.0  ;;  %v2226_v59 = vsel %vm4957_vm8, %v2202_v20, 0.0 }
 0x421   : > { %v2211_v17 = vmax.f32 %v2187_v57, 0.0  ;;  %v2181_v11 = vadd.f32 %v5873_v62, %v2108_v35  ;;  %v2117_v21 = vadd.f32 %v4329_v8, %v1848_v54  ;;  %v2115_v29 = vadd.f32 %v2024_v38, %v1782_v52  ;;  %v6978_v35 = vld [vmem:[#allocation26_spill] sm:$0xff] }
 0x422   : > { %v2082_v58 = vpop.f32.mrf.mxu0  ;;  %v2026_v39 = vpop.f32.mrf.mxu1  ;;  %v2185_v54 = vadd.f32 %v6970_v18, %v2112_v53  ;;  %v2231_v60 = vsel %vm4917_vm5, %v2207_v36, 0.0  ;;  %v2186_v63 = vadd.f32 %v6970_v18, %v2113_v2  ;;  %v6977_v18 = vld [vmem:[#allocation24_spill] sm:$0xff]  ;;  %v2227_v8 = vsel %vm4893_vm2, %v2203_v61, 0.0  ;;  %v6981_v53 = vld [vmem:[#allocation29_spill] sm:$0xff] }
 0x423   : > { %v2205_v13 = vmax.f32 %v2181_v11, 0.0  ;;  %v2190_v22 = vadd.f32 %v6973_v33, %v2117_v21  ;;  %v2111_v42 = vadd.f32 %v2082_v58, %v1840_v50  ;;  %v2188_v23 = vadd.f32 %v6973_v33, %v2115_v29  ;;  %v6983_v36 = vld [vmem:[#allocation17_spill] sm:$0xff]  ;;  %v6984_v29 = vld [vmem:[#allocation31_spill] sm:$0xff] }
 0x424   : > { %v2116_v44 = vadd.f32 %v2026_v39, %v1784_v4  ;;  %v2235_v62 = vsel %vm4957_vm8, %v2211_v17, 0.0  ;;  %v2230_v50 = vsel %vm4893_vm2, %v2206_v48, 0.0  ;;  %v2209_v37 = vmax.f32 %v2185_v54, 0.0  ;;  %v6985_v39 = vld [vmem:[#allocation32_spill] sm:$0xff] }
 0x425   : > { %v2214_v49 = vmax.f32 %v2190_v22, 0.0  ;;  %v2184_v31 = vadd.f32 %v6969_v56, %v2111_v42  ;;  %v2229_v4 = vsel %vm4957_vm8, %v2205_v13, 0.0  ;;  %v2212_v12 = vmax.f32 %v2188_v23, 0.0  ;;  %v6987_v42 = vld [vmem:[#allocation38_spill] sm:$0xff] }
 0x426   : > { %v2189_v3 = vadd.f32 %v6973_v33, %v2116_v44  ;;  %v2259_v6 = vadd.f32 %v2235_v62, %v6975_v0  ;;  %v2220_v56 = vsel %vm4957_vm8, %v2196_v32, 0.0  ;;  %v2253_v57 = vadd.f32 %v2229_v4, %v6977_v18  ;;  %v6986_v33 = vld [vmem:[#allocation37_spill] sm:$0xff]  ;;  %v6989_v44 = vld [vmem:[#allocation14_spill] sm:$0xff]  ;;  %v6997_v0 = vld [vmem:[#allocation27_spill] sm:$0xff] }
 0x427   : > { %v2238_v24 = vsel %vm4957_vm8, %v2214_v49, 0.0  ;;  %v2208_v26 = vmax.f32 %v2184_v31, 0.0  ;;  %v6002_v34 = vadd.f32 %v2231_v60, %v6979_v10  ;;  %v2210_v38 = vmax.f32 %v2186_v63, 0.0  ;;  %v6990_v63 = vld [vmem:[#allocation13_spill] sm:$0xff]  ;;  %v7001_v18 = vld [vmem:[#allocation35_spill] sm:$0xff] }
 0x428   : > { %v2262_v47 = vadd.f32 %v2238_v24, %v6976_v30  ;;  %v2213_v9 = vmax.f32 %v2189_v3, 0.0  ;;  %v2236_v17 = vsel %vm4893_vm2, %v2212_v12, 0.0  ;;  %v6009_v11 = vadd.f32 %v2228_v27, %v6981_v53  ;;  %v6991_v4 = vld [vmem:[#allocation25_spill] sm:$0xff] }
 0x429   : > { %v2232_v15 = vsel %vm4957_vm8, %v2208_v26, 0.0  ;;  %6980 = vst [vmem:[#allocation33_spill] sm:$0xff] %v6002_v34  ;;  %v2254_v2 = vadd.f32 %v2230_v50, %v6983_v36  ;;  %v2247_v58 = vadd.f32 %v2223_v7, %v6984_v29  ;;  %v2250_v20 = vadd.f32 %v2226_v59, %v6985_v39  ;;  %v6988_v7 = vld [vmem:[#allocation16_spill] sm:$0xff]  ;;  %v6993_v12 = vld [vmem:[#allocation21_spill] sm:$0xff] }
 0x42a   : > { %v5997_v19 = vpack.c.bf16 %v2262_v47, %v2259_v6  ;;  %v2256_v46 = vadd.f32 %v2232_v15, %v6978_v35  ;;  %6982 = vst [vmem:[#allocation34_spill] sm:$0xff] %v6009_v11  ;;  %v2233_v61 = vsel %vm4893_vm2, %v2209_v37, 0.0  ;;  %v2237_v13 = vsel %vm4917_vm5, %v2213_v9, 0.0  ;;  %v6091_v37 = vld [vmem:[%s6809_s3 + $0xc0] sm:$0xff]   ;;  %v6999_v15 = vld [vmem:[#allocation36_spill] sm:$0xff] }
 0x42b   : > { %v2241_v22 = vadd.f32 %v2217_v55, %v6986_v33  ;;  %v2244_v48 = vadd.f32 %v2220_v56, %v6987_v42  ;;  %v6028_v32 = vpack.c.bf16 %v6002_v34, %v6009_v11  ;;  %v2251_v23 = vadd.f32 %v2227_v8, %v6988_v7  ;;  %4338 = vmatprep.mubr.msk.bf16.mxu1 %vm700_vm9, %v6091_v37 }
 0x42c   : > { %2309 = vrot.lane.b32.xlu1 %v5997_v19, %s4675_s15  ;;  %v6013_v21 = vpack.c.bf16 %v2256_v46, %v2253_v57  ;;  %v2260_v62 = vadd.f32 %v2236_v17, %v6989_v44  ;;  %v6032_v54 = vpack.c.bf16 %v2250_v20, %v2247_v58  ;;  %v2171_v49 = vadd.f32 %v6972_v1, %v5954_v14 }
 0x42d   : > { %v2198_v55 = vmax.f32 %v5957_v25, 0.0  ;;  %v2234_v31 = vsel %vm4917_vm5, %v2210_v38, 0.0  ;;  %v6039_v27 = vpack.c.bf16 %v2244_v48, %v2241_v22  ;;  %v6043_v60 = vpack.c.bf16 %v2254_v2, %v2251_v23 }
 0x42e   : > { %2303 = vrot.lane.b32.xlu0 %v6013_v21, %s4675_s15  ;;  %v2257_v3 = vadd.f32 %v2233_v61, %v6990_v63  ;;  %v6047_v24 = vadd.f32 %v2237_v13, %v6991_v4  ;;  %v2168_v14 = vadd.f32 %v5887_v40, %v5951_v41  ;;  %v2225_v25 = vsel %vm4917_vm5, %v2201_v5, 0.0 }
 0x42f   : > { %v6060_v26 = vadd.f32 %v2234_v31, %v6993_v12  ;;  %v2195_v59 = vmax.f32 %v2171_v49, 0.0  ;;  %v2222_v50 = vsel %vm4917_vm5, %v2198_v55, 0.0  ;;  %v6071_v41 = vadd.f32 %v2225_v25, %v6995_v28  ;;  %v4522_v31 = vld [vmem:[%s6809_s3 + $0xc8] sm:$0xff]   ;;  %v4065_v12 = vld [vmem:[%s6810_s4 + $0xa0] sm:$0xff]  ;;  %v4527_v28 = vld [vmem:[%s6809_s3 + $0xf0] sm:$0xff]  }
 0x430   : > { %2301 = vrot.lane.b32.xlu1 %v6028_v32, %s4675_s15  ;;  %6992 = vst [vmem:[#allocation18_spill] sm:$0xff] %v6047_v24  ;;  %v6057_v1 = vpack.c.bf16 %v2260_v62, %v2257_v3  ;;  %v2192_v5 = vmax.f32 %v2168_v14, 0.0  ;;  %v6076_v6 = vadd.f32 %v2222_v50, %v6997_v0  ;;  %v4523_v3 = vld [vmem:[%s6809_s3 + $0xd0] sm:$0xff]   ;;  %v7004_v25 = vmov 0   ;;  %v4526_v50 = vld [vmem:[%s6809_s3 + $0xe8] sm:$0xff]   ;;  %v4529_v0 = vld [vmem:[%s6809_s3 + $0x100] sm:$0xff]  }
 0x431   : > { %6994 = vst [vmem:[#allocation19_spill] sm:$0xff] %v6060_v26  ;;  %v6068_v40 = vpack.c.bf16 %v6047_v24, %v6060_v26  ;;  %6996 = vst [vmem:[#allocation44_spill] sm:$0xff] %v6071_v41  ;;  %v2219_v30 = vsel %vm4917_vm5, %v2195_v59, 0.0  ;;  %v4063_v59 = vld [vmem:[%s6810_s4 + $0x90] sm:$0xff] }
 0x432   : > { %2299 = vrot.lane.b32.xlu0 %v6043_v60, %s4675_s15  ;;  %6998 = vst [vmem:[#allocation40_spill] sm:$0xff] %v6076_v6  ;;  %v6084_v47 = vpack.c.bf16 %v6071_v41, %v6076_v6  ;;  %v2216_v56 = vsel %vm4917_vm5, %v2192_v5, 0.0  ;;  %v6096_v9 = vadd.f32 %v2219_v30, %v6999_v15  ;;  %v4528_v5 = vld [vmem:[%s6809_s3 + $0xf8] sm:$0xff]  }
 0x433   : > { %v6103_v57 = vadd.f32 %v2216_v56, %v7001_v18 }
 0x434   : > { %2305 = vrot.lane.b32.xlu1 %v6057_v1, %s4675_s15  ;;  %7000 = vst [vmem:[#allocation48_spill] sm:$0xff] %v6096_v9 }
 0x435   : > { %7002 = vst [vmem:[#allocation45_spill] sm:$0xff] %v6103_v57  ;;  %v6109_v35 = vpack.c.bf16 %v6096_v9, %v6103_v57 }
 0x436   : > { %2307 = vrot.lane.b32.xlu0 %v6068_v40, %s4675_s15 }
 0x438   : > { %2293 = vrot.lane.b32.xlu1 %v5941_v43, %s4675_s15 }
 0x43a   : > { %2295 = vrot.lane.b32.xlu0 %v6084_v47, %s4675_s15 }
 0x43c   : > { %2297 = vrot.lane.b32.xlu1 %v6032_v54, %s4675_s15 }
 0x43e   : > { %2287 = vrot.lane.b32.xlu0 %v5907_v51, %s4675_s15 }
 0x440   : > { %2289 = vrot.lane.b32.xlu1 %v6109_v35, %s4675_s15 }
 0x442   : > { %2291 = vrot.lane.b32.xlu0 %v6039_v27, %s4675_s15 }
 0x49e   : > { %v2310_v46 = vpop.permute.xlu1 %2309 }
 0x49f   : > { %v2346_v4 = vsel %vm624_vm10, %v2310_v46, 0 }
 0x4a0   : > { %v6115_v10 = vpop.permute.xlu0 %2303 }
 0x4a1   : > { %v2344_v14 = vsel %vm624_vm10, %v6115_v10, 0 }
 0x4a2   : > { %v2302_v8 = vpop.permute.xlu1 %2301 }
 0x4a3   : > { %v2316_v38 = vsel %vm624_vm10, %v2302_v8, %v6115_v10 }
 0x4a4   : > { %v2300_v17 = vpop.permute.xlu0 %2299  ;;  %2762 = vrot.lane.b32.xlu1 %v2316_v38, %s4677_s11 }
 0x4a5   : > { %v2315_v53 = vsel %vm624_vm10, %v2300_v17, %v2302_v8  ;;  %v2334_v33 = vsel %vm624_vm10, 0, %v2300_v17 }
 0x4a6   : > { %2760 = vrot.lane.b32.xlu0 %v2315_v53, %s4677_s11  ;;  %v2306_v36 = vpop.permute.xlu1 %2305 }
 0x4a7   : > { %v2337_v2 = vsel %vm624_vm10, 0, %v2306_v36 }
 0x4a8   : > { %v2308_v29 = vpop.permute.xlu0 %2307  ;;  %2766 = vrot.lane.b32.xlu1 %v2337_v2, %s4677_s11 }
 0x4a9   : > { %v2318_v58 = vsel %vm624_vm10, %v2308_v29, %v2310_v46  ;;  %v2317_v39 = vsel %vm624_vm10, %v2306_v36, %v2308_v29 }
 0x4aa   : > { %4330 = vmatprep.subr.bf16.mxu1 %v2318_v58  ;;  %2770 = vrot.lane.b32.xlu0 %v2318_v58, %s4677_s11  ;;  %v2294_v20 = vpop.permute.xlu1 %2293 }
 0x4ab   : > { %2405 = vmatprep.subr.bf16.mxu0 %v2317_v39  ;;  %4331 = vmatpush3.bf16.msra.mxu1 %v2318_v58  ;;  %v2331_v49 = vsel %vm624_vm10, 0, %v2294_v20 }
 0x4ac   : > { %4014 = vmatpush1.bf16.msk.msra.mxu0 %vm5123_vm11, %v2306_v36  ;;  %v2296_v13 = vpop.permute.xlu0 %2295  ;;  %4332 = vmatprep.subr.bf16.mxu1 %v2316_v38 }
 0x4ad   : > { %2768 = vrot.lane.b32.xlu1 %v2317_v39, %s4677_s11  ;;  %2407 = vmatprep.subr.bf16.mxu0 %v2315_v53  ;;  %v2313_v7 = vsel %vm624_vm10, %v2294_v20, %v2296_v13 }
 0x4ae   : > { %2758 = vrot.lane.b32.xlu0 %v2334_v33, %s4677_s11  ;;  %v2298_v22 = vpop.permute.xlu1 %2297 }
 0x4af   : > { %4333 = vmatpush3.bf16.msra.mxu1 %v2316_v38  ;;  %v2314_v42 = vsel %vm624_vm10, %v2296_v13, %v2298_v22 }
 0x4b0   : > { %4016 = vmatpush1.bf16.msk.msra.mxu0 %vm5123_vm11, %v2300_v17  ;;  %v2288_v48 = vpop.permute.xlu0 %2287  ;;  %4334 = vmatprep.subr.bf16.mxu1 %v2314_v42 }
 0x4b1   : > { %2752 = vrot.lane.b32.xlu1 %v2313_v7, %s4677_s11  ;;  %2409 = vmatprep.subr.bf16.mxu0 %v2313_v7  ;;  %v2328_v63 = vsel %vm624_vm10, 0, %v2288_v48 }
 0x4b2   : > { %2754 = vrot.lane.b32.xlu0 %v2314_v42, %s4677_s11  ;;  %v2290_v23 = vpop.permute.xlu1 %2289 }
 0x4b3   : > { %4335 = vmatpush3.bf16.msra.mxu1 %v2314_v42  ;;  %v2311_v44 = vsel %vm624_vm10, %v2288_v48, %v2290_v23 }
 0x4b4   : > { %4018 = vmatpush1.bf16.msk.msra.mxu0 %vm5123_vm11, %v2294_v20  ;;  %v2292_v62 = vpop.permute.xlu0 %2291 }
 0x4b5   : > { %2750 = vrot.lane.b32.xlu1 %v2331_v49, %s4677_s11  ;;  %2411 = vmatprep.subr.bf16.mxu0 %v2311_v44  ;;  %v2312_v55 = vsel %vm624_vm10, %v2290_v23, %v2292_v62  ;;  %v4530_v23 = vld [vmem:[%s6809_s3 + $0x108] sm:$0xff]  }
 0x4b6   : > { %4336 = vmatprep.subr.bf16.mxu1 %v2312_v55  ;;  %2744 = vrot.lane.b32.xlu0 %v2311_v44, %s4677_s11 }
 0x4b7   : > { %4337 = vmatpush3.bf16.msra.mxu1 %v2312_v55 }
 0x4b8   : > { %4020 = vmatpush1.bf16.msk.msra.mxu0 %vm5123_vm11, %v2288_v48  ;;  %2575 = vmatprep.subr.bf16.mxu1 %v6068_v40  ;;  %v4062_v40 = vld [vmem:[%s6810_s4 + $0x88] sm:$0xff] }
 0x4b9   : > { %2746 = vrot.lane.b32.xlu1 %v2312_v55, %s4677_s11  ;;  %4346 = vmatprep.subr.bf16.mxu0 %v5997_v19  ;;  %v4531_v55 = vld [vmem:[%s6809_s3 + $0x110] sm:$0xff]  }
 0x4ba   : > { %2742 = vrot.lane.b32.xlu0 %v2328_v63, %s4677_s11  ;;  %4339 = vmatmul.mubr.msk.bf16.vlgmr.msra.gmra.mxu1 %vm700_vm9, %v4522_v31 }
 0x4bb   : > { %4021 = vmatmul.mubr.msk.bf16.vlgmr.msra.gmra.mxu0 %vm700_vm9, %v6091_v37  ;;  %2576 = vmatpush1.bf16.msra.mxu1 %v6057_v1  ;;  %v4524_v1 = vld [vmem:[%s6809_s3 + $0xd8] sm:$0xff]  }
 0x4bc   : > { %4347 = vmatpush3.bf16.msra.mxu0 %v5997_v19  ;;  %2577 = vmatprep.subr.bf16.mxu1 %v6028_v32  ;;  %v2342_v19 = vsel %vm624_vm10, %v2298_v22, 0  ;;  %v2340_v32 = vsel %vm624_vm10, %v2292_v62, 0 }
 0x4bd   : > { %2772 = vrot.lane.b32.xlu1 %v2346_v4, %s4677_s11  ;;  %4348 = vmatprep.subr.bf16.mxu0 %v6013_v21 }
 0x4be   : > { %2764 = vrot.lane.b32.xlu0 %v2344_v14, %s4677_s11  ;;  %2439 = vmatprep.mubr.bf16.mxu0 %v7004_v25 }
 0x4bf   : > { %2578 = vmatpush1.bf16.msra.mxu1 %v6043_v60  ;;  %4342 = vmatprep.mubr.msk.bf16.mxu1 %vm700_vm9, %v4523_v3  ;;  %v4067_v60 = vld [vmem:[%s6810_s4 + $0xb0] sm:$0xff] }
 0x4c0   : > { %4349 = vmatpush3.bf16.msra.mxu0 %v6013_v21  ;;  %2579 = vmatprep.subr.bf16.mxu1 %v6084_v47  ;;  %v4068_v21 = vld [vmem:[%s6810_s4 + $0xb8] sm:$0xff] }
 0x4c1   : > { %2756 = vrot.lane.b32.xlu1 %v2342_v19, %s4677_s11  ;;  %4350 = vmatprep.subr.bf16.mxu0 %v6032_v54 }
 0x4c2   : > { %2748 = vrot.lane.b32.xlu0 %v2340_v32, %s4677_s11  ;;  %4343 = vmatmul.mubr.msk.bf16.gmra.mxu1 %vm700_vm9, %v4524_v1 }
 0x4c3   : > { %2580 = vmatpush1.bf16.msra.mxu1 %v5941_v43  ;;  %4022 = vmatmul.mubr.msk.bf16.gmra.mxu0 %vm700_vm9, %v4522_v31  ;;  %v4525_v43 = vld [vmem:[%s6809_s3 + $0xe0] sm:$0xff]   ;;  %v4532_v31 = vld [vmem:[%s6809_s3 + $0x118] sm:$0xff]  }
 0x4c4   : > { %4351 = vmatpush3.bf16.msra.mxu0 %v6032_v54  ;;  %2581 = vmatprep.subr.bf16.mxu1 %v6109_v35  ;;  %v4066_v54 = vld [vmem:[%s6810_s4 + $0xa8] sm:$0xff] }
 0x4c5   : > { %3013 = vperm.xlu1 %4496, %v4067_v60   ;;  %4352 = vmatprep.subr.bf16.mxu0 %v6039_v27 }
 0x4c6   : > { %3018 = vperm.xlu0 %4495, %v4068_v21   ;;  %2449 = vmatprep.mubr.bf16.mxu0 %v7004_v25 }
 0x4c7   : > { %2582 = vmatpush1.bf16.msra.mxu1 %v5907_v51  ;;  %2599 = vmatprep.mubr.bf16.mxu1 %v7004_v25  ;;  %v4064_v51 = vld [vmem:[%s6810_s4 + $0x98] sm:$0xff] }
 0x4c8   : > { %4353 = vmatpush3.bf16.msra.mxu0 %v6039_v27  ;;  %v4061_v27 = vld [vmem:[%s6810_s4 + $0x80] sm:$0xff] }
 0x4c9   : > { %3003 = vperm.xlu1 %4496, %v4065_v12  }
 0x4ca   : > { %3008 = vperm.xlu0 %4495, %v4066_v54   ;;  %4033 = vmatmul.mubr.msk.bf16.vlgmr.msra.gmra.mxu1 %vm700_vm9, %v4525_v43 }
 0x4cb   : > { %4023 = vmatmul.mubr.msk.bf16.gmra.mxu0 %vm700_vm9, %v4523_v3  ;;  %2609 = vmatprep.mubr.bf16.mxu1 %v7004_v25 }
 0x4cc   : > { %2459 = vmatprep.mubr.bf16.mxu0 %v7004_v25 }
 0x4cd   : > { %2993 = vperm.xlu1 %4496, %v4063_v59  }
 0x4ce   : > { %2998 = vperm.xlu0 %4495, %v4064_v51  }
 0x4d1   : > { %2983 = vperm.xlu1 %4496, %v4061_v27  }
 0x4d2   : > { %2988 = vperm.xlu0 %4495, %v4062_v40   ;;  %4034 = vmatmul.mubr.msk.bf16.gmra.mxu1 %vm700_vm9, %v4526_v50 }
 0x4d3   : > { %4024 = vmatmul.mubr.msk.bf16.gmra.mxu0 %vm700_vm9, %v4524_v1  ;;  %2619 = vmatprep.mubr.bf16.mxu1 %v7004_v25 }
 0x4d4   : > { %4354 = vmatprep.mubr.msk.bf16.mxu0 %vm700_vm9, %v4525_v43 }
 0x4da   : > { %4035 = vmatmul.mubr.msk.bf16.gmra.mxu1 %vm700_vm9, %v4527_v28 }
 0x4db   : > { %4355 = vmatmul.mubr.msk.bf16.vlgmr.msra.gmra.mxu0 %vm700_vm9, %v4526_v50  ;;  %2629 = vmatprep.mubr.bf16.mxu1 %v7004_v25 }
 0x4dc   : > { %4358 = vmatprep.mubr.msk.bf16.mxu0 %vm700_vm9, %v4527_v28 }
 0x4e2   : > { %4036 = vmatmul.mubr.msk.bf16.gmra.mxu1 %vm700_vm9, %v4528_v5 }
 0x4e3   : > { %4359 = vmatmul.mubr.msk.bf16.gmra.mxu0 %vm700_vm9, %v4528_v5  ;;  %4370 = vmatprep.mubr.msk.bf16.mxu1 %vm700_vm9, %v4529_v0 }
 0x4e4   : > { %2842 = vmatprep.mubr.bf16.mxu0 %v7004_v25 }
 0x516   : > { %v2763_v30 = vpop.permute.xlu1 %2762 }
 0x518   : > { %v2761_v47 = vpop.permute.xlu0 %2760 }
 0x519   : > { %v2781_v10 = vsel %vm1090_vm15, %v2761_v47, %v2763_v30 }
 0x51a   : > { %v2767_v56 = vpop.permute.xlu1 %2766 }
 0x51c   : > { %v2771_v37 = vpop.permute.xlu0 %2770 }
 0x51f   : > { %v2769_v15 = vpop.permute.xlu1 %2768 }
 0x520   : > { %v2783_v18 = vsel %vm1090_vm15, %v2767_v56, %v2769_v15  ;;  %v2759_v35 = vpop.permute.xlu0 %2758  ;;  %v2784_v46 = vsel %vm1090_vm15, %v2769_v15, %v2771_v37 }
 0x521   : > { %2818 = vmatprep.subr.bf16.mxu0 %v2784_v46  ;;  %v2780_v17 = vsel %vm1090_vm15, %v2759_v35, %v2761_v47 }
 0x522   : > { %2819 = vmatpush1.bf16.msra.mxu0 %v2783_v18 }
 0x523   : > { %2820 = vmatprep.subr.bf16.mxu0 %v2781_v10  ;;  %v2753_v8 = vpop.permute.xlu1 %2752 }
 0x524   : > { %v2755_v38 = vpop.permute.xlu0 %2754 }
 0x525   : > { %v2778_v53 = vsel %vm1090_vm15, %v2753_v8, %v2755_v38 }
 0x526   : > { %2821 = vmatpush1.bf16.msra.mxu0 %v2780_v17 }
 0x527   : > { %2822 = vmatprep.subr.bf16.mxu0 %v2778_v53  ;;  %v2751_v36 = vpop.permute.xlu1 %2750 }
 0x528   : > { %v2777_v2 = vsel %vm1090_vm15, %v2751_v36, %v2753_v8  ;;  %v2745_v29 = vpop.permute.xlu0 %2744 }
 0x52a   : > { %2823 = vmatpush1.bf16.msra.mxu0 %v2777_v2 }
 0x52b   : > { %v2747_v58 = vpop.permute.xlu1 %2746 }
 0x52c   : > { %v2743_v39 = vpop.permute.xlu0 %2742  ;;  %v2775_v20 = vsel %vm1090_vm15, %v2745_v29, %v2747_v58 }
 0x52d   : > { %v2774_v13 = vsel %vm1090_vm15, %v2743_v39, %v2745_v29  ;;  %2824 = vmatprep.subr.bf16.mxu0 %v2775_v20 }
 0x52e   : > { %2825 = vmatpush1.bf16.msra.mxu0 %v2774_v13 }
 0x52f   : > { %v2773_v33 = vpop.permute.xlu1 %2772 }
 0x530   : > { %v2765_v22 = vpop.permute.xlu0 %2764  ;;  %v2785_v42 = vsel %vm1090_vm15, %v2771_v37, %v2773_v33 }
 0x531   : > { %4362 = vmatprep.subr.bf16.mxu1 %v2785_v42  ;;  %4053 = vmatmul.mubr.msk.bf16.vlgmr.msra.gmra.mxu0 %vm700_vm9, %v4529_v0  ;;  %v2782_v48 = vsel %vm1090_vm15, %v2763_v30, %v2765_v22 }
 0x532   : > { %4363 = vmatpush3.bf16.msra.mxu1 %v2785_v42  ;;  %2852 = vmatprep.mubr.bf16.mxu0 %v7004_v25 }
 0x533   : > { %4364 = vmatprep.subr.bf16.mxu1 %v2782_v48  ;;  %v2757_v7 = vpop.permute.xlu1 %2756 }
 0x534   : > { %v2779_v44 = vsel %vm1090_vm15, %v2755_v38, %v2757_v7  ;;  %v2749_v62 = vpop.permute.xlu0 %2748 }
 0x535   : > { %v2776_v49 = vsel %vm1090_vm15, %v2747_v58, %v2749_v62 }
 0x536   : > { %4365 = vmatpush3.bf16.msra.mxu1 %v2782_v48 }
 0x537   : > { %4366 = vmatprep.subr.bf16.mxu1 %v2779_v44 }
 0x539   : > { %4054 = vmatmul.mubr.msk.bf16.gmra.mxu0 %vm700_vm9, %v4530_v23 }
 0x53a   : > { %4367 = vmatpush3.bf16.msra.mxu1 %v2779_v44  ;;  %2862 = vmatprep.mubr.bf16.mxu0 %v7004_v25 }
 0x53b   : > { %4368 = vmatprep.subr.bf16.mxu1 %v2776_v49 }
 0x53e   : > { %4369 = vmatpush3.bf16.msra.mxu1 %v2776_v49 }
 0x540   : > { %v6329_v58 = vpop.permute.xlu1 %3013 }
 0x541   : > { %4371 = vmatmul.mubr.msk.bf16.vlgmr.msra.gmra.mxu1 %vm700_vm9, %v4530_v23  ;;  %4055 = vmatmul.mubr.msk.bf16.gmra.mxu0 %vm700_vm9, %v4531_v55  ;;  %v6335_v13 = vpop.permute.xlu0 %3018 }
 0x542   : > { %4374 = vmatprep.mubr.msk.bf16.mxu1 %vm700_vm9, %v4531_v55  ;;  %2872 = vmatprep.mubr.bf16.mxu0 %v7004_v25  ;;  %7006 = vst [vmem:[#allocation20_spill] sm:$0xff] %v6335_v13 }
 0x544   : > { %v6337_v33 = vpop.permute.xlu1 %3003 }
 0x545   : > { %7007 = vst [vmem:[#allocation47_spill] sm:$0xff] %v6337_v33  ;;  %v6343_v48 = vpop.permute.xlu0 %3008 }
 0x546   : > { %7008 = vst [vmem:[#allocation46_spill] sm:$0xff] %v6343_v48 }
 0x548   : > { %v6349_v44 = vpop.permute.xlu1 %2993 }
 0x549   : > { %4375 = vmatmul.mubr.msk.bf16.gmra.mxu1 %vm700_vm9, %v4532_v31  ;;  %4056 = vmatmul.mubr.msk.bf16.gmra.mxu0 %vm700_vm9, %v4532_v31  ;;  %v6355_v55 = vpop.permute.xlu0 %2998 }
 0x54a   : > { %3247 = vmatprep.mubr.bf16.mxu1 %v7004_v25  ;;  %3344 = vmatprep.mubr.bf16.mxu0 %v7004_v25 }
 0x54c   : > { %v6357_v26 = vpop.permute.xlu1 %2983 }
 0x54d   : > { %v6362_v13 = vpop.permute.xlu0 %2988 }
 0x57a   : > { %v6283_v19 = vpop.f32.mrf.mxu1 }
 0x57b   : > { %v2431_v63 = vpop.f32.mrf.mxu0 }
 0x57c   : > { %v6287_v60 = vpop.f32.mrf.mxu1 }
 0x57d   : > { %v2433_v3 = vpop.f32.mrf.mxu0 }
 0x57e   : > { %v6291_v12 = vpop.f32.mrf.mxu1 }
 0x57f   : > { %v2435_v4 = vpop.f32.mrf.mxu0 }
 0x580   : > { %v6295_v54 = vpop.f32.mrf.mxu1 }
 0x581   : > { %v2437_v14 = vpop.f32.mrf.mxu0 }
 0x582   : > { %v6299_v51 = vpop.f32.mrf.mxu1 }
 0x583   : > { %v6281_v1 = vpop.f32.mrf.mxu0 }
 0x584   : > { %v6303_v50 = vpop.f32.mrf.mxu1 }
 0x585   : > { %v6285_v32 = vpop.f32.mrf.mxu0 }
 0x586   : > { %v6307_v28 = vpop.f32.mrf.mxu1 }
 0x587   : > { %v6289_v21 = vpop.f32.mrf.mxu0 }
 0x588   : > { %v6311_v0 = vpop.f32.mrf.mxu1 }
 0x589   : > { %v6293_v43 = vpop.f32.mrf.mxu0 }
 0x58a   : > { %v2601_v47 = vpop.f32.mrf.mxu1 }
 0x58b   : > { %v6297_v59 = vpop.f32.mrf.mxu0  ;;  %v2602_v31 = vadd.f32 %v2601_v47, %v2431_v63 }
 0x58c   : > { %v2603_v37 = vpop.f32.mrf.mxu1 }
 0x58d   : > { %v6301_v27 = vpop.f32.mrf.mxu0  ;;  %v2604_v34 = vadd.f32 %v2603_v37, %v2433_v3 }
 0x58e   : > { %v2605_v18 = vpop.f32.mrf.mxu1 }
 0x58f   : > { %v6305_v40 = vpop.f32.mrf.mxu0  ;;  %v2606_v6 = vadd.f32 %v2605_v18, %v2435_v4 }
 0x590   : > { %v2607_v46 = vpop.f32.mrf.mxu1 }
 0x591   : > { %v6309_v5 = vpop.f32.mrf.mxu0  ;;  %v2608_v48 = vadd.f32 %v2607_v46, %v2437_v14 }
 0x592   : > { %v2611_v10 = vpop.f32.mrf.mxu1 }
 0x593   : > { %v6313_v30 = vpop.f32.mrf.mxu0 }
 0x594   : > { %v2613_v38 = vpop.f32.mrf.mxu1 }
 0x595   : > { %v6315_v56 = vpop.f32.mrf.mxu0  ;;  %v2614_v14 = vadd.f32 %v2613_v38, %v6285_v32 }
 0x596   : > { %v2615_v53 = vpop.f32.mrf.mxu1 }
 0x597   : > { %v6317_v15 = vpop.f32.mrf.mxu0 }
 0x598   : > { %v2617_v2 = vpop.f32.mrf.mxu1 }
 0x599   : > { %v6319_v35 = vpop.f32.mrf.mxu0  ;;  %v2618_v32 = vadd.f32 %v2617_v2, %v6293_v43 }
 0x59a   : > { %7005 = vst [vmem:[#allocation43_spill] sm:$0xff] %v6319_v35  ;;  %v6331_v39 = vpop.f32.mrf.mxu1 }
 0x59b   : > { %v6321_v8 = vpop.f32.mrf.mxu0 }
 0x59c   : > { %v6339_v22 = vpop.f32.mrf.mxu1 }
 0x59d   : > { %v6323_v17 = vpop.f32.mrf.mxu0 }
 0x59e   : > { %v6345_v7 = vpop.f32.mrf.mxu1 }
 0x59f   : > { %v6325_v36 = vpop.f32.mrf.mxu0 }
 0x5a0   : > { %v6351_v62 = vpop.f32.mrf.mxu1 }
 0x5a1   : > { %v6327_v29 = vpop.f32.mrf.mxu0 }
 0x5a2   : > { %v6359_v41 = vpop.f32.mrf.mxu1 }
 0x5a3   : > { %v6333_v20 = vpop.f32.mrf.mxu0 }
 0x5a4   : > { %v6365_v63 = vpop.f32.mrf.mxu1 }
 0x5a5   : > { %v6341_v42 = vpop.f32.mrf.mxu0 }
 0x5a7   : > { %v6347_v23 = vpop.f32.mrf.mxu0 }
 0x5a9   : > { %v6353_v49 = vpop.f32.mrf.mxu0 }
 0x5aa   : > { %7009 = vst [vmem:[#allocation15_spill] sm:$0xff] %v6353_v49 }
 0x5f1   : > { %v2844_v24 = vpop.f32.mrf.mxu0 }
 0x5f2   : > { %v2948_v11 = vadd.f32 %v2844_v24, %v2602_v31  ;;  %v2612_v24 = vadd.f32 %v2611_v10, %v6281_v1 }
 0x5f3   : > { %v2846_v9 = vpop.f32.mrf.mxu0 }
 0x5f4   : > { %v3021_v57 = vadd.f32 %v6357_v26, %v2948_v11  ;;  %v2949_v61 = vadd.f32 %v2846_v9, %v2604_v34 }
 0x5f5   : > { %v2848_v25 = vpop.f32.mrf.mxu0 }
 0x5f6   : > { %v3022_v33 = vadd.f32 %v6357_v26, %v2949_v61  ;;  %v2951_v35 = vadd.f32 %v2848_v25, %v2606_v6  ;;  %v3045_v47 = vmax.f32 %v3021_v57, 0.0  ;;  %v2616_v61 = vadd.f32 %v2615_v53, %v6289_v21  ;;  %v6372_v6 = vpop.f32.mrf.mxu1 }
 0x5f7   : > { %v2850_v49 = vpop.f32.mrf.mxu0 }
 0x5f8   : > { %v3024_v3 = vadd.f32 %v6362_v13, %v2951_v35  ;;  %v2952_v37 = vadd.f32 %v2850_v49, %v2608_v48  ;;  %v3046_v18 = vmax.f32 %v3022_v33, 0.0  ;;  %v6376_v57 = vsel %vm4893_vm2, %v3045_v47, 0.0 }
 0x5f9   : > { %v2854_v4 = vpop.f32.mrf.mxu0 }
 0x5fa   : > { %v3048_v11 = vmax.f32 %v3024_v3, 0.0  ;;  %v3025_v34 = vadd.f32 %v6362_v13, %v2952_v37  ;;  %v2954_v9 = vadd.f32 %v2854_v4, %v2612_v24  ;;  %v6390_v33 = vsel %vm4917_vm5, %v3046_v18, 0.0 }
 0x5fb   : > { %v2856_v25 = vpop.f32.mrf.mxu0  ;;  %v2683_v37 = vadd.f32 %v6321_v8, %v6283_v19 }
 0x5fc   : > { %v6380_v1 = vsel %vm4893_vm2, %v3048_v11, 0.0  ;;  %v6382_v35 = vpack.c.bf16 %v3048_v11, %v3045_v47  ;;  %v3049_v46 = vmax.f32 %v3025_v34, 0.0  ;;  %v3027_v10 = vadd.f32 %v6349_v44, %v2954_v9  ;;  %v6398_v47 = vpop.f32.mrf.mxu1 }
 0x5fd   : > { %v3093_v21 = vpack.c.bf16 %v6380_v1, %v6376_v57  ;;  %v2955_v38 = vadd.f32 %v2856_v25, %v2614_v14  ;;  %v2858_v53 = vpop.f32.mrf.mxu0  ;;  %v4536_v57 = vld [vmem:[%s6809_s3 + $0x148] sm:$0xff]  }
 0x5fe   : > { %v6394_v48 = vsel %vm4917_vm5, %v3049_v46, 0.0  ;;  %v6396_v49 = vpack.c.bf16 %v3049_v46, %v3046_v18  ;;  %v2957_v31 = vadd.f32 %v2858_v53, %v2616_v61  ;;  %v3051_v2 = vmax.f32 %v3027_v10, 0.0 }
 0x5ff   : > { %v3094_v43 = vpack.c.bf16 %v6394_v48, %v6390_v33  ;;  %v3028_v24 = vadd.f32 %v6349_v44, %v2955_v38  ;;  %v2860_v3 = vpop.f32.mrf.mxu0  ;;  %v2675_v46 = vadd.f32 %v6323_v17, %v6287_v60  ;;  %v2686_v10 = vadd.f32 %v6325_v36, %v6291_v12  ;;  %v4538_v33 = vld [vmem:[%s6809_s3 + $0x150] sm:$0xff]  }
 0x600   : > { %v3030_v4 = vadd.f32 %v6355_v55, %v2957_v31  ;;  %v2958_v11 = vadd.f32 %v2860_v3, %v2618_v32  ;;  %v6413_v38 = vsel %vm4893_vm2, %v3051_v2, 0.0  ;;  %v2678_v60 = vadd.f32 %v6327_v29, %v6295_v54 }
 0x601   : > { %v4372_v34 = vpop.f32.mrf.mxu1  ;;  %v2864_v9 = vpop.f32.mrf.mxu0  ;;  %v3052_v18 = vmax.f32 %v3028_v24, 0.0 }
 0x602   : > { %v3054_v14 = vmax.f32 %v3030_v4, 0.0  ;;  %v3031_v61 = vadd.f32 %v6355_v55, %v2958_v11  ;;  %v2956_v25 = vadd.f32 %v4372_v34, %v2683_v37 }
 0x603   : > { %v2917_v19 = vpop.f32.mrf.mxu1  ;;  %v2866_v8 = vpop.f32.mrf.mxu0  ;;  %v6428_v37 = vsel %vm4917_vm5, %v3052_v18, 0.0 }
 0x604   : > { %v6417_v32 = vsel %vm4893_vm2, %v3054_v14, 0.0  ;;  %v6419_v53 = vpack.c.bf16 %v3054_v14, %v3051_v2  ;;  %v3055_v31 = vmax.f32 %v3031_v61, 0.0  ;;  %v3029_v24 = vadd.f32 %v6349_v44, %v2956_v25 }
 0x605   : > { %v3096_v12 = vpack.c.bf16 %v6417_v32, %v6413_v38  ;;  %v2950_v17 = vadd.f32 %v2917_v19, %v2675_v46  ;;  %v4373_v36 = vpop.f32.mrf.mxu1  ;;  %v2868_v3 = vpop.f32.mrf.mxu0  ;;  %v2699_v14 = vadd.f32 %v6333_v20, %v6299_v51  ;;  %v2622_v19 = vadd.f32 %v6331_v39, %v6297_v59 }
 0x606   : > { %v6432_v2 = vsel %vm4917_vm5, %v3055_v31, 0.0  ;;  %v6434_v4 = vpack.c.bf16 %v3055_v31, %v3052_v18  ;;  %v2959_v44 = vadd.f32 %v4373_v36, %v2686_v10  ;;  %v3053_v61 = vmax.f32 %v3029_v24, 0.0 }
 0x607   : > { %v3097_v54 = vpack.c.bf16 %v6432_v2, %v6428_v37  ;;  %v3023_v29 = vadd.f32 %v6357_v26, %v2950_v17  ;;  %v2920_v11 = vpop.f32.mrf.mxu1  ;;  %v2870_v34 = vpop.f32.mrf.mxu0  ;;  %v2624_v18 = vadd.f32 %v6339_v22, %v6301_v27  ;;  %v2626_v10 = vadd.f32 %v6345_v7, %v6305_v40  ;;  %v4540_v37 = vld [vmem:[%s6809_s3 + $0x158] sm:$0xff]  }
 0x608   : > { %v3032_v25 = vadd.f32 %v6355_v55, %v2959_v44  ;;  %v2953_v46 = vadd.f32 %v2920_v11, %v2678_v60  ;;  %v2628_v26 = vadd.f32 %v6351_v62, %v6309_v5  ;;  %v2691_v24 = vadd.f32 %v6341_v42, %v6303_v50  ;;  %v7011_v11 = vld [vmem:[#allocation43_spill] sm:$0xff] }
 0x609   : > { %v4376_v31 = vpop.f32.mrf.mxu1  ;;  %v2874_v17 = vpop.f32.mrf.mxu0  ;;  %v3047_v36 = vmax.f32 %v3023_v29, 0.0  ;;  %v2632_v59 = vadd.f32 %v6359_v41, %v6313_v30  ;;  %v2634_v27 = vadd.f32 %v6365_v63, %v6315_v56  ;;  %v2960_v40 = vadd.f32 %v2864_v9, %v2622_v19  ;;  %v7013_v19 = vld [vmem:[#allocation46_spill] sm:$0xff] }
 0x60a   : > { %v3056_v51 = vmax.f32 %v3032_v25, 0.0  ;;  %v3026_v20 = vadd.f32 %v6362_v13, %v2953_v46  ;;  %v2968_v55 = vadd.f32 %v4376_v31, %v2699_v14  ;;  %v6459_v5 = vsel %vm4957_vm8, %v3053_v61, 0.0  ;;  %v7012_v25 = vld [vmem:[#allocation47_spill] sm:$0xff] }
 0x60b   : > { %v2933_v39 = vpop.f32.mrf.mxu1  ;;  %v2876_v22 = vpop.f32.mrf.mxu0  ;;  %v2964_v62 = vadd.f32 %v2870_v34, %v2628_v26  ;;  %v2636_v50 = vadd.f32 %v6372_v6, %v6317_v15  ;;  %v2961_v41 = vadd.f32 %v2866_v8, %v2624_v18  ;;  %v6471_v9 = vsel %vm4957_vm8, %v3047_v36, 0.0  ;;  %v7010_v6 = vld [vmem:[#allocation15_spill] sm:$0xff] }
 0x60c   : > { %v6463_v13 = vsel %vm4957_vm8, %v3056_v51, 0.0  ;;  %v3050_v7 = vmax.f32 %v3026_v20, 0.0  ;;  %v2962_v56 = vadd.f32 %v2933_v39, %v2691_v24  ;;  %v2963_v60 = vadd.f32 %v2868_v3, %v2626_v10  ;;  %v7014_v24 = vld [vmem:[#allocation20_spill] sm:$0xff] }
 0x60d   : > { %v3098_v30 = vpack.c.bf16 %v6463_v13, %v6459_v5  ;;  %v4377_v42 = vpop.f32.mrf.mxu1  ;;  %v2878_v63 = vpop.f32.mrf.mxu0  ;;  %v3041_v29 = vadd.f32 %v6329_v58, %v2968_v55  ;;  %v2702_v15 = vadd.f32 %v6347_v23, %v6307_v28  ;;  %v2694_v8 = vadd.f32 %v7010_v6, %v6311_v0 }
 0x60e   : > { %v6475_v44 = vsel %vm4957_vm8, %v3050_v7, 0.0  ;;  %v2638_v34 = vadd.f32 %v6398_v47, %v7011_v11  ;;  %v3033_v46 = vadd.f32 %v7012_v25, %v2960_v40  ;;  %v3037_v18 = vadd.f32 %v7013_v19, %v2964_v62 }
 0x60f   : > { %v3095_v14 = vpack.c.bf16 %v6475_v44, %v6471_v9  ;;  %v2936_v61 = vpop.f32.mrf.mxu1  ;;  %v2880_v3 = vpop.f32.mrf.mxu0  ;;  %v2966_v10 = vadd.f32 %v2874_v17, %v2632_v59  ;;  %v3035_v26 = vadd.f32 %v7012_v25, %v2962_v56  ;;  %v2967_v31 = vadd.f32 %v2876_v22, %v2634_v27 }
 0x610   : > { %v2971_v28 = vadd.f32 %v4377_v42, %v2702_v15  ;;  %v2969_v23 = vadd.f32 %v2878_v63, %v2636_v50  ;;  %v2965_v36 = vadd.f32 %v2936_v61, %v2694_v8  ;;  %v3034_v0 = vadd.f32 %v7012_v25, %v2961_v41 }
 0x611   : > { %v3036_v47 = vadd.f32 %v7013_v19, %v2963_v60  ;;  %v3065_v51 = vmax.f32 %v3041_v29, 0.0  ;;  %v2970_v20 = vadd.f32 %v2880_v3, %v2638_v34  ;;  %v3040_v55 = vadd.f32 %v6329_v58, %v2967_v31 }
 0x612   : > { %v3044_v39 = vadd.f32 %v7014_v24, %v2971_v28  ;;  %v3042_v40 = vadd.f32 %v7014_v24, %v2969_v23  ;;  %v3038_v17 = vadd.f32 %v7013_v19, %v2965_v36  ;;  %v3039_v59 = vadd.f32 %v6329_v58, %v2966_v10 }
 0x613   : > { %v3059_v27 = vmax.f32 %v3035_v26, 0.0  ;;  %v3043_v22 = vadd.f32 %v7014_v24, %v2970_v20  ;;  %v3061_v7 = vmax.f32 %v3037_v18, 0.0  ;;  %v3057_v41 = vmax.f32 %v3033_v46, 0.0 }
 0x614   : > { %v3068_v62 = vmax.f32 %v3044_v39, 0.0  ;;  %v3062_v50 = vmax.f32 %v3038_v17, 0.0  ;;  %v3060_v56 = vmax.f32 %v3036_v47, 0.0  ;;  %v3066_v42 = vmax.f32 %v3042_v40, 0.0 }
 0x615   : > { %v3067_v63 = vmax.f32 %v3043_v22, 0.0  ;;  %v3058_v60 = vmax.f32 %v3034_v0, 0.0  ;;  %v3089_v29 = vsel %vm4957_vm8, %v3065_v51, 0.0  ;;  %v3064_v15 = vmax.f32 %v3040_v55, 0.0  ;;  %v4533_v22 = vld [vmem:[%s6809_s3 + $0x120] sm:$0xff]  }
 0x616   : > { %v3092_v6 = vsel %vm4957_vm8, %v3068_v62, 0.0  ;;  %v3063_v8 = vmax.f32 %v3039_v59, 0.0  ;;  %v3083_v58 = vsel %vm4957_vm8, %v3059_v27, 0.0  ;;  %v3086_v34 = vsel %vm4957_vm8, %v3062_v50, 0.0  ;;  %v4149_v50 = vld [vmem:[%s6810_s4 + $0xc0] sm:$0xff] }
 0x617   : > { %v3104_v11 = vpack.c.bf16 %v3092_v6, %v3089_v29  ;;  %v3085_v61 = vsel %vm4917_vm5, %v3061_v7, 0.0  ;;  %v3101_v3 = vpack.c.bf16 %v3086_v34, %v3083_v58  ;;  %v4106_v25 = vpack.c.bf16 %v3067_v63, %v3064_v15  ;;  %v4154_v29 = vld [vmem:[%s6810_s4 + $0xe8] sm:$0xff]  ;;  %v4537_v6 = vld [vmem:[%s6809_s3 + $0x130] sm:$0xff]   ;;  %v4539_v58 = vld [vmem:[%s6809_s3 + $0x138] sm:$0xff]  }
 0x618   : > { %v3084_v46 = vsel %vm4893_vm2, %v3060_v56, 0.0  ;;  %v4109_v19 = vpack.c.bf16 %v3066_v42, %v3063_v8  ;;  %v3082_v18 = vsel %vm4917_vm5, %v3058_v60, 0.0  ;;  %v4112_v10 = vpack.c.bf16 %v3061_v7, %v3058_v60  ;;  %v4153_v60 = vld [vmem:[%s6810_s4 + $0xe0] sm:$0xff] }
 0x619   : > { %3139 = vrot.lane.b32.xlu1 %v3104_v11, %s4675_s15  ;;  %4107 = vmatprep.subr.msk.bf16.mxu0 %vm5157_vm13, %v4106_v25  ;;  %v3081_v16 = vsel %vm4893_vm2, %v3057_v41, 0.0  ;;  %v3100_v31 = vpack.c.bf16 %v3085_v61, %v3082_v18  ;;  %v3090_v36 = vsel %vm4893_vm2, %v3066_v42, 0.0  ;;  %v4115_v0 = vpack.c.bf16 %v3060_v56, %v3057_v41  ;;  %v4150_v41 = vld [vmem:[%s6810_s4 + $0xc8] sm:$0xff]  ;;  %v4151_v56 = vld [vmem:[%s6810_s4 + $0xd0] sm:$0xff] }
 0x61a   : > { %3133 = vrot.lane.b32.xlu0 %v3101_v3, %s4675_s15  ;;  %4110 = vmatpush1.bf16.msk.msra.mxu0 %vm5179_vm14, %v4109_v19  ;;  %v3099_v23 = vpack.c.bf16 %v3084_v46, %v3081_v16  ;;  %v3091_v47 = vsel %vm4917_vm5, %v3067_v63, 0.0  ;;  %v3087_v51 = vsel %vm4893_vm2, %v3063_v8, 0.0  ;;  %v3088_v20 = vsel %vm4917_vm5, %v3064_v15, 0.0  ;;  %v4535_v42 = vld [vmem:[%s6809_s3 + $0x128] sm:$0xff]   ;;  %v4152_v63 = vld [vmem:[%s6810_s4 + $0xd8] sm:$0xff]  ;;  %v4155_v15 = vld [vmem:[%s6810_s4 + $0xf0] sm:$0xff] }
 0x61b   : > { %4113 = vmatprep.subr.msk.bf16.mxu0 %vm5157_vm13, %v4112_v10  ;;  %v3102_v55 = vpack.c.bf16 %v3090_v36, %v3087_v51  ;;  %v3103_v24 = vpack.c.bf16 %v3091_v47, %v3088_v20  ;;  %v4156_v8 = vld [vmem:[%s6810_s4 + $0xf8] sm:$0xff] }
 0x61d   : > { %3131 = vrot.lane.b32.xlu1 %v3100_v31, %s4675_s15 }
 0x61e   : > { %3129 = vrot.lane.b32.xlu0 %v3099_v23, %s4675_s15  ;;  %4116 = vmatpush1.bf16.msk.msra.mxu0 %vm5179_vm14, %v4115_v0 }
 0x61f   : > { %4119 = vmatprep.subr.msk.bf16.mxu0 %vm5157_vm13, %v6434_v4 }
 0x621   : > { %3135 = vrot.lane.b32.xlu1 %v3102_v55, %s4675_s15 }
 0x622   : > { %3137 = vrot.lane.b32.xlu0 %v3103_v24, %s4675_s15  ;;  %4122 = vmatpush1.bf16.msk.msra.mxu0 %vm5179_vm14, %v6419_v53 }
 0x623   : > { %4125 = vmatprep.subr.msk.bf16.mxu0 %vm5157_vm13, %v6396_v49 }
 0x625   : > { %3123 = vrot.lane.b32.xlu1 %v3096_v12, %s4675_s15 }
 0x626   : > { %3125 = vrot.lane.b32.xlu0 %v3097_v54, %s4675_s15  ;;  %4128 = vmatpush1.bf16.msk.msra.mxu0 %vm5179_vm14, %v6382_v35  ;;  %v7017_v35 = vmov 0  }
 0x629   : > { %3127 = vrot.lane.b32.xlu1 %v3098_v30, %s4675_s15  ;;  %4129 = vmatmul.mubr.msk.bf16.vlgmr.msra.gmra.mxu0 %vm700_vm9, %v4534_v45 }
 0x62a   : > { %3117 = vrot.lane.b32.xlu0 %v3093_v21, %s4675_s15  ;;  %3352 = vmatprep.mubr.bf16.mxu0 %v7017_v35 }
 0x62d   : > { %3119 = vrot.lane.b32.xlu1 %v3094_v43, %s4675_s15 }
 0x62e   : > { %3121 = vrot.lane.b32.xlu0 %v3095_v14, %s4675_s15  ;;  %s6703_s15 = scalar_lea.vmem [#allocation5], %s4883_s19  ;;  %s4158_s19 = sshll.u32 %s4661_s26, 4 }
 0x62f   : > { %s3639_s0 = sshll.u32 %s6703_s15, 4  ;;  %s6729_s0 = int_to_ptr.vmem [resolvable:$true] %s3639_s0 }
 0x630   : > { %s4545_s12 = scalar_lea.vmem %s6729_s0, 1024  ;;  %p4552_p9 = scmp.lt.s32.totalorder %s6729_s0, %s4550_s24 }
 0x631   : > { %4130 = vmatmul.mubr.msk.bf16.gmra.mxu0 %vm700_vm9, %v4536_v57  ;;  %p4546_p6 = scmp.ne.s32.totalorder %s6729_s0, %s4545_s12  ;;  %p4553_p10 = scmp.lt.s32.totalorder %s4551_s30, %s4545_s12 }
 0x632   : > { %3360 = vmatprep.mubr.bf16.mxu0 %v7017_v35 }
 0x633   : > { %p4547_p7 = pnand %p4546_p6, %p4822_p13  ;;  %p4554_p11 = por %p4553_p10, %p4552_p9 }
 0x635   : > { %p4548_p8 = pneg %p4547_p7 }
 0x637   : > { %p4555_p12 = pnand %p4554_p11, %p4548_p8 }
 0x639   : > { %4131 = vmatmul.mubr.msk.bf16.gmra.mxu0 %vm700_vm9, %v4538_v33  ;;  %v4543_v33 = vld [vmem:[%s6809_s3 + $0x170] sm:$0xff]  }
 0x63a   : > { %3368 = vmatprep.mubr.bf16.mxu0 %v7017_v35 }
 0x641   : > { %4132 = vmatmul.mubr.msk.bf16.gmra.mxu0 %vm700_vm9, %v4540_v37 }
 0x642   : > { %3494 = vmatprep.mubr.bf16.mxu0 %v7017_v35 }
 0x68b   : > { %v3140_v1 = vpop.permute.xlu1 %3139 }
 0x68c   : > { %v3134_v21 = vpop.permute.xlu0 %3133 }
 0x68f   : > { %v3132_v48 = vpop.permute.xlu1 %3131 }
 0x690   : > { %v3146_v49 = vsel %vm624_vm10, %v3132_v48, %v3134_v21  ;;  %v3130_v43 = vpop.permute.xlu0 %3129  ;;  %v4542_v21 = vld [vmem:[%s6809_s3 + $0x168] sm:$0xff]  }
 0x691   : > { %3426 = vrot.lane.b32.xlu1 %v3146_v49, %s4677_s11  ;;  %v3145_v38 = vsel %vm624_vm10, %v3130_v43, %v3132_v48  ;;  %v3160_v30 = vsel %vm624_vm10, 0, %v3130_v43  ;;  %v4544_v48 = vld [vmem:[%s6809_s3 + $0x178] sm:$0xff]  }
 0x692   : > { %3424 = vrot.lane.b32.xlu0 %v3145_v38, %s4677_s11 }
 0x693   : > { %v3136_v32 = vpop.permute.xlu1 %3135 }
 0x694   : > { %v3138_v53 = vpop.permute.xlu0 %3137  ;;  %v3163_v12 = vsel %vm624_vm10, 0, %v3136_v32 }
 0x695   : > { %v3148_v2 = vsel %vm624_vm10, %v3138_v53, %v3140_v1  ;;  %3428 = vrot.lane.b32.xlu1 %v3163_v12, %s4677_s11  ;;  %v3147_v4 = vsel %vm624_vm10, %v3136_v32, %v3138_v53  ;;  %v4541_v1 = vld [vmem:[%s6809_s3 + $0x160] sm:$0xff]  }
 0x696   : > { %3432 = vrot.lane.b32.xlu0 %v3148_v2, %s4677_s11  ;;  %3223 = vmatprep.subr.bf16.mxu1 %v3147_v4 }
 0x697   : > { %v3124_v54 = vpop.permute.xlu1 %3123  ;;  %4090 = vmatpush1.bf16.msk.msra.mxu1 %vm5123_vm11, %v3136_v32 }
 0x698   : > { %v3126_v13 = vpop.permute.xlu0 %3125  ;;  %3225 = vmatprep.subr.bf16.mxu1 %v3145_v38  ;;  %v3157_v17 = vsel %vm624_vm10, 0, %v3124_v54 }
 0x699   : > { %3430 = vrot.lane.b32.xlu1 %v3147_v4, %s4677_s11  ;;  %v3143_v9 = vsel %vm624_vm10, %v3124_v54, %v3126_v13 }
 0x69a   : > { %3422 = vrot.lane.b32.xlu0 %v3160_v30, %s4677_s11 }
 0x69b   : > { %v3128_v44 = vpop.permute.xlu1 %3127  ;;  %4092 = vmatpush1.bf16.msk.msra.mxu1 %vm5123_vm11, %v3130_v43 }
 0x69c   : > { %v3118_v14 = vpop.permute.xlu0 %3117  ;;  %3227 = vmatprep.subr.bf16.mxu1 %v3143_v9  ;;  %v3144_v39 = vsel %vm624_vm10, %v3126_v13, %v3128_v44 }
 0x69d   : > { %3418 = vrot.lane.b32.xlu1 %v3143_v9, %s4677_s11  ;;  %v3154_v62 = vsel %vm624_vm10, 0, %v3118_v14 }
 0x69e   : > { %3420 = vrot.lane.b32.xlu0 %v3144_v39, %s4677_s11 }
 0x69f   : > { %v3120_v40 = vpop.permute.xlu1 %3119  ;;  %4094 = vmatpush1.bf16.msk.msra.mxu1 %vm5123_vm11, %v3124_v54 }
 0x6a0   : > { %v3141_v59 = vsel %vm624_vm10, %v3118_v14, %v3120_v40  ;;  %v3122_v27 = vpop.permute.xlu0 %3121 }
 0x6a1   : > { %3416 = vrot.lane.b32.xlu1 %v3157_v17, %s4677_s11  ;;  %3229 = vmatprep.subr.bf16.mxu1 %v3141_v59  ;;  %v3142_v7 = vsel %vm624_vm10, %v3120_v40, %v3122_v27 }
 0x6a2   : > { %3412 = vrot.lane.b32.xlu0 %v3141_v59, %s4677_s11 }
 0x6a3   : > { %4096 = vmatpush1.bf16.msk.msra.mxu1 %vm5123_vm11, %v3118_v14 }
 0x6a5   : > { %3414 = vrot.lane.b32.xlu1 %v3142_v7, %s4677_s11 }
 0x6a6   : > { %3410 = vrot.lane.b32.xlu0 %v3154_v62, %s4677_s11  ;;  %4097 = vmatmul.mubr.msk.bf16.vlgmr.msra.gmra.mxu1 %vm700_vm9, %v4533_v22  ;;  %s3636_s11 = sadd.s32 %s4657_s25, %s4158_s19 }
 0x6a7   : > { %3255 = vmatprep.mubr.bf16.mxu1 %v7017_v35  ;;  %s4159_s26 = sshll.u32 %s3636_s11, 7 }
 0x6a8   : > { %s6738_s23 = scalar_lea.hbm %s6811_s5, %s4159_s26 }
 0x6a9   : > { %3546 = vperm.xlu1 %4496, %v4149_v50  }
 0x6aa   : > { %3551 = vperm.xlu0 %4495, %v4150_v41  }
 0x6ad   : > { %3556 = vperm.xlu1 %4496, %v4151_v56  }
 0x6ae   : > { %3561 = vperm.xlu0 %4495, %v4152_v63   ;;  %4098 = vmatmul.mubr.msk.bf16.gmra.mxu1 %vm700_vm9, %v4535_v42 }
 0x6af   : > { %3263 = vmatprep.mubr.bf16.mxu1 %v7017_v35 }
 0x6b1   : > { %3566 = vperm.xlu1 %4496, %v4153_v60  }
 0x6b2   : > { %3571 = vperm.xlu0 %4495, %v4154_v29  }
 0x6b5   : > { %3576 = vperm.xlu1 %4496, %v4155_v15  }
 0x6b6   : > { %3581 = vperm.xlu0 %4495, %v4156_v8   ;;  %4099 = vmatmul.mubr.msk.bf16.gmra.mxu1 %vm700_vm9, %v4537_v6 }
 0x6b7   : > { %3271 = vmatprep.mubr.bf16.mxu1 %v7017_v35 }
 0x6be   : > { %4100 = vmatmul.mubr.msk.bf16.gmra.mxu1 %vm700_vm9, %v4539_v58 }
 0x6bf   : > { %3502 = vmatprep.mubr.bf16.mxu1 %v7017_v35 }
 0x6e9   : > { %v3346_v11 = vpop.f32.mrf.mxu0 }
 0x6eb   : > { %v6667_v34 = vpop.f32.mrf.mxu0 }
 0x6ed   : > { %v3349_v61 = vpop.f32.mrf.mxu0 }
 0x6ef   : > { %v3350_v49 = vpop.f32.mrf.mxu0 }
 0x6f1   : > { %v3354_v43 = vpop.f32.mrf.mxu0 }
 0x6f3   : > { %v3355_v38 = vpop.f32.mrf.mxu0 }
 0x6f5   : > { %v3357_v32 = vpop.f32.mrf.mxu0 }
 0x6f7   : > { %v3358_v53 = vpop.f32.mrf.mxu0 }
 0x6f9   : > { %v3362_v12 = vpop.f32.mrf.mxu0 }
 0x6fb   : > { %v3363_v37 = vpop.f32.mrf.mxu0 }
 0x6fd   : > { %v3365_v2 = vpop.f32.mrf.mxu0 }
 0x6ff   : > { %v3366_v4 = vpop.f32.mrf.mxu0 }
 0x701   : > { %v3370_v54 = vpop.f32.mrf.mxu0 }
 0x703   : > { %v3427_v3 = vpop.permute.xlu1 %3426  ;;  %v3371_v5 = vpop.f32.mrf.mxu0 }
 0x704   : > { %v3425_v25 = vpop.permute.xlu0 %3424 }
 0x705   : > { %v3439_v31 = vsel %vm1090_vm15, %v3425_v25, %v3427_v3  ;;  %v3373_v13 = vpop.f32.mrf.mxu0 }
 0x706   : > { %v7021_v13 = vld [vmem:[#allocation48_spill] sm:$0xff] }
 0x707   : > { %v3429_v46 = vpop.permute.xlu1 %3428  ;;  %v3374_v58 = vpop.f32.mrf.mxu0 }
 0x708   : > { %v3433_v19 = vpop.permute.xlu0 %3432 }
 0x70b   : > { %v3431_v18 = vpop.permute.xlu1 %3430 }
 0x70c   : > { %v3440_v10 = vsel %vm1090_vm15, %v3429_v46, %v3431_v18  ;;  %v3423_v26 = vpop.permute.xlu0 %3422  ;;  %v3441_v16 = vsel %vm1090_vm15, %v3431_v18, %v3433_v19 }
 0x70d   : > { %3470 = vmatprep.subr.bf16.mxu0 %v3441_v16  ;;  %4378 = vmatprep.subr.bf16.mxu1 %v3441_v16  ;;  %v3438_v36 = vsel %vm1090_vm15, %v3423_v26, %v3425_v25 }
 0x70e   : > { %3471 = vmatpush1.bf16.msra.mxu0 %v3440_v10  ;;  %4382 = vmatpush1.bf16.msra.mxu1 %v3440_v10 }
 0x70f   : > { %3472 = vmatprep.subr.bf16.mxu0 %v3439_v31  ;;  %4379 = vmatprep.subr.bf16.mxu1 %v3439_v31  ;;  %v3419_v28 = vpop.permute.xlu1 %3418 }
 0x710   : > { %v3421_v23 = vpop.permute.xlu0 %3420 }
 0x711   : > { %v3437_v0 = vsel %vm1090_vm15, %v3419_v28, %v3421_v23 }
 0x712   : > { %3473 = vmatpush1.bf16.msra.mxu0 %v3438_v36  ;;  %4383 = vmatpush1.bf16.msra.mxu1 %v3438_v36 }
 0x713   : > { %3474 = vmatprep.subr.bf16.mxu0 %v3437_v0  ;;  %4380 = vmatprep.subr.bf16.mxu1 %v3437_v0  ;;  %v3417_v47 = vpop.permute.xlu1 %3416 }
 0x714   : > { %v3436_v51 = vsel %vm1090_vm15, %v3417_v47, %v3419_v28  ;;  %v3413_v20 = vpop.permute.xlu0 %3412 }
 0x716   : > { %3475 = vmatpush1.bf16.msra.mxu0 %v3436_v51  ;;  %4384 = vmatpush1.bf16.msra.mxu1 %v3436_v51 }
 0x717   : > { %v3415_v55 = vpop.permute.xlu1 %3414 }
 0x718   : > { %v3411_v24 = vpop.permute.xlu0 %3410  ;;  %v3435_v45 = vsel %vm1090_vm15, %v3413_v20, %v3415_v55 }
 0x719   : > { %v3434_v57 = vsel %vm1090_vm15, %v3411_v24, %v3413_v20  ;;  %3476 = vmatprep.subr.bf16.mxu0 %v3435_v45  ;;  %4381 = vmatprep.subr.bf16.mxu1 %v3435_v45 }
 0x71a   : > { %3477 = vmatpush1.bf16.msra.mxu0 %v3434_v57  ;;  %4385 = vmatpush1.bf16.msra.mxu1 %v3434_v57 }
 0x71d   : > { %4145 = vmatmul.mubr.msk.bf16.vlgmr.msra.gmra.mxu0 %vm700_vm9, %v4541_v1  ;;  %4146 = vmatmul.mubr.msk.bf16.vlgmr.msra.gmra.mxu1 %vm700_vm9, %v4542_v21 }
 0x71e   : > { %3510 = vmatprep.mubr.bf16.mxu1 %v7017_v35 }
 0x724   : > { %v3547_v6 = vpop.permute.xlu1 %3546 }
 0x725   : > { %4147 = vmatmul.mubr.msk.bf16.gmra.mxu1 %vm700_vm9, %v4543_v33  ;;  %v3552_v3 = vpop.permute.xlu0 %3551  ;;  %v7019_v33 = vld [vmem:[#allocation45_spill] sm:$0xff] }
 0x726   : > { %3518 = vmatprep.mubr.bf16.mxu1 %v7017_v35 }
 0x728   : > { %v3557_v18 = vpop.permute.xlu1 %3556 }
 0x729   : > { %v3562_v24 = vpop.permute.xlu0 %3561 }
 0x72d   : > { %4148 = vmatmul.mubr.msk.bf16.gmra.mxu1 %vm700_vm9, %v4544_v48 }
 0x766   : > { %v3249_v30 = vpop.f32.mrf.mxu1 }
 0x768   : > { %v3250_v35 = vpop.f32.mrf.mxu1 }
 0x769   : > { %v3348_v25 = vadd.f32 %v6667_v34, %v3250_v35  ;;  %v7022_v35 = vld [vmem:[#allocation44_spill] sm:$0xff] }
 0x76a   : > { %v3252_v9 = vpop.f32.mrf.mxu1 }
 0x76c   : > { %v3253_v44 = vpop.f32.mrf.mxu1 }
 0x76d   : > { %v3351_v14 = vadd.f32 %v3350_v49, %v3253_v44  ;;  %v7020_v49 = vld [vmem:[#allocation40_spill] sm:$0xff] }
 0x76e   : > { %v3257_v39 = vpop.f32.mrf.mxu1 }
 0x770   : > { %v3258_v40 = vpop.f32.mrf.mxu1 }
 0x771   : > { %v3356_v17 = vadd.f32 %v3355_v38, %v3258_v40  ;;  %v3572_v40 = vpop.permute.xlu0 %3571 }
 0x772   : > { %v3260_v59 = vpop.f32.mrf.mxu1 }
 0x774   : > { %v3261_v27 = vpop.f32.mrf.mxu1 }
 0x775   : > { %v3359_v22 = vadd.f32 %v3358_v53, %v3261_v27 }
 0x776   : > { %v3265_v7 = vpop.f32.mrf.mxu1 }
 0x778   : > { %v3266_v62 = vpop.f32.mrf.mxu1 }
 0x779   : > { %v3364_v50 = vadd.f32 %v3363_v37, %v3266_v62  ;;  %v3567_v37 = vpop.permute.xlu1 %3566 }
 0x77a   : > { %v3268_v41 = vpop.f32.mrf.mxu1 }
 0x77c   : > { %v3269_v56 = vpop.f32.mrf.mxu1 }
 0x77d   : > { %v3367_v42 = vadd.f32 %v3366_v4, %v3269_v56  ;;  %v3577_v56 = vpop.permute.xlu1 %3576 }
 0x77e   : > { %v3273_v63 = vpop.f32.mrf.mxu1 }
 0x780   : > { %v3274_v60 = vpop.f32.mrf.mxu1 }
 0x781   : > { %v3372_v29 = vadd.f32 %v3371_v5, %v3274_v60 }
 0x782   : > { %v3276_v15 = vpop.f32.mrf.mxu1 }
 0x784   : > { %v3277_v8 = vpop.f32.mrf.mxu1 }
 0x785   : > { %v3375_v63 = vadd.f32 %v3374_v58, %v3277_v8  ;;  %v7025_v58 = vld [vmem:[#allocation19_spill] sm:$0xff] }
 0x7dd   : > { %v3496_v11 = vpop.f32.mrf.mxu0  ;;  %v3504_v61 = vpop.f32.mrf.mxu1 }
 0x7df   : > { %v3497_v46 = vpop.f32.mrf.mxu0  ;;  %v3505_v19 = vpop.f32.mrf.mxu1 }
 0x7e0   : > { %v3527_v10 = vadd.f32 %v3497_v46, %v3348_v25  ;;  %v3529_v26 = vadd.f32 %v3505_v19, %v3356_v17  ;;  %v3582_v46 = vpop.permute.xlu0 %3581 }
 0x7e1   : > { %v3499_v16 = vpop.f32.mrf.mxu0  ;;  %v3507_v31 = vpop.f32.mrf.mxu1 }
 0x7e2   : > { %v3584_v28 = vadd.f32 %v3547_v6, %v3527_v10  ;;  %v3586_v23 = vadd.f32 %v3557_v18, %v3529_v26  ;;  %v7024_v6 = vld [vmem:[#allocation33_spill] sm:$0xff]  ;;  %v7026_v26 = vld [vmem:[#allocation18_spill] sm:$0xff] }
 0x7e3   : > { %v3500_v36 = vpop.f32.mrf.mxu0  ;;  %v3508_v0 = vpop.f32.mrf.mxu1 }
 0x7e4   : > { %v3592_v47 = vmax.f32 %v3584_v28, 0.0  ;;  %v3594_v51 = vmax.f32 %v3586_v23, 0.0  ;;  %v3528_v20 = vadd.f32 %v3500_v36, %v3351_v14  ;;  %v3530_v55 = vadd.f32 %v3508_v0, %v3359_v22  ;;  %v7023_v22 = vld [vmem:[#allocation34_spill] sm:$0xff] }
 0x7e5   : > { %v3512_v45 = vpop.f32.mrf.mxu1 }
 0x7e6   : > { %v3600_v34 = vsel %vm4917_vm5, %v3592_v47, 0.0  ;;  %v3602_v57 = vsel %vm4917_vm5, %v3594_v51, 0.0  ;;  %v3585_v1 = vadd.f32 %v3552_v3, %v3528_v20  ;;  %v3587_v21 = vadd.f32 %v3562_v24, %v3530_v55 }
 0x7e7   : > { %v3608_v48 = vadd.f32 %v3600_v34, %v7019_v33  ;;  %v3610_v43 = vadd.f32 %v3602_v57, %v7020_v49  ;;  %v3513_v38 = vpop.f32.mrf.mxu1 }
 0x7e8   : > { %v3593_v32 = vmax.f32 %v3585_v1, 0.0  ;;  %v3595_v53 = vmax.f32 %v3587_v21, 0.0  ;;  %v3531_v12 = vadd.f32 %v3513_v38, %v3364_v50 }
 0x7e9   : > { %3616 = vst [vmem:[%s6703_s15] sm:$0xff] %v3608_v48  ;;  %3618 = vst [vmem:[%s6703_s15 + $0x10] sm:$0xff] %v3610_v43  ;;  %v3515_v2 = vpop.f32.mrf.mxu1 }
 0x7ea   : > { %v3601_v4 = vsel %vm4917_vm5, %v3593_v32, 0.0  ;;  %v3603_v54 = vsel %vm4917_vm5, %v3595_v53, 0.0  ;;  %v3588_v5 = vadd.f32 %v3567_v37, %v3531_v12 }
 0x7eb   : > { %v3609_v30 = vadd.f32 %v3601_v4, %v7021_v13  ;;  %v3611_v9 = vadd.f32 %v3603_v54, %v7022_v35  ;;  %v3516_v44 = vpop.f32.mrf.mxu1 }
 0x7ec   : > { %v3596_v14 = vmax.f32 %v3588_v5, 0.0  ;;  %v3532_v39 = vadd.f32 %v3516_v44, %v3367_v42 }
 0x7ed   : > { %3617 = vst [vmem:[%s6703_s15 + $0x8] sm:$0xff] %v3609_v30  ;;  %3619 = vst [vmem:[%s6703_s15 + $0x18] sm:$0xff] %v3611_v9  ;;  %v3520_v17 = vpop.f32.mrf.mxu1 }
 0x7ee   : > { %v3604_v59 = vsel %vm4917_vm5, %v3596_v14, 0.0  ;;  %v3589_v27 = vadd.f32 %v3572_v40, %v3532_v39 }
 0x7ef   : > { %v3612_v7 = vadd.f32 %v3604_v59, %v7023_v22  ;;  %v3521_v62 = vpop.f32.mrf.mxu1 }
 0x7f0   : > { %v3597_v50 = vmax.f32 %v3589_v27, 0.0  ;;  %v3533_v41 = vadd.f32 %v3521_v62, %v3372_v29 }
 0x7f1   : > { %3620 = vst [vmem:[%s6703_s15 + $0x20] sm:$0xff] %v3612_v7  ;;  %v3523_v42 = vpop.f32.mrf.mxu1 }
 0x7f2   : > { %v3605_v60 = vsel %vm4917_vm5, %v3597_v50, 0.0  ;;  %v3590_v15 = vadd.f32 %v3577_v56, %v3533_v41 }
 0x7f3   : > { %v3613_v11 = vadd.f32 %v3605_v60, %v7024_v6  ;;  %v3524_v61 = vpop.f32.mrf.mxu1 }
 0x7f4   : > { %v3598_v3 = vmax.f32 %v3590_v15, 0.0  ;;  %v3534_v25 = vadd.f32 %v3524_v61, %v3375_v63 }
 0x7f5   : > { %3621 = vst [vmem:[%s6703_s15 + $0x28] sm:$0xff] %v3613_v11 }
 0x7f6   : > { %v3606_v29 = vsel %vm4917_vm5, %v3598_v3, 0.0  ;;  %v3591_v8 = vadd.f32 %v3582_v46, %v3534_v25 }
 0x7f7   : > { %v3614_v19 = vadd.f32 %v3606_v29, %v7025_v58 }
 0x7f8   : > { %v3599_v18 = vmax.f32 %v3591_v8, 0.0 }
 0x7f9   : > { %3622 = vst [vmem:[%s6703_s15 + $0x30] sm:$0xff] %v3614_v19 }
 0x7fa   : > { %v3607_v10 = vsel %vm4917_vm5, %v3599_v18, 0.0 }
 0x7fb   : > { %v3615_v16 = vadd.f32 %v3607_v10, %v7026_v26 }
 0x7fd   : > { %3623 = vst [vmem:[%s6703_s15 + $0x38] sm:$0xff] %v3615_v16 }
 0x7fe   : > { %4558 = shalt.err (!%p4555_p12)
}
 0x7ff   : > { %s4559_s17 = scalar_lea.hbm %s6738_s23, 1024  ;;  %s4563_s15 = scalar_lea.hbm %s6811_s5, 4096 }
 0x800   : > { %p4560_p0 = scmp.ne.s32.totalorder %s6738_s23, %s4559_s17  ;;  %p4564_p4 = scmp.lt.s32.totalorder %s6738_s23, %s6811_s5 }
 0x801   : > { %p4565_p5 = scmp.lt.s32.totalorder %s4563_s15, %s4559_s17 }
 0x802   : > { %p4561_p2 = pnand %p4560_p0, %p4822_p13 }
 0x803   : > { %p4566_p6 = por %p4565_p5, %p4564_p4 }
 0x804   : > { %p4562_p3 = pneg %p4561_p2 }
 0x806   : > { %p4567_p7 = pnand %p4566_p6, %p4562_p3 }
 0x808   : > { %4570 = shalt.err (!%p4567_p7)
}
 0x809   : > { %s4679_s26 = smov 128   ;;  %s4680_s25 = smov 256  }
 0x80a   : > { %s4681_s8 = smov 8  }
 0x80b   : > { %4386 = dma.vmem_to_hbm [thread:$0]  (%p4822_p13), %s6729_s0, 1024, %s6738_s23, %s6743_s7, %s4679_s26, %s4680_s25, %s4681_s8  }
 0x80c PF: > { %p4392_p8 = scmp.ge.s32.totalorder %s4673_s29, 2  ;;  %s3654_s12 = sand.u32 1, %s4629_s18  }
 0x80d   : > { %s3655_s16 = scalar_lea.sflag [#allocation6], %s3654_s12 }
 0x80e   : > { %p4389_p9 = pnand %p4392_p8, %p4830_p1 }
 0x810   : > { %p4390_p10 = pneg %p4389_p9 }
 0x812   : > { %4620 = dma.done.wait (%p4390_p10), %s3655_s16, 1024  }
 0x813   : > { %4622 = vsyncadd (%p4390_p10), %s3655_s16, 4294966272  ;;  %s18_s29 = sadd.s32 1, %s4673_s29   ;;  %s7027_s9 = sld [smem:[#allocation12_spill]] }
 0x814   : > { %p15_p11 = scmp.ge.s32.totalorder %s18_s29, 6   ;;  %s7028_s23 = sld [smem:[#allocation8_spill]] }
 0x815   : > { %s7029_s24 = sld [smem:[#allocation11_spill]]  ;;  %s7032_s18 = smov %s4641_s21 }
 0x816   : > { %s7030_s0 = sld [smem:[#allocation9_spill]]  ;;  %s7033_s19 = smov %s4637_s20 }
 0x817   : > { %s7031_s7 = sld [smem:[#allocation10_spill]]  ;;  %s7034_s20 = smov %s4828_s13 }
 0x818   : > { %s7035_s21 = smov %s4645_s22  ;;  %s7037_s25 = smov %s4665_s27 }
 0x819   : > { %s7036_s22 = smov %s7027_s9  ;;  %s7038_s26 = smov %s4669_s28 }
 0x81a   :  { %17 = sbr.rel (!%p15_p11) target bundleno = 9 (0x9), region = 224 }
 0x81c   : > { %s7039_s27 = smov %s7030_s0 }
 0x81d   : > { %s7040_s28 = smov %s7031_s7 }
 0x81f   :  { %3660 = vsyncpa [#allocation6], 1 }
 0x820   :  { %3662 = vsyncpa [#allocation6 + $0x1], 1 }

</bundles_post_ra>
